<compile_context>
chip_gen: v6e
topology: v6e:2x2x1
jax: 0.10.0
libtpu: 0.0.40
codegen_flags: <defaults>
</compile_context>

<pallas_src>
import jax
import jax.numpy as jnp
from jax import lax
from jax.experimental import pallas as pl
from jax.experimental.pallas import tpu as pltpu

# Scaled-down versions of the PyTorch defaults (300 / 36 / 2048 / 512) so the
# whole problem is small and TPU-tile friendly.
Q_VOCAB = 100     # question_vocab_size
A_VOCAB = 32      # answer_vocab_size
A_PAD = 128       # lane-dense padded answer dimension (sliced back to A_VOCAB)
WORD_DIM = 128    # word_vector_length
N_LOC = 8         # image_location_number
IMG_FEAT = 256    # image_features_size
EMB = 128         # embedding_size
BATCH = 2
SEQ = 8
B_MIN = 8         # pad batch to at least 8 rows (f32 sublane) for the MXU


def _ght(x, w, b, wg, bg):
    """GatedHyperbolicTangent: tanh(x@W + b) * sigmoid(x@Wg + bg)."""
    y = jnp.dot(x, w, preferred_element_type=jnp.float32) + b
    g = jnp.dot(x, wg, preferred_element_type=jnp.float32) + bg
    return jnp.tanh(y) * jax.nn.sigmoid(g)


def vqa_kernel(x_ref, img_ref,
               wih_ref, whh_ref, bih_ref, bhh_ref,
               wf_img_ref, wf_hid_ref, bf_ref,
               wfg_img_ref, wfg_hid_ref, bfg_ref,
               watt_ref, batt_ref,
               wv_ref, bv_ref, wvg_ref, bvg_ref,
               wq_ref, bq_ref, wqg_ref, bqg_ref,
               wo_ref, bo_ref, wog_ref, bog_ref,
               wout_ref, bout_ref,
               out_ref):
    B, L, F = img_ref.shape
    TB, W = x_ref.shape
    T = TB // B
    H = whh_ref.shape[0]

    # ---- GRU over the question (nn.GRU equations, h0 = 0) -------------------
    # Input projection hoisted out of the recurrence: one big MXU push over all
    # T*B rows (bih folded in here once).  Only h@whh remains per step.
    x = x_ref[...]                                                # (T*B, W)
    gi_all = (jnp.dot(x, wih_ref[...], preferred_element_type=jnp.float32)
              + bih_ref[...]).reshape(T, B, 3 * H)                # [r|z|n]
    whh = whh_ref[...]                                            # (H, 3H)
    bhh = jnp.broadcast_to(bhh_ref[...], (B, 3 * H))              # hoisted once

    h = jnp.zeros((B, H), dtype=jnp.float32)
    for t in range(T):                                            # T small; static slices
        gi = gi_all[t]                                            # (B, 3H)
        gh = jnp.dot(h, whh, preferred_element_type=jnp.float32) + bhh
        rz = jax.nn.sigmoid(gi[:, :2 * H] + gh[:, :2 * H])
        r = rz[:, :H]
        z = rz[:, H:]
        n = jnp.tanh(gi[:, 2 * H:] + r * gh[:, 2 * H:])           # bhh_n inside r*( )
        h = (1.0 - z) * n + z * h
    hidden = h                                                    # (B, H)

    # ---- F.normalize(image): L2 over dim=1 (locations), rsqrt on the EUP ----
    img = img_ref[...]                                            # (B, L, F)
    sumsq = jnp.sum(img * img, axis=1, keepdims=True)             # (B, 1, F)
    img_n = img * lax.rsqrt(jnp.maximum(sumsq, 1e-24))

    # ---- fusion GHT on concat([image, tiled hidden], -1), decomposed --------
    img2d = img_n.reshape(B * L, F)
    hid_f = jnp.dot(hidden, wf_hid_ref[...], preferred_element_type=jnp.float32)
    hid_g = jnp.dot(hidden, wfg_hid_ref[...], preferred_element_type=jnp.float32)
    fy = (jnp.dot(img2d, wf_img_ref[...], preferred_element_type=jnp.float32)
          .reshape(B, L, H) + hid_f[:, None, :] + bf_ref[...])
    fg = (jnp.dot(img2d, wfg_img_ref[...], preferred_element_type=jnp.float32)
          .reshape(B, L, H) + hid_g[:, None, :] + bfg_ref[...])
    fusion = jnp.tanh(fy) * jax.nn.sigmoid(fg)                    # (B, L, H)

    # ---- attention logits: N=1 matmul -> VPU multiply + XLU lane reduce -----
    watt = watt_ref[...].reshape(1, 1, H)                         # hoisted broadcast
    att = jnp.sum(fusion * watt, axis=-1) + batt_ref[...]         # (B, L)
    att = att - jnp.max(att, axis=1, keepdims=True)
    e = jnp.exp(att)
    attn = e * pl.reciprocal(jnp.sum(e, axis=1, keepdims=True), approx=True)

    # ---- attended image vector: bmm((B,1,L),(B,L,F)).squeeze() -> (B, F) ----
    v = jnp.sum(attn[:, :, None] * img_n, axis=1)

    # ---- gated tanh branches, elementwise fusion, lane-dense output head ----
    v = _ght(v, wv_ref[...], bv_ref[...], wvg_ref[...], bvg_ref[...])
    q = _ght(hidden, wq_ref[...], bq_ref[...], wqg_ref[...], bqg_ref[...])
    res = _ght(q * v, wo_ref[...], bo_ref[...], wog_ref[...], bog_ref[...])
    logits = (jnp.dot(res, wout_ref[...], preferred_element_type=jnp.float32)
              + bout_ref[...])                                    # (B, A_PAD)
    out_ref[...] = jax.nn.sigmoid(logits)


def init_params(key):
    def uni(k, shape, fan_in):
        bound = 1.0 / float(fan_in) ** 0.5
        return jax.random.uniform(k, shape, jnp.float32, -bound, bound)

    keys = iter(jax.random.split(key, 40))
    p = {}
    p['emb'] = jax.random.normal(next(keys), (Q_VOCAB, WORD_DIM), jnp.float32)
    # GRU weights stored transposed as (in_features, 3H), gate order [r|z|n]
    p['w_ih'] = uni(next(keys), (WORD_DIM, 3 * EMB), EMB)
    p['w_hh'] = uni(next(keys), (EMB, 3 * EMB), EMB)
    p['b_ih'] = uni(next(keys), (1, 3 * EMB), EMB)
    p['b_hh'] = uni(next(keys), (1, 3 * EMB), EMB)
    # fusion GHT: Linear(F+H -> H) x2, split into image/hidden blocks
    fin = IMG_FEAT + EMB
    p['wf_img'] = uni(next(keys), (IMG_FEAT, EMB), fin)
    p['wf_hid'] = uni(next(keys), (EMB, EMB), fin)
    p['bf'] = uni(next(keys), (1, EMB), fin)
    p['wfg_img'] = uni(next(keys), (IMG_FEAT, EMB), fin)
    p['wfg_hid'] = uni(next(keys), (EMB, EMB), fin)
    p['bfg'] = uni(next(keys), (1, EMB), fin)
    # attention: Linear(EMB -> 1)
    p['w_att'] = uni(next(keys), (EMB, 1), EMB)
    p['b_att'] = uni(next(keys), (1, 1), EMB)
    # v_ght (F -> H), question_ght (H -> H), output_ght (H -> H)
    p['wv'] = uni(next(keys), (IMG_FEAT, EMB), IMG_FEAT)
    p['bv'] = uni(next(keys), (1, EMB), IMG_FEAT)
    p['wvg'] = uni(next(keys), (IMG_FEAT, EMB), IMG_FEAT)
    p['bvg'] = uni(next(keys), (1, EMB), IMG_FEAT)
    p['wq'] = uni(next(keys), (EMB, EMB), EMB)
    p['bq'] = uni(next(keys), (1, EMB), EMB)
    p['wqg'] = uni(next(keys), (EMB, EMB), EMB)
    p['bqg'] = uni(next(keys), (1, EMB), EMB)
    p['wo'] = uni(next(keys), (EMB, EMB), EMB)
    p['bo'] = uni(next(keys), (1, EMB), EMB)
    p['wog'] = uni(next(keys), (EMB, EMB), EMB)
    p['bog'] = uni(next(keys), (1, EMB), EMB)
    # output head: Linear(EMB -> answer_vocab_size)
    p['w_out'] = uni(next(keys), (EMB, A_VOCAB), EMB)
    p['b_out'] = uni(next(keys), (1, A_VOCAB), EMB)
    return p


@jax.jit
def network_forward(question, image, params):
    B, T = question.shape

    # Pad batch so every matmul in the kernel fills at least the 8 f32 sublanes.
    B_pad = max(B_MIN, ((B + 7) // 8) * 8)
    q_pad = jnp.zeros((B_pad, T), question.dtype).at[:B].set(question)
    img_pad = jnp.zeros((B_pad,) + image.shape[1:], jnp.float32).at[:B].set(
        image.astype(jnp.float32))

    # Embedding lookup (gather) is glue, done in plain JAX; feed the kernel a
    # dense (T*B_pad, W) row slab (== .permute(1,0,2) flattened over time/batch).
    x_emb = jnp.take(params['emb'], q_pad, axis=0)            # (B_pad, T, W)
    x_emb = jnp.transpose(x_emb, (1, 0, 2)).reshape(T * B_pad, WORD_DIM)

    # Lane-dense output head: pad answer vocab to 128 lanes, slice back after.
    w_out = jnp.pad(params['w_out'], ((0, 0), (0, A_PAD - A_VOCAB)))
    b_out = jnp.pad(params['b_out'], ((0, 0), (0, A_PAD - A_VOCAB)))
    # Attention weight as a (1, EMB) row for the in-kernel VPU/XLU reduction.
    w_att = params['w_att'].T

    args = [x_emb, img_pad,
            params['w_ih'], params['w_hh'], params['b_ih'], params['b_hh'],
            params['wf_img'], params['wf_hid'], params['bf'],
            params['wfg_img'], params['wfg_hid'], params['bfg'],
            w_att, params['b_att'],
            params['wv'], params['bv'], params['wvg'], params['bvg'],
            params['wq'], params['bq'], params['wqg'], params['bqg'],
            params['wo'], params['bo'], params['wog'], params['bog'],
            w_out, b_out]

    # TODO(synk): at real model sizes (2048/512) tile the big fusion/v weights
    # over a K grid axis (BlockSpec) and shard a batch grid axis "parallel"
    # for the second v7x TensorCore; at toy size a single program suffices.
    out = pl.pallas_call(
        vqa_kernel,
        out_shape=jax.ShapeDtypeStruct((B_pad, A_PAD), jnp.float32),
        in_specs=[pl.BlockSpec(memory_space=pltpu.MemorySpace.VMEM)
                  for _ in args],
        out_specs=pl.BlockSpec(memory_space=pltpu.MemorySpace.VMEM),
        compiler_params=pltpu.CompilerParams(vmem_limit_bytes=64 * 1024 * 1024),
    )(*args)

    return out[:B, :A_VOCAB]


if __name__ == "__main__":
    key = jax.random.PRNGKey(0)
    kp, kq, ki = jax.random.split(key, 3)
    params = init_params(kp)
    question = jax.random.randint(kq, (BATCH, SEQ), 0, Q_VOCAB, dtype=jnp.int32)
    image = jax.random.normal(ki, (BATCH, N_LOC, IMG_FEAT), jnp.float32)

    out = network_forward(question, image, params)
    out = jax.block_until_ready(out)
    assert out.shape == (BATCH, A_VOCAB)
    assert bool(jnp.all(jnp.isfinite(out)))
    assert bool(jnp.all((out >= 0.0) & (out <= 1.0)))   # sigmoid output
    print("KERNEL_OK")
</pallas_src>

<mosaic_0001>
module attributes {stable_mosaic.version = 11 : i64} {
  func.func @vqa_kernel(%arg0: memref<64x128xf32, #tpu.memory_space<vmem>>, %arg1: memref<8x8x256xf32, #tpu.memory_space<vmem>>, %arg2: memref<128x384xf32, #tpu.memory_space<vmem>>, %arg3: memref<128x384xf32, #tpu.memory_space<vmem>>, %arg4: memref<1x384xf32, #tpu.memory_space<vmem>>, %arg5: memref<1x384xf32, #tpu.memory_space<vmem>>, %arg6: memref<256x128xf32, #tpu.memory_space<vmem>>, %arg7: memref<128x128xf32, #tpu.memory_space<vmem>>, %arg8: memref<1x128xf32, #tpu.memory_space<vmem>>, %arg9: memref<256x128xf32, #tpu.memory_space<vmem>>, %arg10: memref<128x128xf32, #tpu.memory_space<vmem>>, %arg11: memref<1x128xf32, #tpu.memory_space<vmem>>, %arg12: memref<1x128xf32, #tpu.memory_space<vmem>>, %arg13: memref<1x1xf32, #tpu.memory_space<vmem>>, %arg14: memref<256x128xf32, #tpu.memory_space<vmem>>, %arg15: memref<1x128xf32, #tpu.memory_space<vmem>>, %arg16: memref<256x128xf32, #tpu.memory_space<vmem>>, %arg17: memref<1x128xf32, #tpu.memory_space<vmem>>, %arg18: memref<128x128xf32, #tpu.memory_space<vmem>>, %arg19: memref<1x128xf32, #tpu.memory_space<vmem>>, %arg20: memref<128x128xf32, #tpu.memory_space<vmem>>, %arg21: memref<1x128xf32, #tpu.memory_space<vmem>>, %arg22: memref<128x128xf32, #tpu.memory_space<vmem>>, %arg23: memref<1x128xf32, #tpu.memory_space<vmem>>, %arg24: memref<128x128xf32, #tpu.memory_space<vmem>>, %arg25: memref<1x128xf32, #tpu.memory_space<vmem>>, %arg26: memref<128x128xf32, #tpu.memory_space<vmem>>, %arg27: memref<1x128xf32, #tpu.memory_space<vmem>>, %arg28: memref<8x128xf32, #tpu.memory_space<vmem>>) attributes {dimension_semantics = [], scalar_prefetch = 0 : i64, scratch_operands = 0 : i64, tpu.core_type = #tpu.core_type<tc>} {
    %c0 = arith.constant 0 : index
    %c0_0 = arith.constant 0 : index
    %0 = vector.load %arg0[%c0, %c0_0] : memref<64x128xf32, #tpu.memory_space<vmem>>, vector<64x128xf32>
    %c0_1 = arith.constant 0 : index
    %c0_2 = arith.constant 0 : index
    %1 = vector.load %arg2[%c0_1, %c0_2] : memref<128x384xf32, #tpu.memory_space<vmem>>, vector<128x384xf32>
    %cst = arith.constant dense<0.000000e+00> : vector<64x384xf32>
    %2 = tpu.matmul %0, %1, %cst {dimension_numbers = #tpu.dot_dimension_numbers<[1], [0], [0], [1], [0, 0, 1, 1], [], []>} : vector<64x128xf32>, vector<128x384xf32>, vector<64x384xf32> -> vector<64x384xf32>
    %c0_3 = arith.constant 0 : index
    %c0_4 = arith.constant 0 : index
    %3 = vector.load %arg4[%c0_3, %c0_4] : memref<1x384xf32, #tpu.memory_space<vmem>>, vector<1x384xf32>
    %4 = vector.broadcast %3 : vector<1x384xf32> to vector<64x384xf32>
    %5 = arith.addf %2, %4 : vector<64x384xf32>
    %6 = vector.shape_cast %5 : vector<64x384xf32> to vector<8x8x384xf32>
    %c0_5 = arith.constant 0 : index
    %c0_6 = arith.constant 0 : index
    %7 = vector.load %arg3[%c0_5, %c0_6] : memref<128x384xf32, #tpu.memory_space<vmem>>, vector<128x384xf32>
    %c0_7 = arith.constant 0 : index
    %c0_8 = arith.constant 0 : index
    %8 = vector.load %arg5[%c0_7, %c0_8] : memref<1x384xf32, #tpu.memory_space<vmem>>, vector<1x384xf32>
    %9 = vector.shape_cast %8 : vector<1x384xf32> to vector<1x384xf32>
    %10 = vector.broadcast %9 : vector<1x384xf32> to vector<8x384xf32>
    %cst_9 = arith.constant 0.000000e+00 : f32
    %11 = vector.broadcast %cst_9 : f32 to vector<8x128xf32>
    %12 = vector.extract_strided_slice %6 {offsets = [0, 0, 0], sizes = [1, 8, 384], strides = [1, 1, 1]} : vector<8x8x384xf32> to vector<1x8x384xf32>
    %13 = vector.shape_cast %12 : vector<1x8x384xf32> to vector<8x384xf32>
    %cst_10 = arith.constant dense<0.000000e+00> : vector<8x384xf32>
    %14 = tpu.matmul %11, %7, %cst_10 {dimension_numbers = #tpu.dot_dimension_numbers<[1], [0], [0], [1], [0, 0, 1, 1], [], []>} : vector<8x128xf32>, vector<128x384xf32>, vector<8x384xf32> -> vector<8x384xf32>
    %15 = arith.addf %14, %10 : vector<8x384xf32>
    %16 = vector.extract_strided_slice %13 {offsets = [0, 0], sizes = [8, 256], strides = [1, 1]} : vector<8x384xf32> to vector<8x256xf32>
    %17 = vector.extract_strided_slice %15 {offsets = [0, 0], sizes = [8, 256], strides = [1, 1]} : vector<8x384xf32> to vector<8x256xf32>
    %18 = arith.addf %16, %17 : vector<8x256xf32>
    %19 = arith.negf %18 : vector<8x256xf32>
    %20 = math.exp %19 : vector<8x256xf32>
    %cst_11 = arith.constant 1.000000e+00 : f32
    %21 = vector.broadcast %cst_11 : f32 to vector<8x256xf32>
    %22 = arith.addf %21, %20 : vector<8x256xf32>
    %23 = arith.divf %21, %22 : vector<8x256xf32>
    %24 = vector.extract_strided_slice %23 {offsets = [0, 0], sizes = [8, 128], strides = [1, 1]} : vector<8x256xf32> to vector<8x128xf32>
    %25 = vector.extract_strided_slice %23 {offsets = [0, 128], sizes = [8, 128], strides = [1, 1]} : vector<8x256xf32> to vector<8x128xf32>
    %26 = vector.extract_strided_slice %13 {offsets = [0, 256], sizes = [8, 128], strides = [1, 1]} : vector<8x384xf32> to vector<8x128xf32>
    %27 = vector.extract_strided_slice %15 {offsets = [0, 256], sizes = [8, 128], strides = [1, 1]} : vector<8x384xf32> to vector<8x128xf32>
    %28 = arith.mulf %24, %27 : vector<8x128xf32>
    %29 = arith.addf %26, %28 : vector<8x128xf32>
    %30 = math.tanh %29 : vector<8x128xf32>
    %cst_12 = arith.constant 1.000000e+00 : f32
    %31 = vector.broadcast %cst_12 : f32 to vector<8x128xf32>
    %32 = arith.subf %31, %25 : vector<8x128xf32>
    %33 = arith.mulf %32, %30 : vector<8x128xf32>
    %34 = arith.mulf %25, %11 : vector<8x128xf32>
    %35 = arith.addf %33, %34 : vector<8x128xf32>
    %36 = vector.extract_strided_slice %6 {offsets = [1, 0, 0], sizes = [1, 8, 384], strides = [1, 1, 1]} : vector<8x8x384xf32> to vector<1x8x384xf32>
    %37 = vector.shape_cast %36 : vector<1x8x384xf32> to vector<8x384xf32>
    %cst_13 = arith.constant dense<0.000000e+00> : vector<8x384xf32>
    %38 = tpu.matmul %35, %7, %cst_13 {dimension_numbers = #tpu.dot_dimension_numbers<[1], [0], [0], [1], [0, 0, 1, 1], [], []>} : vector<8x128xf32>, vector<128x384xf32>, vector<8x384xf32> -> vector<8x384xf32>
    %39 = arith.addf %38, %10 : vector<8x384xf32>
    %40 = vector.extract_strided_slice %37 {offsets = [0, 0], sizes = [8, 256], strides = [1, 1]} : vector<8x384xf32> to vector<8x256xf32>
    %41 = vector.extract_strided_slice %39 {offsets = [0, 0], sizes = [8, 256], strides = [1, 1]} : vector<8x384xf32> to vector<8x256xf32>
    %42 = arith.addf %40, %41 : vector<8x256xf32>
    %43 = arith.negf %42 : vector<8x256xf32>
    %44 = math.exp %43 : vector<8x256xf32>
    %cst_14 = arith.constant 1.000000e+00 : f32
    %45 = vector.broadcast %cst_14 : f32 to vector<8x256xf32>
    %46 = arith.addf %45, %44 : vector<8x256xf32>
    %47 = arith.divf %45, %46 : vector<8x256xf32>
    %48 = vector.extract_strided_slice %47 {offsets = [0, 0], sizes = [8, 128], strides = [1, 1]} : vector<8x256xf32> to vector<8x128xf32>
    %49 = vector.extract_strided_slice %47 {offsets = [0, 128], sizes = [8, 128], strides = [1, 1]} : vector<8x256xf32> to vector<8x128xf32>
    %50 = vector.extract_strided_slice %37 {offsets = [0, 256], sizes = [8, 128], strides = [1, 1]} : vector<8x384xf32> to vector<8x128xf32>
    %51 = vector.extract_strided_slice %39 {offsets = [0, 256], sizes = [8, 128], strides = [1, 1]} : vector<8x384xf32> to vector<8x128xf32>
    %52 = arith.mulf %48, %51 : vector<8x128xf32>
    %53 = arith.addf %50, %52 : vector<8x128xf32>
    %54 = math.tanh %53 : vector<8x128xf32>
    %cst_15 = arith.constant 1.000000e+00 : f32
    %55 = vector.broadcast %cst_15 : f32 to vector<8x128xf32>
    %56 = arith.subf %55, %49 : vector<8x128xf32>
    %57 = arith.mulf %56, %54 : vector<8x128xf32>
    %58 = arith.mulf %49, %35 : vector<8x128xf32>
    %59 = arith.addf %57, %58 : vector<8x128xf32>
    %60 = vector.extract_strided_slice %6 {offsets = [2, 0, 0], sizes = [1, 8, 384], strides = [1, 1, 1]} : vector<8x8x384xf32> to vector<1x8x384xf32>
    %61 = vector.shape_cast %60 : vector<1x8x384xf32> to vector<8x384xf32>
    %cst_16 = arith.constant dense<0.000000e+00> : vector<8x384xf32>
    %62 = tpu.matmul %59, %7, %cst_16 {dimension_numbers = #tpu.dot_dimension_numbers<[1], [0], [0], [1], [0, 0, 1, 1], [], []>} : vector<8x128xf32>, vector<128x384xf32>, vector<8x384xf32> -> vector<8x384xf32>
    %63 = arith.addf %62, %10 : vector<8x384xf32>
    %64 = vector.extract_strided_slice %61 {offsets = [0, 0], sizes = [8, 256], strides = [1, 1]} : vector<8x384xf32> to vector<8x256xf32>
    %65 = vector.extract_strided_slice %63 {offsets = [0, 0], sizes = [8, 256], strides = [1, 1]} : vector<8x384xf32> to vector<8x256xf32>
    %66 = arith.addf %64, %65 : vector<8x256xf32>
    %67 = arith.negf %66 : vector<8x256xf32>
    %68 = math.exp %67 : vector<8x256xf32>
    %cst_17 = arith.constant 1.000000e+00 : f32
    %69 = vector.broadcast %cst_17 : f32 to vector<8x256xf32>
    %70 = arith.addf %69, %68 : vector<8x256xf32>
    %71 = arith.divf %69, %70 : vector<8x256xf32>
    %72 = vector.extract_strided_slice %71 {offsets = [0, 0], sizes = [8, 128], strides = [1, 1]} : vector<8x256xf32> to vector<8x128xf32>
    %73 = vector.extract_strided_slice %71 {offsets = [0, 128], sizes = [8, 128], strides = [1, 1]} : vector<8x256xf32> to vector<8x128xf32>
    %74 = vector.extract_strided_slice %61 {offsets = [0, 256], sizes = [8, 128], strides = [1, 1]} : vector<8x384xf32> to vector<8x128xf32>
    %75 = vector.extract_strided_slice %63 {offsets = [0, 256], sizes = [8, 128], strides = [1, 1]} : vector<8x384xf32> to vector<8x128xf32>
    %76 = arith.mulf %72, %75 : vector<8x128xf32>
    %77 = arith.addf %74, %76 : vector<8x128xf32>
    %78 = math.tanh %77 : vector<8x128xf32>
    %cst_18 = arith.constant 1.000000e+00 : f32
    %79 = vector.broadcast %cst_18 : f32 to vector<8x128xf32>
    %80 = arith.subf %79, %73 : vector<8x128xf32>
    %81 = arith.mulf %80, %78 : vector<8x128xf32>
    %82 = arith.mulf %73, %59 : vector<8x128xf32>
    %83 = arith.addf %81, %82 : vector<8x128xf32>
    %84 = vector.extract_strided_slice %6 {offsets = [3, 0, 0], sizes = [1, 8, 384], strides = [1, 1, 1]} : vector<8x8x384xf32> to vector<1x8x384xf32>
    %85 = vector.shape_cast %84 : vector<1x8x384xf32> to vector<8x384xf32>
    %cst_19 = arith.constant dense<0.000000e+00> : vector<8x384xf32>
    %86 = tpu.matmul %83, %7, %cst_19 {dimension_numbers = #tpu.dot_dimension_numbers<[1], [0], [0], [1], [0, 0, 1, 1], [], []>} : vector<8x128xf32>, vector<128x384xf32>, vector<8x384xf32> -> vector<8x384xf32>
    %87 = arith.addf %86, %10 : vector<8x384xf32>
    %88 = vector.extract_strided_slice %85 {offsets = [0, 0], sizes = [8, 256], strides = [1, 1]} : vector<8x384xf32> to vector<8x256xf32>
    %89 = vector.extract_strided_slice %87 {offsets = [0, 0], sizes = [8, 256], strides = [1, 1]} : vector<8x384xf32> to vector<8x256xf32>
    %90 = arith.addf %88, %89 : vector<8x256xf32>
    %91 = arith.negf %90 : vector<8x256xf32>
    %92 = math.exp %91 : vector<8x256xf32>
    %cst_20 = arith.constant 1.000000e+00 : f32
    %93 = vector.broadcast %cst_20 : f32 to vector<8x256xf32>
    %94 = arith.addf %93, %92 : vector<8x256xf32>
    %95 = arith.divf %93, %94 : vector<8x256xf32>
    %96 = vector.extract_strided_slice %95 {offsets = [0, 0], sizes = [8, 128], strides = [1, 1]} : vector<8x256xf32> to vector<8x128xf32>
    %97 = vector.extract_strided_slice %95 {offsets = [0, 128], sizes = [8, 128], strides = [1, 1]} : vector<8x256xf32> to vector<8x128xf32>
    %98 = vector.extract_strided_slice %85 {offsets = [0, 256], sizes = [8, 128], strides = [1, 1]} : vector<8x384xf32> to vector<8x128xf32>
    %99 = vector.extract_strided_slice %87 {offsets = [0, 256], sizes = [8, 128], strides = [1, 1]} : vector<8x384xf32> to vector<8x128xf32>
    %100 = arith.mulf %96, %99 : vector<8x128xf32>
    %101 = arith.addf %98, %100 : vector<8x128xf32>
    %102 = math.tanh %101 : vector<8x128xf32>
    %cst_21 = arith.constant 1.000000e+00 : f32
    %103 = vector.broadcast %cst_21 : f32 to vector<8x128xf32>
    %104 = arith.subf %103, %97 : vector<8x128xf32>
    %105 = arith.mulf %104, %102 : vector<8x128xf32>
    %106 = arith.mulf %97, %83 : vector<8x128xf32>
    %107 = arith.addf %105, %106 : vector<8x128xf32>
    %108 = vector.extract_strided_slice %6 {offsets = [4, 0, 0], sizes = [1, 8, 384], strides = [1, 1, 1]} : vector<8x8x384xf32> to vector<1x8x384xf32>
    %109 = vector.shape_cast %108 : vector<1x8x384xf32> to vector<8x384xf32>
    %cst_22 = arith.constant dense<0.000000e+00> : vector<8x384xf32>
    %110 = tpu.matmul %107, %7, %cst_22 {dimension_numbers = #tpu.dot_dimension_numbers<[1], [0], [0], [1], [0, 0, 1, 1], [], []>} : vector<8x128xf32>, vector<128x384xf32>, vector<8x384xf32> -> vector<8x384xf32>
    %111 = arith.addf %110, %10 : vector<8x384xf32>
    %112 = vector.extract_strided_slice %109 {offsets = [0, 0], sizes = [8, 256], strides = [1, 1]} : vector<8x384xf32> to vector<8x256xf32>
    %113 = vector.extract_strided_slice %111 {offsets = [0, 0], sizes = [8, 256], strides = [1, 1]} : vector<8x384xf32> to vector<8x256xf32>
    %114 = arith.addf %112, %113 : vector<8x256xf32>
    %115 = arith.negf %114 : vector<8x256xf32>
    %116 = math.exp %115 : vector<8x256xf32>
    %cst_23 = arith.constant 1.000000e+00 : f32
    %117 = vector.broadcast %cst_23 : f32 to vector<8x256xf32>
    %118 = arith.addf %117, %116 : vector<8x256xf32>
    %119 = arith.divf %117, %118 : vector<8x256xf32>
    %120 = vector.extract_strided_slice %119 {offsets = [0, 0], sizes = [8, 128], strides = [1, 1]} : vector<8x256xf32> to vector<8x128xf32>
    %121 = vector.extract_strided_slice %119 {offsets = [0, 128], sizes = [8, 128], strides = [1, 1]} : vector<8x256xf32> to vector<8x128xf32>
    %122 = vector.extract_strided_slice %109 {offsets = [0, 256], sizes = [8, 128], strides = [1, 1]} : vector<8x384xf32> to vector<8x128xf32>
    %123 = vector.extract_strided_slice %111 {offsets = [0, 256], sizes = [8, 128], strides = [1, 1]} : vector<8x384xf32> to vector<8x128xf32>
    %124 = arith.mulf %120, %123 : vector<8x128xf32>
    %125 = arith.addf %122, %124 : vector<8x128xf32>
    %126 = math.tanh %125 : vector<8x128xf32>
    %cst_24 = arith.constant 1.000000e+00 : f32
    %127 = vector.broadcast %cst_24 : f32 to vector<8x128xf32>
    %128 = arith.subf %127, %121 : vector<8x128xf32>
    %129 = arith.mulf %128, %126 : vector<8x128xf32>
    %130 = arith.mulf %121, %107 : vector<8x128xf32>
    %131 = arith.addf %129, %130 : vector<8x128xf32>
    %132 = vector.extract_strided_slice %6 {offsets = [5, 0, 0], sizes = [1, 8, 384], strides = [1, 1, 1]} : vector<8x8x384xf32> to vector<1x8x384xf32>
    %133 = vector.shape_cast %132 : vector<1x8x384xf32> to vector<8x384xf32>
    %cst_25 = arith.constant dense<0.000000e+00> : vector<8x384xf32>
    %134 = tpu.matmul %131, %7, %cst_25 {dimension_numbers = #tpu.dot_dimension_numbers<[1], [0], [0], [1], [0, 0, 1, 1], [], []>} : vector<8x128xf32>, vector<128x384xf32>, vector<8x384xf32> -> vector<8x384xf32>
    %135 = arith.addf %134, %10 : vector<8x384xf32>
    %136 = vector.extract_strided_slice %133 {offsets = [0, 0], sizes = [8, 256], strides = [1, 1]} : vector<8x384xf32> to vector<8x256xf32>
    %137 = vector.extract_strided_slice %135 {offsets = [0, 0], sizes = [8, 256], strides = [1, 1]} : vector<8x384xf32> to vector<8x256xf32>
    %138 = arith.addf %136, %137 : vector<8x256xf32>
    %139 = arith.negf %138 : vector<8x256xf32>
    %140 = math.exp %139 : vector<8x256xf32>
    %cst_26 = arith.constant 1.000000e+00 : f32
    %141 = vector.broadcast %cst_26 : f32 to vector<8x256xf32>
    %142 = arith.addf %141, %140 : vector<8x256xf32>
    %143 = arith.divf %141, %142 : vector<8x256xf32>
    %144 = vector.extract_strided_slice %143 {offsets = [0, 0], sizes = [8, 128], strides = [1, 1]} : vector<8x256xf32> to vector<8x128xf32>
    %145 = vector.extract_strided_slice %143 {offsets = [0, 128], sizes = [8, 128], strides = [1, 1]} : vector<8x256xf32> to vector<8x128xf32>
    %146 = vector.extract_strided_slice %133 {offsets = [0, 256], sizes = [8, 128], strides = [1, 1]} : vector<8x384xf32> to vector<8x128xf32>
    %147 = vector.extract_strided_slice %135 {offsets = [0, 256], sizes = [8, 128], strides = [1, 1]} : vector<8x384xf32> to vector<8x128xf32>
    %148 = arith.mulf %144, %147 : vector<8x128xf32>
    %149 = arith.addf %146, %148 : vector<8x128xf32>
    %150 = math.tanh %149 : vector<8x128xf32>
    %cst_27 = arith.constant 1.000000e+00 : f32
    %151 = vector.broadcast %cst_27 : f32 to vector<8x128xf32>
    %152 = arith.subf %151, %145 : vector<8x128xf32>
    %153 = arith.mulf %152, %150 : vector<8x128xf32>
    %154 = arith.mulf %145, %131 : vector<8x128xf32>
    %155 = arith.addf %153, %154 : vector<8x128xf32>
    %156 = vector.extract_strided_slice %6 {offsets = [6, 0, 0], sizes = [1, 8, 384], strides = [1, 1, 1]} : vector<8x8x384xf32> to vector<1x8x384xf32>
    %157 = vector.shape_cast %156 : vector<1x8x384xf32> to vector<8x384xf32>
    %cst_28 = arith.constant dense<0.000000e+00> : vector<8x384xf32>
    %158 = tpu.matmul %155, %7, %cst_28 {dimension_numbers = #tpu.dot_dimension_numbers<[1], [0], [0], [1], [0, 0, 1, 1], [], []>} : vector<8x128xf32>, vector<128x384xf32>, vector<8x384xf32> -> vector<8x384xf32>
    %159 = arith.addf %158, %10 : vector<8x384xf32>
    %160 = vector.extract_strided_slice %157 {offsets = [0, 0], sizes = [8, 256], strides = [1, 1]} : vector<8x384xf32> to vector<8x256xf32>
    %161 = vector.extract_strided_slice %159 {offsets = [0, 0], sizes = [8, 256], strides = [1, 1]} : vector<8x384xf32> to vector<8x256xf32>
    %162 = arith.addf %160, %161 : vector<8x256xf32>
    %163 = arith.negf %162 : vector<8x256xf32>
    %164 = math.exp %163 : vector<8x256xf32>
    %cst_29 = arith.constant 1.000000e+00 : f32
    %165 = vector.broadcast %cst_29 : f32 to vector<8x256xf32>
    %166 = arith.addf %165, %164 : vector<8x256xf32>
    %167 = arith.divf %165, %166 : vector<8x256xf32>
    %168 = vector.extract_strided_slice %167 {offsets = [0, 0], sizes = [8, 128], strides = [1, 1]} : vector<8x256xf32> to vector<8x128xf32>
    %169 = vector.extract_strided_slice %167 {offsets = [0, 128], sizes = [8, 128], strides = [1, 1]} : vector<8x256xf32> to vector<8x128xf32>
    %170 = vector.extract_strided_slice %157 {offsets = [0, 256], sizes = [8, 128], strides = [1, 1]} : vector<8x384xf32> to vector<8x128xf32>
    %171 = vector.extract_strided_slice %159 {offsets = [0, 256], sizes = [8, 128], strides = [1, 1]} : vector<8x384xf32> to vector<8x128xf32>
    %172 = arith.mulf %168, %171 : vector<8x128xf32>
    %173 = arith.addf %170, %172 : vector<8x128xf32>
    %174 = math.tanh %173 : vector<8x128xf32>
    %cst_30 = arith.constant 1.000000e+00 : f32
    %175 = vector.broadcast %cst_30 : f32 to vector<8x128xf32>
    %176 = arith.subf %175, %169 : vector<8x128xf32>
    %177 = arith.mulf %176, %174 : vector<8x128xf32>
    %178 = arith.mulf %169, %155 : vector<8x128xf32>
    %179 = arith.addf %177, %178 : vector<8x128xf32>
    %180 = vector.extract_strided_slice %6 {offsets = [7, 0, 0], sizes = [1, 8, 384], strides = [1, 1, 1]} : vector<8x8x384xf32> to vector<1x8x384xf32>
    %181 = vector.shape_cast %180 : vector<1x8x384xf32> to vector<8x384xf32>
    %cst_31 = arith.constant dense<0.000000e+00> : vector<8x384xf32>
    %182 = tpu.matmul %179, %7, %cst_31 {dimension_numbers = #tpu.dot_dimension_numbers<[1], [0], [0], [1], [0, 0, 1, 1], [], []>} : vector<8x128xf32>, vector<128x384xf32>, vector<8x384xf32> -> vector<8x384xf32>
    %183 = arith.addf %182, %10 : vector<8x384xf32>
    %184 = vector.extract_strided_slice %181 {offsets = [0, 0], sizes = [8, 256], strides = [1, 1]} : vector<8x384xf32> to vector<8x256xf32>
    %185 = vector.extract_strided_slice %183 {offsets = [0, 0], sizes = [8, 256], strides = [1, 1]} : vector<8x384xf32> to vector<8x256xf32>
    %186 = arith.addf %184, %185 : vector<8x256xf32>
    %187 = arith.negf %186 : vector<8x256xf32>
    %188 = math.exp %187 : vector<8x256xf32>
    %cst_32 = arith.constant 1.000000e+00 : f32
    %189 = vector.broadcast %cst_32 : f32 to vector<8x256xf32>
    %190 = arith.addf %189, %188 : vector<8x256xf32>
    %191 = arith.divf %189, %190 : vector<8x256xf32>
    %192 = vector.extract_strided_slice %191 {offsets = [0, 0], sizes = [8, 128], strides = [1, 1]} : vector<8x256xf32> to vector<8x128xf32>
    %193 = vector.extract_strided_slice %191 {offsets = [0, 128], sizes = [8, 128], strides = [1, 1]} : vector<8x256xf32> to vector<8x128xf32>
    %194 = vector.extract_strided_slice %181 {offsets = [0, 256], sizes = [8, 128], strides = [1, 1]} : vector<8x384xf32> to vector<8x128xf32>
    %195 = vector.extract_strided_slice %183 {offsets = [0, 256], sizes = [8, 128], strides = [1, 1]} : vector<8x384xf32> to vector<8x128xf32>
    %196 = arith.mulf %192, %195 : vector<8x128xf32>
    %197 = arith.addf %194, %196 : vector<8x128xf32>
    %198 = math.tanh %197 : vector<8x128xf32>
    %cst_33 = arith.constant 1.000000e+00 : f32
    %199 = vector.broadcast %cst_33 : f32 to vector<8x128xf32>
    %200 = arith.subf %199, %193 : vector<8x128xf32>
    %201 = arith.mulf %200, %198 : vector<8x128xf32>
    %202 = arith.mulf %193, %179 : vector<8x128xf32>
    %203 = arith.addf %201, %202 : vector<8x128xf32>
    %c0_34 = arith.constant 0 : index
    %c0_35 = arith.constant 0 : index
    %c0_36 = arith.constant 0 : index
    %204 = vector.load %arg1[%c0_34, %c0_35, %c0_36] : memref<8x8x256xf32, #tpu.memory_space<vmem>>, vector<8x8x256xf32>
    %205 = arith.mulf %204, %204 : vector<8x8x256xf32>
    %cst_37 = arith.constant dense<0.000000e+00> : vector<8x256xf32>
    %206 = vector.multi_reduction <add>, %205, %cst_37 [1] : vector<8x8x256xf32> to vector<8x256xf32>
    %207 = vector.shape_cast %206 : vector<8x256xf32> to vector<8x1x256xf32>
    %cst_38 = arith.constant 1.000000e-24 : f32
    %208 = vector.broadcast %cst_38 : f32 to vector<8x1x256xf32>
    %209 = arith.maximumf %207, %208 : vector<8x1x256xf32>
    %210 = math.rsqrt %209 : vector<8x1x256xf32>
    %211 = vector.broadcast %210 : vector<8x1x256xf32> to vector<8x8x256xf32>
    %212 = arith.mulf %204, %211 : vector<8x8x256xf32>
    %213 = vector.shape_cast %212 : vector<8x8x256xf32> to vector<64x256xf32>
    %c0_39 = arith.constant 0 : index
    %c0_40 = arith.constant 0 : index
    %214 = vector.load %arg7[%c0_39, %c0_40] : memref<128x128xf32, #tpu.memory_space<vmem>>, vector<128x128xf32>
    %cst_41 = arith.constant dense<0.000000e+00> : vector<8x128xf32>
    %215 = tpu.matmul %203, %214, %cst_41 {dimension_numbers = #tpu.dot_dimension_numbers<[1], [0], [0], [1], [0, 0, 1, 1], [], []>} : vector<8x128xf32>, vector<128x128xf32>, vector<8x128xf32> -> vector<8x128xf32>
    %c0_42 = arith.constant 0 : index
    %c0_43 = arith.constant 0 : index
    %216 = vector.load %arg10[%c0_42, %c0_43] : memref<128x128xf32, #tpu.memory_space<vmem>>, vector<128x128xf32>
    %cst_44 = arith.constant dense<0.000000e+00> : vector<8x128xf32>
    %217 = tpu.matmul %203, %216, %cst_44 {dimension_numbers = #tpu.dot_dimension_numbers<[1], [0], [0], [1], [0, 0, 1, 1], [], []>} : vector<8x128xf32>, vector<128x128xf32>, vector<8x128xf32> -> vector<8x128xf32>
    %c0_45 = arith.constant 0 : index
    %c0_46 = arith.constant 0 : index
    %218 = vector.load %arg6[%c0_45, %c0_46] : memref<256x128xf32, #tpu.memory_space<vmem>>, vector<256x128xf32>
    %cst_47 = arith.constant dense<0.000000e+00> : vector<64x128xf32>
    %219 = tpu.matmul %213, %218, %cst_47 {dimension_numbers = #tpu.dot_dimension_numbers<[1], [0], [0], [1], [0, 0, 1, 1], [], []>} : vector<64x256xf32>, vector<256x128xf32>, vector<64x128xf32> -> vector<64x128xf32>
    %220 = vector.shape_cast %219 : vector<64x128xf32> to vector<8x8x128xf32>
    %221 = vector.shape_cast %215 : vector<8x128xf32> to vector<8x1x128xf32>
    %222 = vector.broadcast %221 : vector<8x1x128xf32> to vector<8x8x128xf32>
    %223 = arith.addf %220, %222 : vector<8x8x128xf32>
    %c0_48 = arith.constant 0 : index
    %c0_49 = arith.constant 0 : index
    %224 = vector.load %arg8[%c0_48, %c0_49] : memref<1x128xf32, #tpu.memory_space<vmem>>, vector<1x128xf32>
    %225 = vector.shape_cast %224 : vector<1x128xf32> to vector<1x1x128xf32>
    %226 = vector.broadcast %225 : vector<1x1x128xf32> to vector<8x8x128xf32>
    %227 = arith.addf %223, %226 : vector<8x8x128xf32>
    %c0_50 = arith.constant 0 : index
    %c0_51 = arith.constant 0 : index
    %228 = vector.load %arg9[%c0_50, %c0_51] : memref<256x128xf32, #tpu.memory_space<vmem>>, vector<256x128xf32>
    %cst_52 = arith.constant dense<0.000000e+00> : vector<64x128xf32>
    %229 = tpu.matmul %213, %228, %cst_52 {dimension_numbers = #tpu.dot_dimension_numbers<[1], [0], [0], [1], [0, 0, 1, 1], [], []>} : vector<64x256xf32>, vector<256x128xf32>, vector<64x128xf32> -> vector<64x128xf32>
    %230 = vector.shape_cast %229 : vector<64x128xf32> to vector<8x8x128xf32>
    %231 = vector.shape_cast %217 : vector<8x128xf32> to vector<8x1x128xf32>
    %232 = vector.broadcast %231 : vector<8x1x128xf32> to vector<8x8x128xf32>
    %233 = arith.addf %230, %232 : vector<8x8x128xf32>
    %c0_53 = arith.constant 0 : index
    %c0_54 = arith.constant 0 : index
    %234 = vector.load %arg11[%c0_53, %c0_54] : memref<1x128xf32, #tpu.memory_space<vmem>>, vector<1x128xf32>
    %235 = vector.shape_cast %234 : vector<1x128xf32> to vector<1x1x128xf32>
    %236 = vector.broadcast %235 : vector<1x1x128xf32> to vector<8x8x128xf32>
    %237 = arith.addf %233, %236 : vector<8x8x128xf32>
    %238 = math.tanh %227 : vector<8x8x128xf32>
    %239 = arith.negf %237 : vector<8x8x128xf32>
    %240 = math.exp %239 : vector<8x8x128xf32>
    %cst_55 = arith.constant 1.000000e+00 : f32
    %241 = vector.broadcast %cst_55 : f32 to vector<8x8x128xf32>
    %242 = arith.addf %241, %240 : vector<8x8x128xf32>
    %243 = arith.divf %241, %242 : vector<8x8x128xf32>
    %244 = arith.mulf %238, %243 : vector<8x8x128xf32>
    %c0_56 = arith.constant 0 : index
    %c0_57 = arith.constant 0 : index
    %245 = vector.load %arg12[%c0_56, %c0_57] : memref<1x128xf32, #tpu.memory_space<vmem>>, vector<1x128xf32>
    %246 = vector.shape_cast %245 : vector<1x128xf32> to vector<1x1x128xf32>
    %247 = vector.broadcast %246 : vector<1x1x128xf32> to vector<8x8x128xf32>
    %248 = arith.mulf %244, %247 : vector<8x8x128xf32>
    %cst_58 = arith.constant dense<0.000000e+00> : vector<8x8xf32>
    %249 = vector.multi_reduction <add>, %248, %cst_58 [2] : vector<8x8x128xf32> to vector<8x8xf32>
    %c0_59 = arith.constant 0 : index
    %c0_60 = arith.constant 0 : index
    %250 = vector.load %arg13[%c0_59, %c0_60] : memref<1x1xf32, #tpu.memory_space<vmem>>, vector<1x1xf32>
    %251 = vector.broadcast %250 : vector<1x1xf32> to vector<8x8xf32>
    %252 = arith.addf %249, %251 : vector<8x8xf32>
    %cst_61 = arith.constant dense<0xFF800000> : vector<8xf32>
    %253 = vector.multi_reduction <maximumf>, %252, %cst_61 [1] : vector<8x8xf32> to vector<8xf32>
    %254 = vector.shape_cast %253 : vector<8xf32> to vector<8x1xf32>
    %255 = vector.broadcast %254 : vector<8x1xf32> to vector<8x8xf32>
    %256 = arith.subf %252, %255 : vector<8x8xf32>
    %257 = math.exp %256 : vector<8x8xf32>
    %cst_62 = arith.constant dense<0.000000e+00> : vector<8xf32>
    %258 = vector.multi_reduction <add>, %257, %cst_62 [1] : vector<8x8xf32> to vector<8xf32>
    %259 = vector.shape_cast %258 : vector<8xf32> to vector<8x1xf32>
    %260 = tpu.reciprocal %259 {approx = true} : vector<8x1xf32> -> vector<8x1xf32>
    %261 = vector.broadcast %260 : vector<8x1xf32> to vector<8x8xf32>
    %262 = arith.mulf %257, %261 : vector<8x8xf32>
    %263 = vector.shape_cast %262 : vector<8x8xf32> to vector<8x8x1xf32>
    %264 = vector.broadcast %263 : vector<8x8x1xf32> to vector<8x8x256xf32>
    %265 = arith.mulf %264, %212 : vector<8x8x256xf32>
    %cst_63 = arith.constant dense<0.000000e+00> : vector<8x256xf32>
    %266 = vector.multi_reduction <add>, %265, %cst_63 [1] : vector<8x8x256xf32> to vector<8x256xf32>
    %c0_64 = arith.constant 0 : index
    %c0_65 = arith.constant 0 : index
    %267 = vector.load %arg14[%c0_64, %c0_65] : memref<256x128xf32, #tpu.memory_space<vmem>>, vector<256x128xf32>
    %c0_66 = arith.constant 0 : index
    %c0_67 = arith.constant 0 : index
    %268 = vector.load %arg15[%c0_66, %c0_67] : memref<1x128xf32, #tpu.memory_space<vmem>>, vector<1x128xf32>
    %c0_68 = arith.constant 0 : index
    %c0_69 = arith.constant 0 : index
    %269 = vector.load %arg16[%c0_68, %c0_69] : memref<256x128xf32, #tpu.memory_space<vmem>>, vector<256x128xf32>
    %c0_70 = arith.constant 0 : index
    %c0_71 = arith.constant 0 : index
    %270 = vector.load %arg17[%c0_70, %c0_71] : memref<1x128xf32, #tpu.memory_space<vmem>>, vector<1x128xf32>
    %cst_72 = arith.constant dense<0.000000e+00> : vector<8x128xf32>
    %271 = tpu.matmul %266, %267, %cst_72 {dimension_numbers = #tpu.dot_dimension_numbers<[1], [0], [0], [1], [0, 0, 1, 1], [], []>} : vector<8x256xf32>, vector<256x128xf32>, vector<8x128xf32> -> vector<8x128xf32>
    %272 = vector.broadcast %268 : vector<1x128xf32> to vector<8x128xf32>
    %273 = arith.addf %271, %272 : vector<8x128xf32>
    %cst_73 = arith.constant dense<0.000000e+00> : vector<8x128xf32>
    %274 = tpu.matmul %266, %269, %cst_73 {dimension_numbers = #tpu.dot_dimension_numbers<[1], [0], [0], [1], [0, 0, 1, 1], [], []>} : vector<8x256xf32>, vector<256x128xf32>, vector<8x128xf32> -> vector<8x128xf32>
    %275 = vector.broadcast %270 : vector<1x128xf32> to vector<8x128xf32>
    %276 = arith.addf %274, %275 : vector<8x128xf32>
    %277 = math.tanh %273 : vector<8x128xf32>
    %278 = arith.negf %276 : vector<8x128xf32>
    %279 = math.exp %278 : vector<8x128xf32>
    %cst_74 = arith.constant 1.000000e+00 : f32
    %280 = vector.broadcast %cst_74 : f32 to vector<8x128xf32>
    %281 = arith.addf %280, %279 : vector<8x128xf32>
    %282 = arith.divf %280, %281 : vector<8x128xf32>
    %283 = arith.mulf %277, %282 : vector<8x128xf32>
    %c0_75 = arith.constant 0 : index
    %c0_76 = arith.constant 0 : index
    %284 = vector.load %arg18[%c0_75, %c0_76] : memref<128x128xf32, #tpu.memory_space<vmem>>, vector<128x128xf32>
    %c0_77 = arith.constant 0 : index
    %c0_78 = arith.constant 0 : index
    %285 = vector.load %arg19[%c0_77, %c0_78] : memref<1x128xf32, #tpu.memory_space<vmem>>, vector<1x128xf32>
    %c0_79 = arith.constant 0 : index
    %c0_80 = arith.constant 0 : index
    %286 = vector.load %arg20[%c0_79, %c0_80] : memref<128x128xf32, #tpu.memory_space<vmem>>, vector<128x128xf32>
    %c0_81 = arith.constant 0 : index
    %c0_82 = arith.constant 0 : index
    %287 = vector.load %arg21[%c0_81, %c0_82] : memref<1x128xf32, #tpu.memory_space<vmem>>, vector<1x128xf32>
    %cst_83 = arith.constant dense<0.000000e+00> : vector<8x128xf32>
    %288 = tpu.matmul %203, %284, %cst_83 {dimension_numbers = #tpu.dot_dimension_numbers<[1], [0], [0], [1], [0, 0, 1, 1], [], []>} : vector<8x128xf32>, vector<128x128xf32>, vector<8x128xf32> -> vector<8x128xf32>
    %289 = vector.broadcast %285 : vector<1x128xf32> to vector<8x128xf32>
    %290 = arith.addf %288, %289 : vector<8x128xf32>
    %cst_84 = arith.constant dense<0.000000e+00> : vector<8x128xf32>
    %291 = tpu.matmul %203, %286, %cst_84 {dimension_numbers = #tpu.dot_dimension_numbers<[1], [0], [0], [1], [0, 0, 1, 1], [], []>} : vector<8x128xf32>, vector<128x128xf32>, vector<8x128xf32> -> vector<8x128xf32>
    %292 = vector.broadcast %287 : vector<1x128xf32> to vector<8x128xf32>
    %293 = arith.addf %291, %292 : vector<8x128xf32>
    %294 = math.tanh %290 : vector<8x128xf32>
    %295 = arith.negf %293 : vector<8x128xf32>
    %296 = math.exp %295 : vector<8x128xf32>
    %cst_85 = arith.constant 1.000000e+00 : f32
    %297 = vector.broadcast %cst_85 : f32 to vector<8x128xf32>
    %298 = arith.addf %297, %296 : vector<8x128xf32>
    %299 = arith.divf %297, %298 : vector<8x128xf32>
    %300 = arith.mulf %294, %299 : vector<8x128xf32>
    %301 = arith.mulf %300, %283 : vector<8x128xf32>
    %c0_86 = arith.constant 0 : index
    %c0_87 = arith.constant 0 : index
    %302 = vector.load %arg22[%c0_86, %c0_87] : memref<128x128xf32, #tpu.memory_space<vmem>>, vector<128x128xf32>
    %c0_88 = arith.constant 0 : index
    %c0_89 = arith.constant 0 : index
    %303 = vector.load %arg23[%c0_88, %c0_89] : memref<1x128xf32, #tpu.memory_space<vmem>>, vector<1x128xf32>
    %c0_90 = arith.constant 0 : index
    %c0_91 = arith.constant 0 : index
    %304 = vector.load %arg24[%c0_90, %c0_91] : memref<128x128xf32, #tpu.memory_space<vmem>>, vector<128x128xf32>
    %c0_92 = arith.constant 0 : index
    %c0_93 = arith.constant 0 : index
    %305 = vector.load %arg25[%c0_92, %c0_93] : memref<1x128xf32, #tpu.memory_space<vmem>>, vector<1x128xf32>
    %cst_94 = arith.constant dense<0.000000e+00> : vector<8x128xf32>
    %306 = tpu.matmul %301, %302, %cst_94 {dimension_numbers = #tpu.dot_dimension_numbers<[1], [0], [0], [1], [0, 0, 1, 1], [], []>} : vector<8x128xf32>, vector<128x128xf32>, vector<8x128xf32> -> vector<8x128xf32>
    %307 = vector.broadcast %303 : vector<1x128xf32> to vector<8x128xf32>
    %308 = arith.addf %306, %307 : vector<8x128xf32>
    %cst_95 = arith.constant dense<0.000000e+00> : vector<8x128xf32>
    %309 = tpu.matmul %301, %304, %cst_95 {dimension_numbers = #tpu.dot_dimension_numbers<[1], [0], [0], [1], [0, 0, 1, 1], [], []>} : vector<8x128xf32>, vector<128x128xf32>, vector<8x128xf32> -> vector<8x128xf32>
    %310 = vector.broadcast %305 : vector<1x128xf32> to vector<8x128xf32>
    %311 = arith.addf %309, %310 : vector<8x128xf32>
    %312 = math.tanh %308 : vector<8x128xf32>
    %313 = arith.negf %311 : vector<8x128xf32>
    %314 = math.exp %313 : vector<8x128xf32>
    %cst_96 = arith.constant 1.000000e+00 : f32
    %315 = vector.broadcast %cst_96 : f32 to vector<8x128xf32>
    %316 = arith.addf %315, %314 : vector<8x128xf32>
    %317 = arith.divf %315, %316 : vector<8x128xf32>
    %318 = arith.mulf %312, %317 : vector<8x128xf32>
    %c0_97 = arith.constant 0 : index
    %c0_98 = arith.constant 0 : index
    %319 = vector.load %arg26[%c0_97, %c0_98] : memref<128x128xf32, #tpu.memory_space<vmem>>, vector<128x128xf32>
    %cst_99 = arith.constant dense<0.000000e+00> : vector<8x128xf32>
    %320 = tpu.matmul %318, %319, %cst_99 {dimension_numbers = #tpu.dot_dimension_numbers<[1], [0], [0], [1], [0, 0, 1, 1], [], []>} : vector<8x128xf32>, vector<128x128xf32>, vector<8x128xf32> -> vector<8x128xf32>
    %c0_100 = arith.constant 0 : index
    %c0_101 = arith.constant 0 : index
    %321 = vector.load %arg27[%c0_100, %c0_101] : memref<1x128xf32, #tpu.memory_space<vmem>>, vector<1x128xf32>
    %322 = vector.broadcast %321 : vector<1x128xf32> to vector<8x128xf32>
    %323 = arith.addf %320, %322 : vector<8x128xf32>
    %324 = arith.negf %323 : vector<8x128xf32>
    %325 = math.exp %324 : vector<8x128xf32>
    %cst_102 = arith.constant 1.000000e+00 : f32
    %326 = vector.broadcast %cst_102 : f32 to vector<8x128xf32>
    %327 = arith.addf %326, %325 : vector<8x128xf32>
    %328 = arith.divf %326, %327 : vector<8x128xf32>
    %c0_103 = arith.constant 0 : index
    %c0_104 = arith.constant 0 : index
    %329 = vector.load %arg28[%c0_103, %c0_104] : memref<8x128xf32, #tpu.memory_space<vmem>>, vector<8x128xf32>
    tpu.vector_store %arg28[%c0_103, %c0_104], %328 {strides = array<i32>} : memref<8x128xf32, #tpu.memory_space<vmem>>, vector<8x128xf32>,
    return
  }
}

</mosaic_0001>

<bundles_post_ra>
// kernel: network_forward.1
= control target key start
LH: loop header
LB: loop body
LE: loop exit
PB: predicated region body
PF: predicated region fallthrough
CT: control target
= control target key end

     0   :  { %s7917_s0 = inlined_call_operand.vmem [shape: f32[64,128], index: 0, kind: input, shape index: {}]   ;;  %s7918_s1 = inlined_call_operand.vmem [shape: f32[8,8,256], index: 1, kind: input, shape index: {}]   ;;  %s7919_s2 = inlined_call_operand.vmem [shape: f32[128,384], index: 2, kind: input, shape index: {}]   ;;  %s7920_s3 = inlined_call_operand.vmem [shape: f32[128,384], index: 3, kind: input, shape index: {}]   ;;  %s7921_s4 = inlined_call_operand.vmem [shape: f32[1,384], index: 4, kind: input, shape index: {}]   ;;  %s7922_s5 = inlined_call_operand.vmem [shape: f32[1,384], index: 5, kind: input, shape index: {}]   ;;  %s7923_s6 = inlined_call_operand.vmem [shape: f32[256,128], index: 6, kind: input, shape index: {}]   ;;  %s7924_s7 = inlined_call_operand.hbm [shape: f32[128,128], index: 7, kind: input, shape index: {}]   ;;  %s7925_s8 = inlined_call_operand.vmem [shape: f32[1,128], index: 8, kind: input, shape index: {}]   ;;  %s7926_s9 = inlined_call_operand.vmem [shape: f32[256,128], index: 9, kind: input, shape index: {}]   ;;  %s7927_s10 = inlined_call_operand.hbm [shape: f32[128,128], index: 10, kind: input, shape index: {}]   ;;  %s7928_s11 = inlined_call_operand.vmem [shape: f32[1,128], index: 11, kind: input, shape index: {}]   ;;  %s7929_s12 = inlined_call_operand.vmem [shape: f32[1,128], index: 12, kind: input, shape index: {}]   ;;  %s7930_s13 = inlined_call_operand.<no memory space> [shape: f32[1,1], index: 13, kind: input, shape index: {}]   ;;  %s7931_s14 = inlined_call_operand.hbm [shape: f32[256,128], index: 14, kind: input, shape index: {}]   ;;  %s7932_s15 = inlined_call_operand.vmem [shape: f32[1,128], index: 15, kind: input, shape index: {}]   ;;  %s7933_s16 = inlined_call_operand.hbm [shape: f32[256,128], index: 16, kind: input, shape index: {}]   ;;  %s7934_s17 = inlined_call_operand.vmem [shape: f32[1,128], index: 17, kind: input, shape index: {}]   ;;  %s7935_s18 = inlined_call_operand.hbm [shape: f32[128,128], index: 18, kind: input, shape index: {}]   ;;  %s7936_s19 = inlined_call_operand.vmem [shape: f32[1,128], index: 19, kind: input, shape index: {}]   ;;  %s7937_s20 = inlined_call_operand.hbm [shape: f32[128,128], index: 20, kind: input, shape index: {}]   ;;  %s7938_s21 = inlined_call_operand.hbm [shape: f32[1,128], index: 21, kind: input, shape index: {}]   ;;  %s7939_s22 = inlined_call_operand.hbm [shape: f32[128,128], index: 22, kind: input, shape index: {}]   ;;  %s7940_s23 = inlined_call_operand.vmem [shape: f32[1,128], index: 23, kind: input, shape index: {}]   ;;  %s7941_s24 = inlined_call_operand.hbm [shape: f32[128,128], index: 24, kind: input, shape index: {}]   ;;  %s7942_s25 = inlined_call_operand.vmem [shape: f32[1,128], index: 25, kind: input, shape index: {}]   ;;  %s7943_s26 = inlined_call_operand.vmem [shape: f32[128,128], index: 26, kind: input, shape index: {}]   ;;  %s7944_s27 = inlined_call_operand.vmem [shape: f32[1,128], index: 27, kind: input, shape index: {}]   ;;  %s7945_s28 = inlined_call_operand.vmem [shape: f32[8,128], index: 28, kind: output, shape index: {}]  }
   0x1   :  { %7989 = sst [smem:[#allocation57_spill]] %s7917_s0  ;;  %v33_v0 = vstv %s7930_s13 }
   0x2   :  { %7990 = sst [smem:[#allocation58_spill]] %s7918_s1  ;;  %34 = vst [vmem:[#allocation2] sm:$0x1] %v33_v0 }
   0x3   :  { %7991 = sst [smem:[#allocation59_spill]] %s7919_s2 }
   0x4   :  { %7992 = sst [smem:[#allocation60_spill]] %s7920_s3 }
   0x5   :  { %7993 = sst [smem:[#allocation61_spill]] %s7921_s4 }
   0x6   :  { %7994 = sst [smem:[#allocation62_spill]] %s7922_s5 }
   0x7   :  { %7995 = sst [smem:[#allocation63_spill]] %s7923_s6 }
   0x8   :  { %7996 = sst [smem:[#allocation64_spill]] %s7924_s7 }
   0x9   :  { %7997 = sst [smem:[#allocation65_spill]] %s7925_s8 }
   0xa   :  { %7998 = sst [smem:[#allocation66_spill]] %s7926_s9 }
   0xb   :  { %7999 = sst [smem:[#allocation67_spill]] %s7927_s10 }
   0xc   :  { %8000 = sst [smem:[#allocation68_spill]] %s7928_s11 }
   0xd   :  { %8001 = sst [smem:[#allocation69_spill]] %s7929_s12 }
   0xe   :  { %35 = vsyncpa [#allocation4], 0 }
   0xf   :  { %36 = vsyncpa [#allocation6], 0 }
  0x10   :  { %37 = vsyncpa [#allocation9], 0 }
  0x11   :  { %38 = vsyncpa [#allocation12], 0 }
  0x12   :  { %39 = vsyncpa [#allocation15], 0  ;;  %s5507_s9 = smov [#allocation5]   ;;  %s5508_s3 = smov [#allocation8]  }
  0x13   :  { %s75_s30 = sshll.u32 %s5507_s9, 4  ;;  %s107_s6 = sshll.u32 %s5508_s3, 4  ;;  %s76_s30 = int_to_ptr.vmem [resolvable:$true] %s75_s30  ;;  %s108_s6 = int_to_ptr.vmem [resolvable:$true] %s107_s6 }
  0x14   :  { %s5325_s10 = scalar_lea.vmem %s76_s30, 2048  ;;  %p5330_p1 = scmp.lt.s32.totalorder %s76_s30, %s76_s30 }
  0x15   :  { %p5326_p0 = scmp.ne.s32.totalorder %s76_s30, %s5325_s10  ;;  %p5331_p2 = scmp.lt.s32.totalorder %s5325_s10, %s5325_s10 }
  0x17   :  { %p5332_p3 = por %p5331_p2, %p5330_p1 }
  0x19   :  { %p5333_p4 = pnand %p5332_p3, %p5326_p0 }
  0x1b   :  { %5336 = shalt.err (!%p5333_p4)
}
  0x1c   :  { %s5509_s13 = smov 128   ;;  %s5510_s0 = smov 8  }
  0x1d   :  { %s8002_s2 = sld [smem:[#allocation67_spill]]  ;;  %s5345_s7 = scalar_lea.vmem %s108_s6, 4096 }
  0x1e   :  { %p5346_p5 = scmp.ne.s32.totalorder %s108_s6, %s5345_s7  ;;  %p5350_p6 = scmp.lt.s32.totalorder %s108_s6, %s108_s6 }
  0x1f   :  { %p5351_p7 = scmp.lt.s32.totalorder %s5345_s7, %s5345_s7 }
  0x21   :  { %p5352_p8 = por %p5351_p7, %p5350_p6 }
  0x23   :  { %81 = dma.hbm_to_vmem [thread:$0]  %s8002_s2, 2048, %s76_s30, [#allocation6], %s5509_s13, %s5509_s13, %s5510_s0  }
  0x24   :  { %p5353_p9 = pnand %p5352_p8, %p5346_p5 }
  0x26   :  { %5356 = shalt.err (!%p5353_p9)
}
  0x27   :  { %113 = dma.hbm_to_vmem [thread:$0]  %s7933_s16, 4096, %s108_s6, [#allocation9], %s5509_s13, %s5509_s13, %s5510_s0  }
  0x28   :  { %s5511_s4 = smov [#allocation11]   ;;  %s5512_s5 = smov [#allocation14]  }
  0x29   :  { %s135_s8 = sshll.u32 %s5511_s4, 4  ;;  %s157_s9 = sshll.u32 %s5512_s5, 4  ;;  %s136_s8 = int_to_ptr.vmem [resolvable:$true] %s135_s8  ;;  %s158_s9 = int_to_ptr.vmem [resolvable:$true] %s157_s9 }
  0x2a   :  { %s5365_s30 = scalar_lea.vmem %s136_s8, 2048  ;;  %p5370_p11 = scmp.lt.s32.totalorder %s136_s8, %s136_s8 }
  0x2b   :  { %p5366_p10 = scmp.ne.s32.totalorder %s136_s8, %s5365_s30  ;;  %p5371_p12 = scmp.lt.s32.totalorder %s5365_s30, %s5365_s30 }
  0x2d   :  { %p5372_p13 = por %p5371_p12, %p5370_p11 }
  0x2f   :  { %p5373_p0 = pnand %p5372_p13, %p5366_p10 }
  0x31   :  { %5376 = shalt.err (!%p5373_p0)
}
  0x32   :  { %141 = dma.hbm_to_vmem [thread:$0]  %s7937_s20, 2048, %s136_s8, [#allocation12], %s5509_s13, %s5509_s13, %s5510_s0  }
  0x33   :  { %s5385_s16 = scalar_lea.vmem %s158_s9, 2048  ;;  %p5390_p2 = scmp.lt.s32.totalorder %s158_s9, %s158_s9 }
  0x34   :  { %p5386_p1 = scmp.ne.s32.totalorder %s158_s9, %s5385_s16  ;;  %p5391_p3 = scmp.lt.s32.totalorder %s5385_s16, %s5385_s16 }
  0x36   :  { %p5392_p4 = por %p5391_p3, %p5390_p2 }
  0x38   :  { %p5393_p5 = pnand %p5392_p4, %p5386_p1 }
  0x3a   :  { %5396 = shalt.err (!%p5393_p5)
}
  0x3b   :  { %163 = dma.hbm_to_vmem [thread:$0]  %s7939_s22, 2048, %s158_s9, [#allocation15], %s5509_s13, %s5509_s13, %s5510_s0  }
  0x3c   :  { %s5513_s29 = smov [#allocation3]   ;;  %s5514_s7 = smov [#allocation7]  }
  0x3d   :  { %s59_s2 = sshll.u32 %s5513_s29, 4  ;;  %s93_s12 = sshll.u32 %s5514_s7, 4  ;;  %s60_s2 = int_to_ptr.vmem [resolvable:$true] %s59_s2  ;;  %s94_s12 = int_to_ptr.vmem [resolvable:$true] %s93_s12 }
  0x3e   :  { %s5405_s20 = scalar_lea.vmem %s60_s2, 2048  ;;  %p5410_p7 = scmp.lt.s32.totalorder %s60_s2, %s60_s2 }
  0x3f   :  { %p5406_p6 = scmp.ne.s32.totalorder %s60_s2, %s5405_s20  ;;  %p5411_p8 = scmp.lt.s32.totalorder %s5405_s20, %s5405_s20 }
  0x41   :  { %p5412_p9 = por %p5411_p8, %p5410_p7 }
  0x43   :  { %p5413_p10 = pnand %p5412_p9, %p5406_p6 }
  0x45   :  { %5416 = shalt.err (!%p5413_p10)
}
  0x46   :  { %s8003_s8 = sld [smem:[#allocation64_spill]]  ;;  %s5425_s22 = scalar_lea.vmem %s94_s12, 4096 }
  0x47   :  { %p5426_p11 = scmp.ne.s32.totalorder %s94_s12, %s5425_s22  ;;  %p5430_p12 = scmp.lt.s32.totalorder %s94_s12, %s94_s12 }
  0x48   :  { %p5431_p13 = scmp.lt.s32.totalorder %s5425_s22, %s5425_s22 }
  0x4a   :  { %p5432_p0 = por %p5431_p13, %p5430_p12 }
  0x4c   :  { %65 = dma.hbm_to_vmem [thread:$0]  %s8003_s8, 2048, %s60_s2, [#allocation4], %s5509_s13, %s5509_s13, %s5510_s0  }
  0x4d   :  { %p5433_p1 = pnand %p5432_p0, %p5426_p11 }
  0x4f   :  { %5436 = shalt.err (!%p5433_p1)
}
  0x50   :  { %99 = dma.hbm_to_vmem [thread:$0]  %s7931_s14, 4096, %s94_s12, [#allocation6], %s5509_s13, %s5509_s13, %s5510_s0  }
  0x51   :  { %s5515_s30 = smov [#allocation10]   ;;  %s5516_s10 = smov [#allocation13]  }
  0x52   :  { %s121_s3 = sshll.u32 %s5515_s30, 4  ;;  %s148_s16 = sshll.u32 %s5516_s10, 4  ;;  %s122_s3 = int_to_ptr.vmem [resolvable:$true] %s121_s3  ;;  %s149_s16 = int_to_ptr.vmem [resolvable:$true] %s148_s16 }
  0x53   :  { %s5445_s6 = scalar_lea.vmem %s122_s3, 2048  ;;  %p5450_p3 = scmp.lt.s32.totalorder %s122_s3, %s122_s3 }
  0x54   :  { %p5446_p2 = scmp.ne.s32.totalorder %s122_s3, %s5445_s6  ;;  %p5451_p4 = scmp.lt.s32.totalorder %s5445_s6, %s5445_s6 }
  0x56   :  { %p5452_p5 = por %p5451_p4, %p5450_p3 }
  0x58   :  { %p5453_p6 = pnand %p5452_p5, %p5446_p2 }
  0x5a   :  { %5456 = shalt.err (!%p5453_p6)
}
  0x5b   :  { %127 = dma.hbm_to_vmem [thread:$0]  %s7935_s18, 2048, %s122_s3, [#allocation9], %s5509_s13, %s5509_s13, %s5510_s0  }
  0x5c   :  { %s5465_s14 = scalar_lea.vmem %s149_s16, 16  ;;  %s5469_s2 = scalar_lea.vmem %s149_s16, 32 }
  0x5d   :  { %p5466_p7 = scmp.ne.s32.totalorder %s149_s16, %s5465_s14  ;;  %p5470_p8 = scmp.lt.s32.totalorder %s149_s16, %s149_s16 }
  0x5e   :  { %p5471_p9 = scmp.lt.s32.totalorder %s5469_s2, %s5465_s14 }
  0x60   :  { %p5472_p10 = por %p5471_p9, %p5470_p8 }
  0x62   :  { %p5473_p11 = pnand %p5472_p10, %p5466_p7 }
  0x64   :  { %5476 = shalt.err (!%p5473_p11)
}
  0x65   :  { %151 = dma.hbm_to_vmem [thread:$0]  %s7938_s21, 16, %s149_s16, [#allocation12]  }
  0x66   :  { %s5517_s20 = smov [#allocation16]  }
  0x67   :  { %s171_s1 = sshll.u32 %s5517_s20, 4  ;;  %s172_s1 = int_to_ptr.vmem [resolvable:$true] %s171_s1 }
  0x68   :  { %s5485_s4 = scalar_lea.vmem %s172_s1, 2048  ;;  %p5490_p13 = scmp.lt.s32.totalorder %s172_s1, %s172_s1 }
  0x69   :  { %p5486_p12 = scmp.ne.s32.totalorder %s172_s1, %s5485_s4  ;;  %p5491_p0 = scmp.lt.s32.totalorder %s5485_s4, %s5485_s4 }
  0x6b   :  { %p5492_p1 = por %p5491_p0, %p5490_p13 }
  0x6d   :  { %p5493_p2 = pnand %p5492_p1, %p5486_p12 }
  0x6f   :  { %5496 = shalt.err (!%p5493_p2)
}
  0x70   :  { %177 = dma.hbm_to_vmem [thread:$0]  %s7941_s24, 2048, %s172_s1, [#allocation15], %s5509_s13, %s5509_s13, %s5510_s0  }
  0x71   :  { %5497 = dma.done.wait [#allocation4], 2048  }
  0x72   :  { %5498 = vsyncadd [#allocation4], 4294965248 }
  0x73   :  { %5499 = dma.done.wait [#allocation6], 6144  }
  0x74   :  { %5500 = vsyncadd [#allocation6], 4294961152 }
  0x75   :  { %5501 = dma.done.wait [#allocation9], 6144  }
  0x76   :  { %5502 = vsyncadd [#allocation9], 4294961152 }
  0x77   :  { %5503 = dma.done.wait [#allocation12], 2064  }
  0x78   :  { %5504 = vsyncadd [#allocation12], 4294965232 }
  0x79   :  { %5505 = dma.done.wait [#allocation15], 4096  }
  0x7a   :  { %5506 = vsyncadd [#allocation15], 4294963200  ;;  %v7953_v1 = vmov 0.0   ;;  %s8004_s5 = sld [smem:[#allocation59_spill]]  ;;  %vm5519_vm0 = vmmov 0   ;;  %vm2866_vm1 = vcmask 1041409  }
  0x7b   :  { %348 = vmatprep.mubr.f32.mxu0 %v7953_v1  ;;  %s8005_s0 = sld [smem:[#allocation57_spill]]  ;;  %vm2868_vm2 = vcmask 1042434   ;;  %vm2870_vm3 = vcmask 1043459   ;;  %vm2872_vm4 = vcmask 1044484   ;;  %vm2874_vm5 = vcmask 1045509  }
  0x7c   :  { %s8006_s13 = sld [smem:[#allocation60_spill]]  ;;  %vm2876_vm6 = vcmask 1046534   ;;  %vm2878_vm7 = vcmask 1047559   ;;  %vm2881_vm8 = vcmask 64512  }
  0x7d   :  { %s8018_s21 = sld [smem:[#allocation61_spill]] }
  0x7e   :  { %s8032_s30 = sld [smem:[#allocation62_spill]] }
  0x7f   :  { %s8092_s14 = sld [smem:[#allocation63_spill]] }
  0x80   :  { %v265_v2 = vld [vmem:[%s8004_s5 + $0x170] sm:$0xff]  ;;  %v264_v3 = vld [vmem:[%s8004_s5 + $0x168] sm:$0xff]  ;;  %v262_v4 = vld [vmem:[%s8004_s5 + $0x158] sm:$0xff]  ;;  %s8093_s12 = sld [smem:[#allocation66_spill]] }
  0x81   :  { %284 = vmatprep.subr.mxu0 %v265_v2  ;;  %v261_v5 = vld [vmem:[%s8004_s5 + $0x150] sm:$0xff]  ;;  %v259_v6 = vld [vmem:[%s8004_s5 + $0x140] sm:$0xff]  ;;  %v258_v7 = vld [vmem:[%s8004_s5 + $0x138] sm:$0xff]  ;;  %s8096_s4 = sld [smem:[#allocation58_spill]] }
  0x82   :  { %285 = vmatpush1.msra.mxu0 %v264_v3  ;;  %v256_v8 = vld [vmem:[%s8004_s5 + $0x128] sm:$0xff]  ;;  %v255_v9 = vld [vmem:[%s8004_s5 + $0x120] sm:$0xff]  ;;  %v253_v10 = vld [vmem:[%s8004_s5 + $0x110] sm:$0xff]  ;;  %s8102_s29 = sld [smem:[#allocation69_spill]] }
  0x83   :  { %286 = vmatprep.subr.mxu0 %v262_v4  ;;  %v252_v11 = vld [vmem:[%s8004_s5 + $0x108] sm:$0xff]  ;;  %v250_v12 = vld [vmem:[%s8004_s5 + $0xf8] sm:$0xff]  ;;  %v249_v13 = vld [vmem:[%s8004_s5 + $0xf0] sm:$0xff] }
  0x84   :  { %287 = vmatpush1.msra.mxu0 %v261_v5  ;;  %v247_v14 = vld [vmem:[%s8004_s5 + $0xe0] sm:$0xff]  ;;  %v246_v16 = vld [vmem:[%s8004_s5 + $0xd8] sm:$0xff]  ;;  %v244_v18 = vld [vmem:[%s8004_s5 + $0xc8] sm:$0xff] }
  0x85   :  { %288 = vmatprep.subr.mxu0 %v259_v6  ;;  %v5764_v15 = vld [vmem:[%s8005_s0] sm:$0xff]  ;;  %v266_v17 = vld [vmem:[%s8004_s5 + $0x178] sm:$0xff]  ;;  %v260_v21 = vld [vmem:[%s8004_s5 + $0x148] sm:$0xff] }
  0x86   :  { %289 = vmatpush1.msra.mxu0 %v258_v7  ;;  %4515 = vmatprep.mubr.f32.mxu1 %v5764_v15  ;;  %v263_v19 = vld [vmem:[%s8004_s5 + $0x160] sm:$0xff]  ;;  %v241_v22 = vld [vmem:[%s8004_s5 + $0xb0] sm:$0xff]  ;;  %v240_v23 = vld [vmem:[%s8004_s5 + $0xa8] sm:$0xff] }
  0x87   :  { %290 = vmatprep.subr.mxu0 %v256_v8  ;;  %4483 = vmatprep.subr.mxu1 %v266_v17  ;;  %v243_v20 = vld [vmem:[%s8004_s5 + $0xc0] sm:$0xff]  ;;  %v257_v24 = vld [vmem:[%s8004_s5 + $0x130] sm:$0xff]  ;;  %v238_v25 = vld [vmem:[%s8004_s5 + $0x98] sm:$0xff] }
  0x88   :  { %291 = vmatpush1.msra.mxu0 %v255_v9  ;;  %4484 = vmatpush3.msra.mxu1 %v266_v17  ;;  %v237_v26 = vld [vmem:[%s8004_s5 + $0x90] sm:$0xff]  ;;  %v254_v27 = vld [vmem:[%s8004_s5 + $0x118] sm:$0xff]  ;;  %v235_v28 = vld [vmem:[%s8004_s5 + $0x80] sm:$0xff] }
  0x89   :  { %292 = vmatprep.subr.mxu0 %v253_v10  ;;  %4485 = vmatprep.subr.mxu1 %v263_v19  ;;  %v234_v29 = vld [vmem:[%s8004_s5 + $0x78] sm:$0xff]  ;;  %v251_v30 = vld [vmem:[%s8004_s5 + $0x100] sm:$0xff]  ;;  %v232_v31 = vld [vmem:[%s8004_s5 + $0x68] sm:$0xff] }
  0x8a   :  { %293 = vmatpush1.msra.mxu0 %v252_v11  ;;  %4486 = vmatpush3.msra.mxu1 %v263_v19  ;;  %v231_v32 = vld [vmem:[%s8004_s5 + $0x60] sm:$0xff]  ;;  %v248_v33 = vld [vmem:[%s8004_s5 + $0xe8] sm:$0xff]  ;;  %v229_v34 = vld [vmem:[%s8004_s5 + $0x50] sm:$0xff] }
  0x8b   :  { %294 = vmatprep.subr.mxu0 %v250_v12  ;;  %4487 = vmatprep.subr.mxu1 %v260_v21  ;;  %v228_v35 = vld [vmem:[%s8004_s5 + $0x48] sm:$0xff]  ;;  %v245_v36 = vld [vmem:[%s8004_s5 + $0xd0] sm:$0xff]  ;;  %v226_v37 = vld [vmem:[%s8004_s5 + $0x38] sm:$0xff] }
  0x8c   :  { %295 = vmatpush1.msra.mxu0 %v249_v13  ;;  %4488 = vmatpush3.msra.mxu1 %v260_v21  ;;  %v225_v38 = vld [vmem:[%s8004_s5 + $0x30] sm:$0xff]  ;;  %v242_v39 = vld [vmem:[%s8004_s5 + $0xb8] sm:$0xff]  ;;  %v223_v40 = vld [vmem:[%s8004_s5 + $0x20] sm:$0xff] }
  0x8d   :  { %296 = vmatprep.subr.mxu0 %v247_v14  ;;  %4489 = vmatprep.subr.mxu1 %v257_v24  ;;  %v222_v41 = vld [vmem:[%s8004_s5 + $0x18] sm:$0xff]  ;;  %v239_v42 = vld [vmem:[%s8004_s5 + $0xa0] sm:$0xff]  ;;  %v220_v43 = vld [vmem:[%s8004_s5 + $0x8] sm:$0xff] }
  0x8e   :  { %297 = vmatpush1.msra.mxu0 %v246_v16  ;;  %4490 = vmatpush3.msra.mxu1 %v257_v24  ;;  %v219_v44 = vld [vmem:[%s8004_s5] sm:$0xff]  ;;  %v236_v45 = vld [vmem:[%s8004_s5 + $0x88] sm:$0xff]  ;;  %v5860_v46 = vld [vmem:[%s8006_s13 + $0x170] sm:$0xff] }
  0x8f   :  { %298 = vmatprep.subr.mxu0 %v244_v18  ;;  %4491 = vmatprep.subr.mxu1 %v254_v27  ;;  %8007 = vst [vmem:[#allocation22_spill] sm:$0xff] %v5860_v46  ;;  %v5865_v47 = vld [vmem:[%s8006_s13 + $0x168] sm:$0xff]  ;;  %v5870_v48 = vld [vmem:[%s8006_s13 + $0x158] sm:$0xff]  ;;  %v5877_v49 = vld [vmem:[%s8006_s13 + $0x150] sm:$0xff] }
  0x90   :  { %299 = vmatpush1.msra.mxu0 %v243_v20  ;;  %4492 = vmatpush3.msra.mxu1 %v254_v27  ;;  %v233_v50 = vld [vmem:[%s8004_s5 + $0x70] sm:$0xff]  ;;  %v5887_v51 = vld [vmem:[%s8005_s0 + $0x8] sm:$0xff]  ;;  %v5892_v52 = vld [vmem:[%s8006_s13 + $0x140] sm:$0xff] }
  0x91   :  { %300 = vmatprep.subr.mxu0 %v241_v22  ;;  %4493 = vmatprep.subr.mxu1 %v251_v30  ;;  %v5898_v53 = vld [vmem:[%s8006_s13 + $0x138] sm:$0xff]  ;;  %v5904_v54 = vld [vmem:[%s8006_s13 + $0x128] sm:$0xff]  ;;  %v5911_v55 = vld [vmem:[%s8006_s13 + $0x120] sm:$0xff] }
  0x92   :  { %301 = vmatpush1.msra.mxu0 %v240_v23  ;;  %4494 = vmatpush3.msra.mxu1 %v251_v30  ;;  %v230_v56 = vld [vmem:[%s8004_s5 + $0x58] sm:$0xff]  ;;  %v5921_v57 = vld [vmem:[%s8005_s0 + $0x10] sm:$0xff]  ;;  %v5932_v59 = vld [vmem:[%s8006_s13 + $0x108] sm:$0xff] }
  0x93   :  { %302 = vmatprep.subr.mxu0 %v238_v25  ;;  %4495 = vmatprep.subr.mxu1 %v248_v33  ;;  %v5926_v58 = vld [vmem:[%s8006_s13 + $0x110] sm:$0xff]  ;;  %v5938_v60 = vld [vmem:[%s8006_s13 + $0xf8] sm:$0xff]  ;;  %v227_v62 = vld [vmem:[%s8004_s5 + $0x40] sm:$0xff] }
  0x94   :  { %303 = vmatpush1.msra.mxu0 %v237_v26  ;;  %4496 = vmatpush3.msra.mxu1 %v248_v33  ;;  %v5945_v61 = vld [vmem:[%s8006_s13 + $0xf0] sm:$0xff]  ;;  %v5955_v63 = vld [vmem:[%s8005_s0 + $0x18] sm:$0xff]  ;;  %v5960_v0 = vld [vmem:[%s8006_s13 + $0xe0] sm:$0xff] }
  0x95   :  { %304 = vmatprep.subr.mxu0 %v235_v28  ;;  %4497 = vmatprep.subr.mxu1 %v245_v36  ;;  %v5966_v2 = vld [vmem:[%s8006_s13 + $0xd8] sm:$0xff]  ;;  %v5972_v3 = vld [vmem:[%s8006_s13 + $0xc8] sm:$0xff]  ;;  %v5979_v4 = vld [vmem:[%s8006_s13 + $0xc0] sm:$0xff] }
  0x96   :  { %305 = vmatpush1.msra.mxu0 %v234_v29  ;;  %4498 = vmatpush3.msra.mxu1 %v245_v36  ;;  %v224_v5 = vld [vmem:[%s8004_s5 + $0x28] sm:$0xff]  ;;  %v5989_v6 = vld [vmem:[%s8005_s0 + $0x20] sm:$0xff]  ;;  %v5994_v7 = vld [vmem:[%s8006_s13 + $0xb0] sm:$0xff] }
  0x97   :  { %306 = vmatprep.subr.mxu0 %v232_v31  ;;  %4499 = vmatprep.subr.mxu1 %v242_v39  ;;  %v6000_v8 = vld [vmem:[%s8006_s13 + $0xa8] sm:$0xff]  ;;  %v6006_v9 = vld [vmem:[%s8006_s13 + $0x98] sm:$0xff]  ;;  %v6013_v10 = vld [vmem:[%s8006_s13 + $0x90] sm:$0xff] }
  0x98   :  { %307 = vmatpush1.msra.mxu0 %v231_v32  ;;  %4500 = vmatpush3.msra.mxu1 %v242_v39  ;;  %v221_v11 = vld [vmem:[%s8004_s5 + $0x10] sm:$0xff]  ;;  %v216_v12 = vld [vmem:[%s8005_s0 + $0x28] sm:$0xff]  ;;  %v6026_v13 = vld [vmem:[%s8006_s13 + $0x80] sm:$0xff] }
  0x99   :  { %308 = vmatprep.subr.mxu0 %v229_v34  ;;  %4501 = vmatprep.subr.mxu1 %v239_v42  ;;  %v6032_v14 = vld [vmem:[%s8006_s13 + $0x78] sm:$0xff]  ;;  %v6044_v16 = vld [vmem:[%s8006_s13 + $0x60] sm:$0xff]  ;;  %v217_v17 = vld [vmem:[%s8005_s0 + $0x30] sm:$0xff] }
  0x9a   :  { %309 = vmatpush1.msra.mxu0 %v228_v35  ;;  %4502 = vmatpush3.msra.mxu1 %v239_v42  ;;  %v6054_v18 = vld [vmem:[%s8006_s13 + $0x50] sm:$0xff]  ;;  %v6060_v19 = vld [vmem:[%s8006_s13 + $0x48] sm:$0xff]  ;;  %v6066_v20 = vld [vmem:[%s8006_s13 + $0x38] sm:$0xff] }
  0x9b   :  { %310 = vmatprep.subr.mxu0 %v226_v37  ;;  %4503 = vmatprep.subr.mxu1 %v236_v45  ;;  %v6073_v21 = vld [vmem:[%s8006_s13 + $0x30] sm:$0xff]  ;;  %v6078_v22 = vld [vmem:[%s8006_s13 + $0x178] sm:$0xff]  ;;  %v6088_v24 = vld [vmem:[%s8006_s13 + $0x20] sm:$0xff] }
  0x9c   :  { %311 = vmatpush1.msra.mxu0 %v225_v38  ;;  %4504 = vmatpush3.msra.mxu1 %v236_v45  ;;  %8008 = vst [vmem:[#allocation23_spill] sm:$0xff] %v6073_v21  ;;  %v218_v23 = vld [vmem:[%s8005_s0 + $0x38] sm:$0xff]  ;;  %8009 = vst [vmem:[#allocation24_spill] sm:$0xff] %v6088_v24  ;;  %v6101_v26 = vld [vmem:[%s8006_s13 + $0x8] sm:$0xff]  ;;  %s8101_s0 = sld [smem:[#allocation65_spill]] }
  0x9d   :  { %312 = vmatprep.subr.mxu0 %v223_v40  ;;  %4505 = vmatprep.subr.mxu1 %v233_v50  ;;  %v6094_v25 = vld [vmem:[%s8006_s13 + $0x18] sm:$0xff]  ;;  %8011 = vst [vmem:[#allocation26_spill] sm:$0xff] %v6101_v26  ;;  %v6108_v27 = vld [vmem:[%s8006_s13] sm:$0xff]  ;;  %v6122_v29 = vld [vmem:[%s8006_s13 + $0x148] sm:$0xff] }
  0x9e   :  { %313 = vmatpush1.msra.mxu0 %v222_v41  ;;  %4506 = vmatpush3.msra.mxu1 %v233_v50  ;;  %8010 = vst [vmem:[#allocation25_spill] sm:$0xff] %v6094_v25  ;;  %8012 = vst [vmem:[#allocation27_spill] sm:$0xff] %v6108_v27  ;;  %v6113_v28 = vld [vmem:[%s8006_s13 + $0x160] sm:$0xff]  ;;  %v6131_v30 = vld [vmem:[%s8006_s13 + $0x130] sm:$0xff] }
  0x9f   :  { %314 = vmatprep.subr.mxu0 %v220_v43  ;;  %4507 = vmatprep.subr.mxu1 %v230_v56  ;;  %v6139_v31 = vld [vmem:[%s8006_s13 + $0x118] sm:$0xff]  ;;  %v6148_v32 = vld [vmem:[%s8006_s13 + $0x100] sm:$0xff]  ;;  %v6157_v33 = vld [vmem:[%s8006_s13 + $0xe8] sm:$0xff]  ;;  %v7952_v43 = vlaneseq }
  0xa0   :  { %315 = vmatpush1.msra.mxu0 %v219_v44  ;;  %4508 = vmatpush3.msra.mxu1 %v230_v56  ;;  %v6164_v34 = vld [vmem:[%s8006_s13 + $0xd0] sm:$0xff]  ;;  %v6173_v35 = vld [vmem:[%s8006_s13 + $0xb8] sm:$0xff]  ;;  %v6182_v36 = vld [vmem:[%s8006_s13 + $0xa0] sm:$0xff] }
  0xa1   :  { %349 = vmatmul.mubr.f32.vlgmr.msra.gmra.mxu0 %v5764_v15  ;;  %567 = vmatprep.subr.mxu0 %v5860_v46  ;;  %v6038_v15 = vld [vmem:[%s8006_s13 + $0x68] sm:$0xff]  ;;  %v6200_v38 = vld [vmem:[%s8006_s13 + $0x70] sm:$0xff]  ;;  %v6209_v39 = vld [vmem:[%s8006_s13 + $0x58] sm:$0xff]  ;;  %v6296_v44 = vshrl.u32 %v7952_v43, 7 }
  0xa2   :  { %568 = vmatpush1.msra.mxu0 %v5865_v47  ;;  %354 = vmatprep.mubr.f32.mxu0 %v7953_v1  ;;  %v6191_v37 = vld [vmem:[%s8006_s13 + $0x88] sm:$0xff]  ;;  %v6218_v40 = vld [vmem:[%s8006_s13 + $0x40] sm:$0xff]  ;;  %v6236_v42 = vld [vmem:[%s8006_s13 + $0x10] sm:$0xff] }
  0xa3   :  { %569 = vmatprep.subr.mxu0 %v5870_v48  ;;  %4509 = vmatprep.subr.mxu1 %v227_v62  ;;  %8013 = vst [vmem:[#allocation28_spill] sm:$0xff] %v6218_v40  ;;  %v6227_v41 = vld [vmem:[%s8006_s13 + $0x28] sm:$0xff]  ;;  %8015 = vst [vmem:[#allocation30_spill] sm:$0xff] %v6236_v42  ;;  %v6299_v45 = vsub.s32 0, %v6296_v44  ;;  %v267_v50 = vld [vmem:[%s8018_s21] sm:$0x7] }
  0xa4   :  { %570 = vmatpush1.msra.mxu0 %v5877_v49  ;;  %4510 = vmatpush3.msra.mxu1 %v227_v62  ;;  %8014 = vst [vmem:[#allocation29_spill] sm:$0xff] %v6227_v41  ;;  %8016 = vst [vmem:[#allocation31_spill] sm:$0xff] %v6296_v44  ;;  %v6305_v56 = vsub.s32 1, %v6296_v44 }
  0xa5   :  { %355 = vmatmul.mubr.f32.gmra.mxu0 %v5887_v51  ;;  %571 = vmatprep.subr.mxu0 %v5892_v52  ;;  %8017 = vst [vmem:[#allocation32_spill] sm:$0xff] %v6299_v45  ;;  %v272_v62 = vrot.slane %v267_v50, %v6299_v45 }
  0xa6   :  { %572 = vmatpush1.msra.mxu0 %v5898_v53  ;;  %360 = vmatprep.mubr.f32.mxu0 %v7953_v1  ;;  %8019 = vst [vmem:[#allocation33_spill] sm:$0xff] %v6305_v56 }
  0xa7   :  { %573 = vmatprep.subr.mxu0 %v5904_v54  ;;  %4511 = vmatprep.subr.mxu1 %v224_v5 }
  0xa8   :  { %574 = vmatpush1.msra.mxu0 %v5911_v55  ;;  %4512 = vmatpush3.msra.mxu1 %v224_v5  ;;  %v276_v5 = vrot.slane %v267_v50, %v6305_v56 }
  0xa9   :  { %361 = vmatmul.mubr.f32.gmra.mxu0 %v5921_v57  ;;  %575 = vmatprep.subr.mxu0 %v5926_v58 }
  0xaa   :  { %576 = vmatpush1.msra.mxu0 %v5932_v59  ;;  %366 = vmatprep.mubr.f32.mxu0 %v7953_v1 }
  0xab   :  { %577 = vmatprep.subr.mxu0 %v5938_v60  ;;  %4513 = vmatprep.subr.mxu1 %v221_v11 }
  0xac   :  { %578 = vmatpush1.msra.mxu0 %v5945_v61  ;;  %4514 = vmatpush3.msra.mxu1 %v221_v11 }
  0xad   :  { %367 = vmatmul.mubr.f32.gmra.mxu0 %v5955_v63  ;;  %579 = vmatprep.subr.mxu0 %v5960_v0 }
  0xae   :  { %580 = vmatpush1.msra.mxu0 %v5966_v2  ;;  %372 = vmatprep.mubr.f32.mxu0 %v7953_v1 }
  0xaf   :  { %581 = vmatprep.subr.mxu0 %v5972_v3  ;;  %4527 = vmatprep.subr.mxu1 %v7953_v1 }
  0xb0   :  { %582 = vmatpush1.msra.mxu0 %v5979_v4  ;;  %4516 = vmatmul.mubr.f32.vlgmr.msra.gmra.mxu1 %v5887_v51 }
  0xb1   :  { %373 = vmatmul.mubr.f32.gmra.mxu0 %v5989_v6  ;;  %583 = vmatprep.subr.mxu0 %v5994_v7 }
  0xb2   :  { %584 = vmatpush1.msra.mxu0 %v6000_v8  ;;  %378 = vmatprep.mubr.f32.mxu0 %v7953_v1 }
  0xb3   :  { %585 = vmatprep.subr.mxu0 %v6006_v9  ;;  %4528 = vmatpush3.msra.mxu1 %v6078_v22 }
  0xb4   :  { %586 = vmatpush1.msra.mxu0 %v6013_v10  ;;  %4529 = vmatprep.subr.mxu1 %v7953_v1 }
  0xb5   :  { %379 = vmatmul.mubr.f32.gmra.mxu0 %v216_v12  ;;  %587 = vmatprep.subr.mxu0 %v6026_v13 }
  0xb6   :  { %588 = vmatpush1.msra.mxu0 %v6032_v14  ;;  %384 = vmatprep.mubr.f32.mxu0 %v7953_v1 }
  0xb7   :  { %589 = vmatprep.subr.mxu0 %v6038_v15  ;;  %4530 = vmatpush3.msra.mxu1 %v6113_v28 }
  0xb8   :  { %590 = vmatpush1.msra.mxu0 %v6044_v16  ;;  %4531 = vmatprep.subr.mxu1 %v7953_v1 }
  0xb9   :  { %385 = vmatmul.mubr.f32.gmra.mxu0 %v217_v17  ;;  %591 = vmatprep.subr.mxu0 %v6054_v18 }
  0xba   :  { %592 = vmatpush1.msra.mxu0 %v6060_v19  ;;  %390 = vmatprep.mubr.f32.mxu0 %v7953_v1 }
  0xbb   :  { %593 = vmatprep.subr.mxu0 %v6066_v20  ;;  %4532 = vmatpush3.msra.mxu1 %v6122_v29 }
  0xbc   :  { %594 = vmatpush1.msra.mxu0 %v6073_v21  ;;  %4518 = vmatprep.mubr.f32.mxu1 %v5921_v57 }
  0xbd   :  { %391 = vmatmul.mubr.f32.gmra.mxu0 %v218_v23  ;;  %595 = vmatprep.subr.mxu0 %v6088_v24 }
  0xbe   :  { %596 = vmatpush1.msra.mxu0 %v6094_v25  ;;  %631 = vmatprep.mubr.f32.mxu0 %v7953_v1 }
  0xbf   :  { %597 = vmatprep.subr.mxu0 %v6101_v26  ;;  %4533 = vmatprep.subr.mxu1 %v7953_v1 }
  0xc0   :  { %598 = vmatpush1.msra.mxu0 %v6108_v27  ;;  %4519 = vmatmul.mubr.f32.gmra.mxu1 %v5955_v63 }
  0xc1   :  { %632 = vmatmul.mubr.f32.vlgmr.msra.gmra.mxu0 %v7953_v1  ;;  %4534 = vmatpush3.msra.mxu1 %v6131_v30 }
  0xc2   :  { %4521 = vmatprep.mubr.f32.mxu1 %v5989_v6  ;;  %4535 = vmatprep.subr.mxu1 %v7953_v1 }
  0xc3   :  { %729 = vmatprep.subr.mxu0 %v5860_v46  ;;  %4536 = vmatpush3.msra.mxu1 %v6139_v31 }
  0xc4   :  { %730 = vmatpush1.msra.mxu0 %v5865_v47  ;;  %4537 = vmatprep.subr.mxu1 %v7953_v1 }
  0xc5   :  { %4522 = vmatmul.mubr.f32.gmra.mxu1 %v216_v12  ;;  %731 = vmatprep.subr.mxu0 %v5870_v48 }
  0xc6   :  { %4538 = vmatpush3.msra.mxu1 %v6148_v32  ;;  %4524 = vmatprep.mubr.f32.mxu1 %v217_v17 }
  0xc7   :  { %4539 = vmatprep.subr.mxu1 %v7953_v1  ;;  %732 = vmatpush1.msra.mxu0 %v5877_v49 }
  0xc8   :  { %4540 = vmatpush3.msra.mxu1 %v6157_v33  ;;  %733 = vmatprep.subr.mxu0 %v5892_v52 }
  0xc9   :  { %4541 = vmatprep.subr.mxu1 %v7953_v1  ;;  %4525 = vmatmul.mubr.f32.gmra.mxu1 %v218_v23 }
  0xca   :  { %4542 = vmatpush3.msra.mxu1 %v6164_v34  ;;  %4559 = vmatprep.mubr.msk.f32.mxu1 %vm5519_vm0, %v7953_v1 }
  0xcb   :  { %4543 = vmatprep.subr.mxu1 %v7953_v1  ;;  %734 = vmatpush1.msra.mxu0 %v5898_v53 }
  0xcc   :  { %4544 = vmatpush3.msra.mxu1 %v6173_v35  ;;  %735 = vmatprep.subr.mxu0 %v5904_v54 }
  0xcd   :  { %4545 = vmatprep.subr.mxu1 %v7953_v1  ;;  %736 = vmatpush1.msra.mxu0 %v5911_v55 }
  0xce   :  { %4546 = vmatpush3.msra.mxu1 %v6182_v36  ;;  %737 = vmatprep.subr.mxu0 %v5926_v58 }
  0xcf   :  { %4547 = vmatprep.subr.mxu1 %v7953_v1  ;;  %738 = vmatpush1.msra.mxu0 %v5932_v59 }
  0xd0   :  { %4548 = vmatpush3.msra.mxu1 %v6191_v37  ;;  %739 = vmatprep.subr.mxu0 %v5938_v60 }
  0xd1   :  { %4549 = vmatprep.subr.mxu1 %v7953_v1  ;;  %740 = vmatpush1.msra.mxu0 %v5945_v61 }
  0xd2   :  { %4550 = vmatpush3.msra.mxu1 %v6200_v38  ;;  %741 = vmatprep.subr.mxu0 %v5960_v0 }
  0xd3   :  { %4551 = vmatprep.subr.mxu1 %v7953_v1  ;;  %742 = vmatpush1.msra.mxu0 %v5966_v2 }
  0xd4   :  { %4552 = vmatpush3.msra.mxu1 %v6209_v39  ;;  %743 = vmatprep.subr.mxu0 %v5972_v3 }
  0xd5   :  { %4553 = vmatprep.subr.mxu1 %v7953_v1  ;;  %744 = vmatpush1.msra.mxu0 %v5979_v4 }
  0xd6   :  { %4554 = vmatpush3.msra.mxu1 %v6218_v40  ;;  %745 = vmatprep.subr.mxu0 %v5994_v7 }
  0xd7   :  { %4555 = vmatprep.subr.mxu1 %v7953_v1  ;;  %746 = vmatpush1.msra.mxu0 %v6000_v8 }
  0xd8   :  { %4556 = vmatpush3.msra.mxu1 %v6227_v41  ;;  %747 = vmatprep.subr.mxu0 %v6006_v9 }
  0xd9   :  { %4557 = vmatprep.subr.mxu1 %v7953_v1  ;;  %748 = vmatpush1.msra.mxu0 %v6013_v10 }
  0xda   :  { %4558 = vmatpush3.msra.mxu1 %v6236_v42  ;;  %749 = vmatprep.subr.mxu0 %v6026_v13 }
  0xdb   :  { %4560 = vmatmul.mubr.f32.vlgmr.msra.gmra.mxu1 %v7953_v1  ;;  %4562 = vmatprep.subr.mxu1 %v7953_v1 }
  0xdc   :  { %4563 = vmatpush3.msra.mxu1 %v6078_v22  ;;  %750 = vmatpush1.msra.mxu0 %v6032_v14 }
  0xdd   :  { %4564 = vmatprep.subr.mxu1 %v7953_v1  ;;  %751 = vmatprep.subr.mxu0 %v6038_v15 }
  0xde   :  { %4565 = vmatpush3.msra.mxu1 %v6113_v28  ;;  %752 = vmatpush1.msra.mxu0 %v6044_v16 }
  0xdf   :  { %4566 = vmatprep.subr.mxu1 %v7953_v1  ;;  %753 = vmatprep.subr.mxu0 %v6054_v18 }
  0xe0   :  { %4567 = vmatpush3.msra.mxu1 %v6122_v29  ;;  %754 = vmatpush1.msra.mxu0 %v6060_v19 }
  0xe1   :  { %4568 = vmatprep.subr.mxu1 %v7953_v1  ;;  %755 = vmatprep.subr.mxu0 %v6066_v20 }
  0xe2   :  { %4569 = vmatpush3.msra.mxu1 %v6131_v30  ;;  %756 = vmatpush1.msra.mxu0 %v6073_v21 }
  0xe3   :  { %4570 = vmatprep.subr.mxu1 %v7953_v1  ;;  %757 = vmatprep.subr.mxu0 %v6088_v24 }
  0xe4   :  { %4571 = vmatpush3.msra.mxu1 %v6139_v31  ;;  %758 = vmatpush1.msra.mxu0 %v6094_v25 }
  0xe5   :  { %4572 = vmatprep.subr.mxu1 %v7953_v1  ;;  %759 = vmatprep.subr.mxu0 %v6101_v26 }
  0xe6   :  { %4573 = vmatpush3.msra.mxu1 %v6148_v32  ;;  %760 = vmatpush1.msra.mxu0 %v6108_v27 }
  0xe7   :  { %4574 = vmatprep.subr.mxu1 %v7953_v1  ;;  %793 = vmatprep.mubr.f32.mxu0 %v7953_v1 }
  0xe8   :  { %4575 = vmatpush3.msra.mxu1 %v6157_v33  ;;  %4594 = vmatprep.mubr.msk.f32.mxu1 %vm5519_vm0, %v7953_v1 }
  0xe9   :  { %4576 = vmatprep.subr.mxu1 %v7953_v1  ;;  %891 = vmatprep.subr.mxu0 %v5860_v46 }
  0xea   :  { %4577 = vmatpush3.msra.mxu1 %v6164_v34 }
  0xeb   :  { %4578 = vmatprep.subr.mxu1 %v7953_v1 }
  0xec   :  { %4579 = vmatpush3.msra.mxu1 %v6173_v35 }
  0xed   :  { %4580 = vmatprep.subr.mxu1 %v7953_v1 }
  0xee   :  { %4581 = vmatpush3.msra.mxu1 %v6182_v36 }
  0xef   :  { %4582 = vmatprep.subr.mxu1 %v7953_v1 }
  0xf0   :  { %4583 = vmatpush3.msra.mxu1 %v6191_v37 }
  0xf1   :  { %4584 = vmatprep.subr.mxu1 %v7953_v1 }
  0xf2   :  { %4585 = vmatpush3.msra.mxu1 %v6200_v38 }
  0xf3   :  { %4586 = vmatprep.subr.mxu1 %v7953_v1 }
  0xf4   :  { %4587 = vmatpush3.msra.mxu1 %v6209_v39 }
  0xf5   :  { %4588 = vmatprep.subr.mxu1 %v7953_v1 }
  0xf6   :  { %4589 = vmatpush3.msra.mxu1 %v6218_v40 }
  0xf7   :  { %4590 = vmatprep.subr.mxu1 %v7953_v1 }
  0xf8   :  { %4591 = vmatpush3.msra.mxu1 %v6227_v41 }
  0xf9   :  { %4592 = vmatprep.subr.mxu1 %v7953_v1 }
  0xfa   :  { %4593 = vmatpush3.msra.mxu1 %v6236_v42 }
  0xfb   :  { %4597 = vmatprep.subr.mxu1 %v7953_v1 }
 0x161   :  { %v350_v51 = vpop.f32.mrf.mxu0 }
 0x163   :  { %v352_v57 = vpop.f32.mrf.mxu0 }
 0x165   :  { %v356_v63 = vpop.f32.mrf.mxu0 }
 0x166   :  { %v6309_v6 = vadd.f32 %v356_v63, %v272_v62 }
 0x167   :  { %v358_v11 = vpop.f32.mrf.mxu0 }
 0x168   :  { %8020 = vst [vmem:[#allocation34_spill] sm:$0xff] %v6309_v6  ;;  %v6311_v12 = vadd.f32 %v358_v11, %v276_v5  ;;  %v6326_v11 = vsub.s32 2, %v6296_v44 }
 0x169   :  { %v362_v17 = vpop.f32.mrf.mxu0 }
 0x16a   :  { %8021 = vst [vmem:[#allocation35_spill] sm:$0xff] %v6311_v12  ;;  %v6313_v23 = vadd.f32 %v362_v17, %v272_v62  ;;  %8028 = vst [vmem:[#allocation42_spill] sm:$0xff] %v6326_v11 }
 0x16b   :  { %v364_v43 = vpop.f32.mrf.mxu0 }
 0x16c   :  { %8022 = vst [vmem:[#allocation36_spill] sm:$0xff] %v6313_v23  ;;  %v6315_v1 = vadd.f32 %v364_v43, %v276_v5 }
 0x16d   :  { %v368_v46 = vpop.f32.mrf.mxu0 }
 0x16e   :  { %8023 = vst [vmem:[#allocation37_spill] sm:$0xff] %v6315_v1  ;;  %v6317_v42 = vadd.f32 %v368_v46, %v272_v62  ;;  %v280_v46 = vrot.slane %v267_v50, %v6326_v11 }
 0x16f   :  { %v370_v27 = vpop.f32.mrf.mxu0 }
 0x170   :  { %8024 = vst [vmem:[#allocation38_spill] sm:$0xff] %v6317_v42  ;;  %v6319_v26 = vadd.f32 %v370_v27, %v276_v5 }
 0x171   :  { %v374_v41 = vpop.f32.mrf.mxu0 }
 0x172   :  { %8025 = vst [vmem:[#allocation39_spill] sm:$0xff] %v6319_v26  ;;  %v6321_v25 = vadd.f32 %v374_v41, %v272_v62  ;;  %v550_v41 = vld [vmem:[%s8032_s30] sm:$0x7] }
 0x173   :  { %v376_v63 = vpop.f32.mrf.mxu0  ;;  %v6351_v24 = vrot.slane %v550_v41, %v6305_v56 }
 0x174   :  { %8026 = vst [vmem:[#allocation40_spill] sm:$0xff] %v6321_v25  ;;  %v6323_v6 = vadd.f32 %v376_v63, %v276_v5  ;;  %v4517_v63 = vpop.f32.mrf.mxu1  ;;  %v351_v25 = vadd.f32 %v350_v51, %v272_v62 }
 0x175   :  { %v380_v17 = vpop.f32.mrf.mxu0  ;;  %v6340_v44 = vadd.f32 %v4517_v63, %v280_v46 }
 0x176   :  { %8027 = vst [vmem:[#allocation41_spill] sm:$0xff] %v6323_v6  ;;  %v6328_v23 = vadd.f32 %v380_v17, %v272_v62 }
 0x177   :  { %v382_v43 = vpop.f32.mrf.mxu0  ;;  %8034 = vst [vmem:[#allocation47_spill] sm:$0xff] %v6340_v44 }
 0x178   :  { %8029 = vst [vmem:[#allocation43_spill] sm:$0xff] %v6328_v23  ;;  %v6330_v1 = vadd.f32 %v382_v43, %v276_v5  ;;  %v6345_v43 = vrot.slane %v550_v41, %v6299_v45 }
 0x179   :  { %v386_v42 = vpop.f32.mrf.mxu0 }
 0x17a   :  { %8030 = vst [vmem:[#allocation44_spill] sm:$0xff] %v6330_v1  ;;  %v6333_v27 = vadd.f32 %v386_v42, %v272_v62  ;;  %8036 = vst [vmem:[#allocation49_spill] sm:$0xff] %v6345_v43 }
 0x17b   :  { %v388_v26 = vpop.f32.mrf.mxu0 }
 0x17c   :  { %8031 = vst [vmem:[#allocation45_spill] sm:$0xff] %v6333_v27  ;;  %v6338_v6 = vadd.f32 %v388_v26, %v276_v5  ;;  %v463_v27 = vpop.f32.mrf.mxu1 }
 0x17d   :  { %v392_v17 = vpop.f32.mrf.mxu0 }
 0x17e   :  { %8033 = vst [vmem:[#allocation46_spill] sm:$0xff] %v6338_v6  ;;  %v6342_v23 = vadd.f32 %v392_v17, %v272_v62 }
 0x17f   :  { %v394_v50 = vpop.f32.mrf.mxu0 }
 0x180   :  { %8035 = vst [vmem:[#allocation48_spill] sm:$0xff] %v6342_v23  ;;  %v6347_v1 = vadd.f32 %v394_v50, %v276_v5  ;;  %v4520_v63 = vpop.f32.mrf.mxu1 }
 0x181   :  { %v633_v42 = vpop.f32.mrf.mxu0  ;;  %v6353_v44 = vadd.f32 %v4520_v63, %v280_v46 }
 0x182   :  { %8037 = vst [vmem:[#allocation50_spill] sm:$0xff] %v6347_v1  ;;  %v634_v12 = vadd.f32 %v633_v42, %v6345_v43  ;;  %v473_v17 = vpop.f32.mrf.mxu1  ;;  %v353_v1 = vadd.f32 %v352_v57, %v276_v5  ;;  %v6367_v57 = vrot.slane %v550_v41, %v6326_v11  ;;  %v8047_v41 = vld [vmem:[#allocation24_spill] sm:$0xff] }
 0x183   :  { %v635_v26 = vpop.f32.mrf.mxu0  ;;  %8038 = vst [vmem:[#allocation51_spill] sm:$0xff] %v6353_v44  ;;  %v6356_v40 = vadd.f32 %v473_v17, %v280_v46  ;;  %v8056_v44 = vld [vmem:[#allocation35_spill] sm:$0xff] }
 0x184   :  { %v708_v6 = vadd.f32 %v634_v12, %v351_v25  ;;  %v636_v45 = vadd.f32 %v635_v26, %v6351_v24 }
 0x185   :  { %8039 = vst [vmem:[#allocation52_spill] sm:$0xff] %v6356_v40  ;;  %v4523_v50 = vpop.f32.mrf.mxu1 }
 0x186   :  { %v3983_v23 = vmul.f32 -1.442695, %v708_v6  ;;  %v6358_v51 = vadd.f32 %v4523_v50, %v280_v46  ;;  %v709_v42 = vadd.f32 %v636_v45, %v353_v1 }
 0x187   :  { %v483_v62 = vpop.f32.mrf.mxu1 }
 0x188   :  { %5069 = vpow2.f32 %v3983_v23  ;;  %8040 = vst [vmem:[#allocation53_spill] sm:$0xff] %v6358_v51  ;;  %v6360_v56 = vadd.f32 %v483_v62, %v280_v46  ;;  %v3984_v12 = vmul.f32 -1.442695, %v709_v42 }
 0x189   :  { %v4526_v43 = vpop.f32.mrf.mxu1 }
 0x18a   :  { %8041 = vst [vmem:[#allocation54_spill] sm:$0xff] %v6360_v56  ;;  %v6362_v21 = vadd.f32 %v4526_v43, %v280_v46  ;;  %5071 = vpow2.f32 %v3984_v12  ;;  %v464_v43 = vadd.f32 %v463_v27, %v280_v46  ;;  %v8046_v27 = vld [vmem:[#allocation28_spill] sm:$0xff] }
 0x18b   :  { %v493_v25 = vpop.f32.mrf.mxu1 }
 0x18c   :  { %8042 = vst [vmem:[#allocation55_spill] sm:$0xff] %v6362_v21  ;;  %v6364_v63 = vadd.f32 %v493_v25, %v280_v46  ;;  %v8044_v46 = vmov 0.0  }
 0x18e   :  { %8043 = vst [vmem:[#allocation56_spill] sm:$0xff] %v6364_v63 }
 0x195   :  { %v5070_v6 = vpop.eup %5069 }
 0x196   :  { %v716_v26 = vadd.f32 1.0, %v5070_v6 }
 0x197   :  { %v5072_v5 = vpop.eup %5071 }
 0x198   :  { %5073 = vrcp.f32 %v716_v26  ;;  %v717_v1 = vadd.f32 1.0, %v5072_v5  ;;  %v8049_v5 = vld [vmem:[#allocation29_spill] sm:$0xff] }
 0x19a   :  { %5075 = vrcp.f32 %v717_v1  ;;  %v8051_v1 = vld [vmem:[#allocation27_spill] sm:$0xff] }
 0x19b   :  { %v704_v17 = vpop.f32.mrf.mxu1 }
 0x19c   :  { %v705_v45 = vadd.f32 %v704_v17, %v6367_v57  ;;  %v8048_v17 = vld [vmem:[#allocation25_spill] sm:$0xff] }
 0x19d   :  { %v4561_v23 = vpop.f32.mrf.mxu1 }
 0x19e   :  { %v8050_v23 = vld [vmem:[#allocation26_spill] sm:$0xff] }
 0x1a5   :  { %v5074_v50 = vpop.eup %5073 }
 0x1a6   :  { %v722_v62 = vmul.f32 %v5074_v50, %v705_v45  ;;  %v8052_v45 = vld [vmem:[#allocation30_spill] sm:$0xff] }
 0x1a7   :  { %v5076_v25 = vpop.eup %5075  ;;  %v8053_v50 = vld [vmem:[#allocation22_spill] sm:$0xff] }
 0x1a8   :  { %v723_v42 = vadd.f32 %v722_v62, %v464_v43  ;;  %v725_v12 = vsub.f32 1.0, %v5076_v25  ;;  %v727_v26 = vmul.f32 0.0, %v5076_v25 }
 0x1aa   :  { %5077 = vtanh.f32 %v723_v42  ;;  %v8054_v42 = vld [vmem:[#allocation49_spill] sm:$0xff] }
 0x1b7   :  { %v5078_v21 = vpop.eup %5077 }
 0x1b8   :  { %v726_v6 = vmul.f32 %v5078_v21, %v725_v12  ;;  %v8045_v21 = vld [vmem:[#allocation23_spill] sm:$0xff] }
 0x1ba   :  { %v6370_v63 = vadd.f32 %v727_v26, %v726_v6  ;;  %v8055_v26 = vld [vmem:[#allocation34_spill] sm:$0xff] }
 0x1bc   :  { %794 = vmatmul.mubr.f32.vlgmr.msra.gmra.mxu0 %v6370_v63  ;;  %4595 = vmatmul.mubr.f32.vlgmr.msra.gmra.mxu1 %v6370_v63 }
 0x1bd   :  { %892 = vmatpush1.msra.mxu0 %v5865_v47  ;;  %4598 = vmatpush3.msra.mxu1 %v6078_v22 }
 0x1be   :  { %893 = vmatprep.subr.mxu0 %v5870_v48  ;;  %4599 = vmatprep.subr.mxu1 %v8044_v46 }
 0x1bf   :  { %894 = vmatpush1.msra.mxu0 %v5877_v49  ;;  %4600 = vmatpush3.msra.mxu1 %v6113_v28 }
 0x1c0   :  { %895 = vmatprep.subr.mxu0 %v5892_v52  ;;  %4601 = vmatprep.subr.mxu1 %v8044_v46 }
 0x1c1   :  { %896 = vmatpush1.msra.mxu0 %v5898_v53  ;;  %4602 = vmatpush3.msra.mxu1 %v6122_v29 }
 0x1c2   :  { %897 = vmatprep.subr.mxu0 %v5904_v54  ;;  %4603 = vmatprep.subr.mxu1 %v8044_v46 }
 0x1c3   :  { %898 = vmatpush1.msra.mxu0 %v5911_v55  ;;  %4604 = vmatpush3.msra.mxu1 %v6131_v30 }
 0x1c4   :  { %899 = vmatprep.subr.mxu0 %v5926_v58  ;;  %4605 = vmatprep.subr.mxu1 %v8044_v46 }
 0x1c5   :  { %900 = vmatpush1.msra.mxu0 %v5932_v59  ;;  %4606 = vmatpush3.msra.mxu1 %v6139_v31 }
 0x1c6   :  { %901 = vmatprep.subr.mxu0 %v5938_v60  ;;  %4607 = vmatprep.subr.mxu1 %v8044_v46 }
 0x1c7   :  { %902 = vmatpush1.msra.mxu0 %v5945_v61  ;;  %4608 = vmatpush3.msra.mxu1 %v6148_v32 }
 0x1c8   :  { %903 = vmatprep.subr.mxu0 %v5960_v0  ;;  %4609 = vmatprep.subr.mxu1 %v8044_v46 }
 0x1c9   :  { %904 = vmatpush1.msra.mxu0 %v5966_v2  ;;  %4610 = vmatpush3.msra.mxu1 %v6157_v33 }
 0x1ca   :  { %905 = vmatprep.subr.mxu0 %v5972_v3  ;;  %4611 = vmatprep.subr.mxu1 %v8044_v46 }
 0x1cb   :  { %906 = vmatpush1.msra.mxu0 %v5979_v4  ;;  %4612 = vmatpush3.msra.mxu1 %v6164_v34 }
 0x1cc   :  { %907 = vmatprep.subr.mxu0 %v5994_v7  ;;  %4613 = vmatprep.subr.mxu1 %v8044_v46 }
 0x1cd   :  { %908 = vmatpush1.msra.mxu0 %v6000_v8  ;;  %4614 = vmatpush3.msra.mxu1 %v6173_v35 }
 0x1ce   :  { %909 = vmatprep.subr.mxu0 %v6006_v9  ;;  %4615 = vmatprep.subr.mxu1 %v8044_v46 }
 0x1cf   :  { %910 = vmatpush1.msra.mxu0 %v6013_v10  ;;  %4616 = vmatpush3.msra.mxu1 %v6182_v36 }
 0x1d0   :  { %911 = vmatprep.subr.mxu0 %v6026_v13  ;;  %4617 = vmatprep.subr.mxu1 %v8044_v46 }
 0x1d1   :  { %912 = vmatpush1.msra.mxu0 %v6032_v14  ;;  %4618 = vmatpush3.msra.mxu1 %v6191_v37 }
 0x1d2   :  { %913 = vmatprep.subr.mxu0 %v6038_v15  ;;  %4619 = vmatprep.subr.mxu1 %v8044_v46 }
 0x1d3   :  { %914 = vmatpush1.msra.mxu0 %v6044_v16  ;;  %4620 = vmatpush3.msra.mxu1 %v6200_v38 }
 0x1d4   :  { %915 = vmatprep.subr.mxu0 %v6054_v18  ;;  %4621 = vmatprep.subr.mxu1 %v8044_v46 }
 0x1d5   :  { %916 = vmatpush1.msra.mxu0 %v6060_v19  ;;  %4622 = vmatpush3.msra.mxu1 %v6209_v39 }
 0x1d6   :  { %917 = vmatprep.subr.mxu0 %v6066_v20  ;;  %4623 = vmatprep.subr.mxu1 %v8044_v46 }
 0x1d7   :  { %918 = vmatpush1.msra.mxu0 %v8045_v21  ;;  %4624 = vmatpush3.msra.mxu1 %v8046_v27 }
 0x1d8   :  { %919 = vmatprep.subr.mxu0 %v8047_v41  ;;  %4625 = vmatprep.subr.mxu1 %v8044_v46 }
 0x1d9   :  { %920 = vmatpush1.msra.mxu0 %v8048_v17  ;;  %4626 = vmatpush3.msra.mxu1 %v8049_v5 }
 0x1da   :  { %921 = vmatprep.subr.mxu0 %v8050_v23  ;;  %4627 = vmatprep.subr.mxu1 %v8044_v46 }
 0x1db   :  { %922 = vmatpush1.msra.mxu0 %v8051_v1  ;;  %955 = vmatprep.mubr.f32.mxu0 %v8044_v46 }
 0x1dc   :  { %4628 = vmatpush3.msra.mxu1 %v8052_v45  ;;  %4629 = vmatprep.mubr.msk.f32.mxu1 %vm5519_vm0, %v8044_v46 }
 0x1dd   :  { %1053 = vmatprep.subr.mxu0 %v8053_v50  ;;  %4632 = vmatprep.subr.mxu1 %v8044_v46 }
 0x27c   :  { %v795_v43 = vpop.f32.mrf.mxu0  ;;  %v866_v62 = vpop.f32.mrf.mxu1 }
 0x27d   :  { %v796_v25 = vadd.f32 %v795_v43, %v8054_v42  ;;  %v867_v17 = vadd.f32 %v866_v62, %v6367_v57 }
 0x27e   :  { %v797_v12 = vpop.f32.mrf.mxu0  ;;  %v4596_v6 = vpop.f32.mrf.mxu1 }
 0x27f   :  { %v870_v11 = vadd.f32 %v796_v25, %v8055_v26  ;;  %v798_v56 = vadd.f32 %v797_v12, %v6351_v24  ;;  %v8057_v6 = vld [vmem:[#allocation47_spill] sm:$0xff] }
 0x281   :  { %v3985_v51 = vmul.f32 -1.442695, %v870_v11  ;;  %v871_v40 = vadd.f32 %v798_v56, %v8056_v44  ;;  %v8063_v56 = vld [vmem:[#allocation22_spill] sm:$0xff] }
 0x283   :  { %5079 = vpow2.f32 %v3985_v51  ;;  %v3986_v45 = vmul.f32 -1.442695, %v871_v40 }
 0x285   :  { %5081 = vpow2.f32 %v3986_v45 }
 0x290   :  { %v5080_v1 = vpop.eup %5079 }
 0x291   :  { %v878_v50 = vadd.f32 1.0, %v5080_v1 }
 0x292   :  { %v5082_v23 = vpop.eup %5081 }
 0x293   :  { %5083 = vrcp.f32 %v878_v50  ;;  %v879_v5 = vadd.f32 1.0, %v5082_v23  ;;  %v8065_v50 = vld [vmem:[#allocation36_spill] sm:$0xff] }
 0x295   :  { %5085 = vrcp.f32 %v879_v5  ;;  %v8064_v5 = vld [vmem:[#allocation49_spill] sm:$0xff] }
 0x2a0   :  { %v5084_v43 = vpop.eup %5083 }
 0x2a1   :  { %v884_v42 = vmul.f32 %v5084_v43, %v867_v17 }
 0x2a2   :  { %v5086_v11 = vpop.eup %5085 }
 0x2a3   :  { %v885_v25 = vadd.f32 %v884_v42, %v8057_v6  ;;  %v887_v12 = vsub.f32 1.0, %v5086_v11  ;;  %v889_v40 = vmul.f32 %v5086_v11, %v6370_v63  ;;  %v8066_v6 = vld [vmem:[#allocation37_spill] sm:$0xff] }
 0x2a5   :  { %5087 = vtanh.f32 %v885_v25 }
 0x2b2   :  { %v5088_v51 = vpop.eup %5087 }
 0x2b3   :  { %v888_v26 = vmul.f32 %v5088_v51, %v887_v12 }
 0x2b5   :  { %v6448_v44 = vadd.f32 %v889_v40, %v888_v26 }
 0x2b7   :  { %956 = vmatmul.mubr.f32.vlgmr.msra.gmra.mxu0 %v6448_v44  ;;  %4630 = vmatmul.mubr.f32.vlgmr.msra.gmra.mxu1 %v6448_v44 }
 0x2b8   :  { %1054 = vmatpush1.msra.mxu0 %v5865_v47  ;;  %4633 = vmatpush3.msra.mxu1 %v6078_v22  ;;  %v8058_v47 = vld [vmem:[#allocation25_spill] sm:$0xff] }
 0x2b9   :  { %1055 = vmatprep.subr.mxu0 %v5870_v48  ;;  %4634 = vmatprep.subr.mxu1 %v8044_v46  ;;  %v8059_v48 = vld [vmem:[#allocation29_spill] sm:$0xff] }
 0x2ba   :  { %1056 = vmatpush1.msra.mxu0 %v5877_v49  ;;  %4635 = vmatpush3.msra.mxu1 %v6113_v28  ;;  %v8060_v49 = vld [vmem:[#allocation26_spill] sm:$0xff] }
 0x2bb   :  { %1057 = vmatprep.subr.mxu0 %v5892_v52  ;;  %4636 = vmatprep.subr.mxu1 %v8044_v46  ;;  %v8061_v52 = vld [vmem:[#allocation27_spill] sm:$0xff] }
 0x2bc   :  { %1058 = vmatpush1.msra.mxu0 %v5898_v53  ;;  %4637 = vmatpush3.msra.mxu1 %v6122_v29  ;;  %v8062_v53 = vld [vmem:[#allocation30_spill] sm:$0xff] }
 0x2bd   :  { %1059 = vmatprep.subr.mxu0 %v5904_v54  ;;  %4638 = vmatprep.subr.mxu1 %v8044_v46 }
 0x2be   :  { %1060 = vmatpush1.msra.mxu0 %v5911_v55  ;;  %4639 = vmatpush3.msra.mxu1 %v6131_v30 }
 0x2bf   :  { %1061 = vmatprep.subr.mxu0 %v5926_v58  ;;  %4640 = vmatprep.subr.mxu1 %v8044_v46 }
 0x2c0   :  { %1062 = vmatpush1.msra.mxu0 %v5932_v59  ;;  %4641 = vmatpush3.msra.mxu1 %v6139_v31 }
 0x2c1   :  { %1063 = vmatprep.subr.mxu0 %v5938_v60  ;;  %4642 = vmatprep.subr.mxu1 %v8044_v46 }
 0x2c2   :  { %1064 = vmatpush1.msra.mxu0 %v5945_v61  ;;  %4643 = vmatpush3.msra.mxu1 %v6148_v32 }
 0x2c3   :  { %1065 = vmatprep.subr.mxu0 %v5960_v0  ;;  %4644 = vmatprep.subr.mxu1 %v8044_v46 }
 0x2c4   :  { %1066 = vmatpush1.msra.mxu0 %v5966_v2  ;;  %4645 = vmatpush3.msra.mxu1 %v6157_v33 }
 0x2c5   :  { %1067 = vmatprep.subr.mxu0 %v5972_v3  ;;  %4646 = vmatprep.subr.mxu1 %v8044_v46 }
 0x2c6   :  { %1068 = vmatpush1.msra.mxu0 %v5979_v4  ;;  %4647 = vmatpush3.msra.mxu1 %v6164_v34 }
 0x2c7   :  { %1069 = vmatprep.subr.mxu0 %v5994_v7  ;;  %4648 = vmatprep.subr.mxu1 %v8044_v46 }
 0x2c8   :  { %1070 = vmatpush1.msra.mxu0 %v6000_v8  ;;  %4649 = vmatpush3.msra.mxu1 %v6173_v35 }
 0x2c9   :  { %1071 = vmatprep.subr.mxu0 %v6006_v9  ;;  %4650 = vmatprep.subr.mxu1 %v8044_v46 }
 0x2ca   :  { %1072 = vmatpush1.msra.mxu0 %v6013_v10  ;;  %4651 = vmatpush3.msra.mxu1 %v6182_v36 }
 0x2cb   :  { %1073 = vmatprep.subr.mxu0 %v6026_v13  ;;  %4652 = vmatprep.subr.mxu1 %v8044_v46 }
 0x2cc   :  { %1074 = vmatpush1.msra.mxu0 %v6032_v14  ;;  %4653 = vmatpush3.msra.mxu1 %v6191_v37 }
 0x2cd   :  { %1075 = vmatprep.subr.mxu0 %v6038_v15  ;;  %4654 = vmatprep.subr.mxu1 %v8044_v46 }
 0x2ce   :  { %1076 = vmatpush1.msra.mxu0 %v6044_v16  ;;  %4655 = vmatpush3.msra.mxu1 %v6200_v38 }
 0x2cf   :  { %1077 = vmatprep.subr.mxu0 %v6054_v18  ;;  %4656 = vmatprep.subr.mxu1 %v8044_v46 }
 0x2d0   :  { %1078 = vmatpush1.msra.mxu0 %v6060_v19  ;;  %4657 = vmatpush3.msra.mxu1 %v6209_v39 }
 0x2d1   :  { %1079 = vmatprep.subr.mxu0 %v6066_v20  ;;  %4658 = vmatprep.subr.mxu1 %v8044_v46 }
 0x2d2   :  { %1080 = vmatpush1.msra.mxu0 %v8045_v21  ;;  %4659 = vmatpush3.msra.mxu1 %v8046_v27 }
 0x2d3   :  { %1081 = vmatprep.subr.mxu0 %v8047_v41  ;;  %4660 = vmatprep.subr.mxu1 %v8044_v46 }
 0x2d4   :  { %1082 = vmatpush1.msra.mxu0 %v8058_v47  ;;  %4661 = vmatpush3.msra.mxu1 %v8059_v48 }
 0x2d5   :  { %1083 = vmatprep.subr.mxu0 %v8060_v49  ;;  %4662 = vmatprep.subr.mxu1 %v8044_v46 }
 0x2d6   :  { %1084 = vmatpush1.msra.mxu0 %v8061_v52  ;;  %1117 = vmatprep.mubr.f32.mxu0 %v8044_v46 }
 0x2d7   :  { %4663 = vmatpush3.msra.mxu1 %v8062_v53  ;;  %4664 = vmatprep.mubr.msk.f32.mxu1 %vm5519_vm0, %v8044_v46 }
 0x2d8   :  { %1215 = vmatprep.subr.mxu0 %v8063_v56  ;;  %4667 = vmatprep.subr.mxu1 %v8044_v46 }
 0x377   :  { %v957_v63 = vpop.f32.mrf.mxu0  ;;  %v1028_v17 = vpop.f32.mrf.mxu1 }
 0x378   :  { %v958_v23 = vadd.f32 %v957_v63, %v8064_v5  ;;  %v1029_v56 = vadd.f32 %v1028_v17, %v6367_v57  ;;  %v6533_v17 = vld [vmem:[%s8006_s13 + $0x168] sm:$0xff] }
 0x379   :  { %v959_v1 = vpop.f32.mrf.mxu0  ;;  %v4631_v45 = vpop.f32.mrf.mxu1 }
 0x37a   :  { %v1032_v62 = vadd.f32 %v958_v23, %v8065_v50  ;;  %v960_v43 = vadd.f32 %v959_v1, %v6351_v24  ;;  %v8067_v45 = vld [vmem:[#allocation52_spill] sm:$0xff] }
 0x37c   :  { %v3987_v42 = vmul.f32 -1.442695, %v1032_v62  ;;  %v1033_v25 = vadd.f32 %v960_v43, %v8066_v6 }
 0x37e   :  { %5089 = vpow2.f32 %v3987_v42  ;;  %v3988_v11 = vmul.f32 -1.442695, %v1033_v25  ;;  %v6561_v25 = vld [vmem:[%s8006_s13 + $0x138] sm:$0xff] }
 0x380   :  { %5091 = vpow2.f32 %v3988_v11  ;;  %v6660_v11 = vld [vmem:[%s8006_s13 + $0x148] sm:$0xff] }
 0x38b   :  { %v5090_v12 = vpop.eup %5089 }
 0x38c   :  { %v1040_v51 = vadd.f32 1.0, %v5090_v12  ;;  %v6666_v12 = vld [vmem:[%s8006_s13 + $0x128] sm:$0xff] }
 0x38d   :  { %v5092_v26 = vpop.eup %5091 }
 0x38e   :  { %5093 = vrcp.f32 %v1040_v51  ;;  %v1041_v40 = vadd.f32 1.0, %v5092_v26  ;;  %v6673_v51 = vld [vmem:[%s8006_s13 + $0x120] sm:$0xff]  ;;  %v6679_v26 = vld [vmem:[%s8006_s13 + $0x130] sm:$0xff] }
 0x390   :  { %5095 = vrcp.f32 %v1041_v40  ;;  %v6685_v40 = vld [vmem:[%s8006_s13 + $0x110] sm:$0xff] }
 0x39b   :  { %v5094_v63 = vpop.eup %5093 }
 0x39c   :  { %v1046_v5 = vmul.f32 %v5094_v63, %v1029_v56  ;;  %v6692_v56 = vld [vmem:[%s8006_s13 + $0x108] sm:$0xff]  ;;  %v6698_v63 = vld [vmem:[%s8006_s13 + $0x118] sm:$0xff] }
 0x39d   :  { %v5096_v50 = vpop.eup %5095 }
 0x39e   :  { %v1047_v23 = vadd.f32 %v1046_v5, %v8067_v45  ;;  %v1049_v1 = vsub.f32 1.0, %v5096_v50  ;;  %v1051_v43 = vmul.f32 %v5096_v50, %v6448_v44  ;;  %v6540_v5 = vld [vmem:[%s8006_s13 + $0x158] sm:$0xff]  ;;  %v6547_v44 = vld [vmem:[%s8006_s13 + $0x150] sm:$0xff]  ;;  %v6717_v50 = vld [vmem:[%s8006_s13 + $0x100] sm:$0xff] }
 0x39f   :  { %v6704_v45 = vld [vmem:[%s8006_s13 + $0xf8] sm:$0xff] }
 0x3a0   :  { %5097 = vtanh.f32 %v1047_v23  ;;  %v6711_v23 = vld [vmem:[%s8006_s13 + $0xf0] sm:$0xff] }
 0x3ad   :  { %v5098_v62 = vpop.eup %5097 }
 0x3ae   :  { %v1050_v42 = vmul.f32 %v5098_v62, %v1049_v1  ;;  %v6723_v1 = vld [vmem:[%s8006_s13 + $0xe0] sm:$0xff]  ;;  %v6730_v62 = vld [vmem:[%s8006_s13 + $0xd8] sm:$0xff] }
 0x3b0   :  { %v6526_v6 = vadd.f32 %v1051_v43, %v1050_v42  ;;  %v6737_v42 = vld [vmem:[%s8006_s13 + $0xc8] sm:$0xff]  ;;  %v6744_v43 = vld [vmem:[%s8006_s13 + $0xc0] sm:$0xff] }
 0x3b2   :  { %1118 = vmatmul.mubr.f32.vlgmr.msra.gmra.mxu0 %v6526_v6  ;;  %4665 = vmatmul.mubr.f32.vlgmr.msra.gmra.mxu1 %v6526_v6 }
 0x3b3   :  { %1216 = vmatpush1.msra.mxu0 %v6533_v17  ;;  %4668 = vmatpush3.msra.mxu1 %v6078_v22  ;;  %v6554_v22 = vld [vmem:[%s8006_s13 + $0x140] sm:$0xff] }
 0x3b4   :  { %1217 = vmatprep.subr.mxu0 %v6540_v5  ;;  %4669 = vmatprep.subr.mxu1 %v8044_v46 }
 0x3b5   :  { %1218 = vmatpush1.msra.mxu0 %v6547_v44  ;;  %4670 = vmatpush3.msra.mxu1 %v6113_v28  ;;  %v8071_v28 = vld [vmem:[#allocation51_spill] sm:$0xff] }
 0x3b6   :  { %1219 = vmatprep.subr.mxu0 %v6554_v22  ;;  %4671 = vmatprep.subr.mxu1 %v8044_v46 }
 0x3b7   :  { %1220 = vmatpush1.msra.mxu0 %v6561_v25  ;;  %4672 = vmatpush3.msra.mxu1 %v6122_v29 }
 0x3b8   :  { %1221 = vmatprep.subr.mxu0 %v5904_v54  ;;  %4673 = vmatprep.subr.mxu1 %v8044_v46  ;;  %v6623_v54 = vld [vmem:[%s8006_s13 + $0x170] sm:$0xff] }
 0x3b9   :  { %1222 = vmatpush1.msra.mxu0 %v5911_v55  ;;  %4674 = vmatpush3.msra.mxu1 %v6131_v30 }
 0x3ba   :  { %1223 = vmatprep.subr.mxu0 %v5926_v58  ;;  %4675 = vmatprep.subr.mxu1 %v8044_v46 }
 0x3bb   :  { %1224 = vmatpush1.msra.mxu0 %v5932_v59  ;;  %4676 = vmatpush3.msra.mxu1 %v6139_v31  ;;  %v8068_v59 = vld [vmem:[#allocation49_spill] sm:$0xff] }
 0x3bc   :  { %1225 = vmatprep.subr.mxu0 %v5938_v60  ;;  %4677 = vmatprep.subr.mxu1 %v8044_v46 }
 0x3bd   :  { %1226 = vmatpush1.msra.mxu0 %v5945_v61  ;;  %4678 = vmatpush3.msra.mxu1 %v6148_v32 }
 0x3be   :  { %1227 = vmatprep.subr.mxu0 %v5960_v0  ;;  %4679 = vmatprep.subr.mxu1 %v8044_v46 }
 0x3bf   :  { %1228 = vmatpush1.msra.mxu0 %v5966_v2  ;;  %4680 = vmatpush3.msra.mxu1 %v6157_v33  ;;  %v8069_v2 = vld [vmem:[#allocation38_spill] sm:$0xff] }
 0x3c0   :  { %1229 = vmatprep.subr.mxu0 %v5972_v3  ;;  %4681 = vmatprep.subr.mxu1 %v8044_v46 }
 0x3c1   :  { %1230 = vmatpush1.msra.mxu0 %v5979_v4  ;;  %4682 = vmatpush3.msra.mxu1 %v6164_v34 }
 0x3c2   :  { %1231 = vmatprep.subr.mxu0 %v5994_v7  ;;  %4683 = vmatprep.subr.mxu1 %v8044_v46 }
 0x3c3   :  { %1232 = vmatpush1.msra.mxu0 %v6000_v8  ;;  %4684 = vmatpush3.msra.mxu1 %v6173_v35  ;;  %v8070_v8 = vld [vmem:[#allocation39_spill] sm:$0xff] }
 0x3c4   :  { %1233 = vmatprep.subr.mxu0 %v6006_v9  ;;  %4685 = vmatprep.subr.mxu1 %v8044_v46 }
 0x3c5   :  { %1234 = vmatpush1.msra.mxu0 %v6013_v10  ;;  %4686 = vmatpush3.msra.mxu1 %v6182_v36 }
 0x3c6   :  { %1235 = vmatprep.subr.mxu0 %v6026_v13  ;;  %4687 = vmatprep.subr.mxu1 %v8044_v46 }
 0x3c7   :  { %1236 = vmatpush1.msra.mxu0 %v6032_v14  ;;  %4688 = vmatpush3.msra.mxu1 %v6191_v37 }
 0x3c8   :  { %1237 = vmatprep.subr.mxu0 %v6038_v15  ;;  %4689 = vmatprep.subr.mxu1 %v8044_v46 }
 0x3c9   :  { %1238 = vmatpush1.msra.mxu0 %v6044_v16  ;;  %4690 = vmatpush3.msra.mxu1 %v6200_v38 }
 0x3ca   :  { %1239 = vmatprep.subr.mxu0 %v6054_v18  ;;  %4691 = vmatprep.subr.mxu1 %v8044_v46 }
 0x3cb   :  { %1240 = vmatpush1.msra.mxu0 %v6060_v19  ;;  %4692 = vmatpush3.msra.mxu1 %v6209_v39 }
 0x3cc   :  { %1241 = vmatprep.subr.mxu0 %v6066_v20  ;;  %4693 = vmatprep.subr.mxu1 %v8044_v46 }
 0x3cd   :  { %1242 = vmatpush1.msra.mxu0 %v8045_v21  ;;  %4694 = vmatpush3.msra.mxu1 %v8046_v27 }
 0x3ce   :  { %1243 = vmatprep.subr.mxu0 %v8047_v41  ;;  %4695 = vmatprep.subr.mxu1 %v8044_v46 }
 0x3cf   :  { %1244 = vmatpush1.msra.mxu0 %v8058_v47  ;;  %4696 = vmatpush3.msra.mxu1 %v8059_v48 }
 0x3d0   :  { %1245 = vmatprep.subr.mxu0 %v8060_v49  ;;  %4697 = vmatprep.subr.mxu1 %v8044_v46  ;;  %v6642_v49 = vld [vmem:[%s8006_s13 + $0x178] sm:$0xff] }
 0x3d1   :  { %1246 = vmatpush1.msra.mxu0 %v8061_v52  ;;  %1279 = vmatprep.mubr.f32.mxu0 %v8044_v46  ;;  %v6651_v52 = vld [vmem:[%s8006_s13 + $0x160] sm:$0xff] }
 0x3d2   :  { %4698 = vmatpush3.msra.mxu1 %v8062_v53  ;;  %4699 = vmatprep.mubr.msk.f32.mxu1 %vm5519_vm0, %v8044_v46 }
 0x3d3   :  { %1377 = vmatprep.subr.mxu0 %v6623_v54  ;;  %4702 = vmatprep.subr.mxu1 %v8044_v46 }
 0x472   :  { %v1119_v55 = vpop.f32.mrf.mxu0  ;;  %v1190_v58 = vpop.f32.mrf.mxu1 }
 0x473   :  { %v1120_v60 = vadd.f32 %v1119_v55, %v8068_v59  ;;  %v1191_v18 = vadd.f32 %v1190_v58, %v6367_v57  ;;  %v6772_v55 = vld [vmem:[%s8006_s13 + $0x90] sm:$0xff]  ;;  %v6786_v58 = vld [vmem:[%s8006_s13 + $0x78] sm:$0xff] }
 0x474   :  { %v1121_v61 = vpop.f32.mrf.mxu0  ;;  %v4666_v0 = vpop.f32.mrf.mxu1 }
 0x475   :  { %v1194_v3 = vadd.f32 %v1120_v60, %v8069_v2  ;;  %v1122_v7 = vadd.f32 %v1121_v61, %v6351_v24  ;;  %v6800_v60 = vld [vmem:[%s8006_s13 + $0x60] sm:$0xff]  ;;  %v6814_v61 = vld [vmem:[%s8006_s13 + $0x48] sm:$0xff]  ;;  %v6828_v0 = vld [vmem:[%s8006_s13 + $0x30] sm:$0xff] }
 0x476   :  { %v6842_v2 = vld [vmem:[%s8006_s13 + $0x18] sm:$0xff] }
 0x477   :  { %v3989_v4 = vmul.f32 -1.442695, %v1194_v3  ;;  %v1195_v9 = vadd.f32 %v1122_v7, %v8070_v8  ;;  %8072 = vst [vmem:[#allocation23_spill] sm:$0xff] %v6842_v2  ;;  %v6856_v3 = vld [vmem:[%s8006_s13] sm:$0xff] }
 0x478   :  { %8074 = vst [vmem:[#allocation24_spill] sm:$0xff] %v6856_v3 }
 0x479   :  { %5099 = vpow2.f32 %v3989_v4  ;;  %v3990_v10 = vmul.f32 -1.442695, %v1195_v9 }
 0x47b   :  { %5101 = vpow2.f32 %v3990_v10  ;;  %v8075_v10 = vld [vmem:[#allocation40_spill] sm:$0xff] }
 0x486   :  { %v5100_v13 = vpop.eup %5099 }
 0x487   :  { %v1202_v14 = vadd.f32 1.0, %v5100_v13 }
 0x488   :  { %v5102_v15 = vpop.eup %5101 }
 0x489   :  { %5103 = vrcp.f32 %v1202_v14  ;;  %v1203_v16 = vadd.f32 1.0, %v5102_v15 }
 0x48b   :  { %5105 = vrcp.f32 %v1203_v16 }
 0x496   :  { %v5104_v19 = vpop.eup %5103 }
 0x497   :  { %v1208_v20 = vmul.f32 %v5104_v19, %v1191_v18 }
 0x498   :  { %v5106_v30 = vpop.eup %5105 }
 0x499   :  { %v1209_v29 = vadd.f32 %v1208_v20, %v8071_v28  ;;  %v1211_v31 = vsub.f32 1.0, %v5106_v30  ;;  %v1213_v41 = vmul.f32 %v5106_v30, %v6526_v6  ;;  %v6758_v6 = vld [vmem:[%s8006_s13 + $0xa8] sm:$0xff] }
 0x49b   :  { %5107 = vtanh.f32 %v1209_v29 }
 0x4a8   :  { %v5108_v32 = vpop.eup %5107 }
 0x4a9   :  { %v1212_v21 = vmul.f32 %v5108_v32, %v1211_v31 }
 0x4ab   :  { %v6634_v47 = vadd.f32 %v1213_v41, %v1212_v21  ;;  %v8077_v21 = vld [vmem:[#allocation54_spill] sm:$0xff] }
 0x4ad   :  { %1280 = vmatmul.mubr.f32.vlgmr.msra.gmra.mxu0 %v6634_v47  ;;  %4700 = vmatmul.mubr.f32.vlgmr.msra.gmra.mxu1 %v6634_v47 }
 0x4ae   :  { %1378 = vmatpush1.msra.mxu0 %v6533_v17  ;;  %4703 = vmatpush3.msra.mxu1 %v6642_v49 }
 0x4af   :  { %1379 = vmatprep.subr.mxu0 %v6540_v5  ;;  %4704 = vmatprep.subr.mxu1 %v8044_v46 }
 0x4b0   :  { %1380 = vmatpush1.msra.mxu0 %v6547_v44  ;;  %4705 = vmatpush3.msra.mxu1 %v6651_v52 }
 0x4b1   :  { %1381 = vmatprep.subr.mxu0 %v6554_v22  ;;  %4706 = vmatprep.subr.mxu1 %v8044_v46 }
 0x4b2   :  { %1382 = vmatpush1.msra.mxu0 %v6561_v25  ;;  %4707 = vmatpush3.msra.mxu1 %v6660_v11 }
 0x4b3   :  { %1383 = vmatprep.subr.mxu0 %v6666_v12  ;;  %4708 = vmatprep.subr.mxu1 %v8044_v46 }
 0x4b4   :  { %1384 = vmatpush1.msra.mxu0 %v6673_v51  ;;  %4709 = vmatpush3.msra.mxu1 %v6679_v26 }
 0x4b5   :  { %1385 = vmatprep.subr.mxu0 %v6685_v40  ;;  %4710 = vmatprep.subr.mxu1 %v8044_v46 }
 0x4b6   :  { %1386 = vmatpush1.msra.mxu0 %v6692_v56  ;;  %4711 = vmatpush3.msra.mxu1 %v6698_v63 }
 0x4b7   :  { %1387 = vmatprep.subr.mxu0 %v6704_v45  ;;  %4712 = vmatprep.subr.mxu1 %v8044_v46 }
 0x4b8   :  { %1388 = vmatpush1.msra.mxu0 %v6711_v23  ;;  %4713 = vmatpush3.msra.mxu1 %v6717_v50 }
 0x4b9   :  { %1389 = vmatprep.subr.mxu0 %v6723_v1  ;;  %4714 = vmatprep.subr.mxu1 %v8044_v46 }
 0x4ba   :  { %1390 = vmatpush1.msra.mxu0 %v6730_v62  ;;  %4715 = vmatpush3.msra.mxu1 %v6157_v33  ;;  %v6751_v33 = vld [vmem:[%s8006_s13 + $0xb0] sm:$0xff] }
 0x4bb   :  { %1391 = vmatprep.subr.mxu0 %v6737_v42  ;;  %4716 = vmatprep.subr.mxu1 %v8044_v46 }
 0x4bc   :  { %1392 = vmatpush1.msra.mxu0 %v6744_v43  ;;  %4717 = vmatpush3.msra.mxu1 %v6164_v34  ;;  %v6765_v34 = vld [vmem:[%s8006_s13 + $0x98] sm:$0xff] }
 0x4bd   :  { %1393 = vmatprep.subr.mxu0 %v6751_v33  ;;  %4718 = vmatprep.subr.mxu1 %v8044_v46 }
 0x4be   :  { %1394 = vmatpush1.msra.mxu0 %v6758_v6  ;;  %4719 = vmatpush3.msra.mxu1 %v6173_v35  ;;  %v6779_v35 = vld [vmem:[%s8006_s13 + $0x80] sm:$0xff] }
 0x4bf   :  { %1395 = vmatprep.subr.mxu0 %v6765_v34  ;;  %4720 = vmatprep.subr.mxu1 %v8044_v46 }
 0x4c0   :  { %1396 = vmatpush1.msra.mxu0 %v6772_v55  ;;  %4721 = vmatpush3.msra.mxu1 %v6182_v36  ;;  %v6793_v36 = vld [vmem:[%s8006_s13 + $0x68] sm:$0xff] }
 0x4c1   :  { %1397 = vmatprep.subr.mxu0 %v6779_v35  ;;  %4722 = vmatprep.subr.mxu1 %v8044_v46 }
 0x4c2   :  { %1398 = vmatpush1.msra.mxu0 %v6786_v58  ;;  %4723 = vmatpush3.msra.mxu1 %v6191_v37  ;;  %v6807_v37 = vld [vmem:[%s8006_s13 + $0x50] sm:$0xff] }
 0x4c3   :  { %1399 = vmatprep.subr.mxu0 %v6793_v36  ;;  %4724 = vmatprep.subr.mxu1 %v8044_v46 }
 0x4c4   :  { %1400 = vmatpush1.msra.mxu0 %v6800_v60  ;;  %4725 = vmatpush3.msra.mxu1 %v6200_v38  ;;  %v6821_v38 = vld [vmem:[%s8006_s13 + $0x38] sm:$0xff] }
 0x4c5   :  { %1401 = vmatprep.subr.mxu0 %v6807_v37  ;;  %4726 = vmatprep.subr.mxu1 %v8044_v46 }
 0x4c6   :  { %1402 = vmatpush1.msra.mxu0 %v6814_v61  ;;  %4727 = vmatpush3.msra.mxu1 %v6209_v39  ;;  %v6835_v39 = vld [vmem:[%s8006_s13 + $0x20] sm:$0xff] }
 0x4c7   :  { %1403 = vmatprep.subr.mxu0 %v6821_v38  ;;  %4728 = vmatprep.subr.mxu1 %v8044_v46 }
 0x4c8   :  { %1404 = vmatpush1.msra.mxu0 %v6828_v0  ;;  %4729 = vmatpush3.msra.mxu1 %v8046_v27  ;;  %v6849_v27 = vld [vmem:[%s8006_s13 + $0x8] sm:$0xff] }
 0x4c9   :  { %1405 = vmatprep.subr.mxu0 %v6835_v39  ;;  %4730 = vmatprep.subr.mxu1 %v8044_v46  ;;  %8073 = vst [vmem:[#allocation28_spill] sm:$0xff] %v6849_v27 }
 0x4ca   :  { %1406 = vmatpush1.msra.mxu0 %v6842_v2  ;;  %4731 = vmatpush3.msra.mxu1 %v8059_v48 }
 0x4cb   :  { %1407 = vmatprep.subr.mxu0 %v6849_v27  ;;  %4732 = vmatprep.subr.mxu1 %v8044_v46 }
 0x4cc   :  { %1408 = vmatpush1.msra.mxu0 %v6856_v3  ;;  %1441 = vmatprep.mubr.f32.mxu0 %v8044_v46 }
 0x4cd   :  { %4733 = vmatpush3.msra.mxu1 %v8062_v53  ;;  %4734 = vmatprep.mubr.msk.f32.mxu1 %vm5519_vm0, %v8044_v46  ;;  %v8076_v53 = vld [vmem:[#allocation41_spill] sm:$0xff] }
 0x4ce   :  { %1539 = vmatprep.subr.mxu0 %v6623_v54  ;;  %4737 = vmatprep.subr.mxu1 %v8044_v46 }
 0x56d   :  { %v1281_v48 = vpop.f32.mrf.mxu0  ;;  %v1352_v4 = vpop.f32.mrf.mxu1 }
 0x56e   :  { %v1282_v7 = vadd.f32 %v1281_v48, %v8068_v59  ;;  %v1353_v30 = vadd.f32 %v1352_v4, %v6367_v57  ;;  %v6913_v4 = vld [vmem:[%s8006_s13 + $0xd0] sm:$0xff] }
 0x56f   :  { %v1283_v8 = vpop.f32.mrf.mxu0  ;;  %v4701_v9 = vpop.f32.mrf.mxu1 }
 0x570   :  { %v1356_v13 = vadd.f32 %v1282_v7, %v8075_v10  ;;  %v1284_v15 = vadd.f32 %v1283_v8, %v6351_v24 }
 0x572   :  { %v3991_v14 = vmul.f32 -1.442695, %v1356_v13  ;;  %v1357_v16 = vadd.f32 %v1284_v15, %v8076_v53  ;;  %v6931_v15 = vld [vmem:[%s8006_s13 + $0xa0] sm:$0xff]  ;;  %v6940_v53 = vld [vmem:[%s8006_s13 + $0x88] sm:$0xff] }
 0x574   :  { %5109 = vpow2.f32 %v3991_v14  ;;  %v3992_v18 = vmul.f32 -1.442695, %v1357_v16  ;;  %v6922_v14 = vld [vmem:[%s8006_s13 + $0xb8] sm:$0xff]  ;;  %v6949_v16 = vld [vmem:[%s8006_s13 + $0x70] sm:$0xff] }
 0x576   :  { %5111 = vpow2.f32 %v3992_v18  ;;  %v6958_v18 = vld [vmem:[%s8006_s13 + $0x58] sm:$0xff] }
 0x581   :  { %v5110_v19 = vpop.eup %5109 }
 0x582   :  { %v1364_v20 = vadd.f32 1.0, %v5110_v19  ;;  %v6967_v19 = vld [vmem:[%s8006_s13 + $0x40] sm:$0xff] }
 0x583   :  { %v5112_v28 = vpop.eup %5111 }
 0x584   :  { %5113 = vrcp.f32 %v1364_v20  ;;  %v1365_v29 = vadd.f32 1.0, %v5112_v28  ;;  %v6976_v20 = vld [vmem:[%s8006_s13 + $0x28] sm:$0xff]  ;;  %v6986_v28 = vld [vmem:[%s8006_s13 + $0x10] sm:$0xff] }
 0x585   :  { %8078 = vst [vmem:[#allocation34_spill] sm:$0xff] %v6976_v20  ;;  %8079 = vst [vmem:[#allocation35_spill] sm:$0xff] %v6986_v28 }
 0x586   :  { %5115 = vrcp.f32 %v1365_v29 }
 0x591   :  { %v5114_v31 = vpop.eup %5113 }
 0x592   :  { %v1370_v32 = vmul.f32 %v5114_v31, %v1353_v30 }
 0x593   :  { %v5116_v48 = vpop.eup %5115 }
 0x594   :  { %v1371_v41 = vadd.f32 %v1370_v32, %v8077_v21  ;;  %v1373_v7 = vsub.f32 1.0, %v5116_v48  ;;  %v1375_v10 = vmul.f32 %v5116_v48, %v6634_v47  ;;  %v6904_v47 = vld [vmem:[%s8006_s13 + $0xe8] sm:$0xff] }
 0x596   :  { %5117 = vtanh.f32 %v1371_v41  ;;  %v8080_v41 = vld [vmem:[#allocation43_spill] sm:$0xff] }
 0x5a3   :  { %v5118_v8 = vpop.eup %5117 }
 0x5a4   :  { %v1374_v9 = vmul.f32 %v5118_v8, %v1373_v7 }
 0x5a6   :  { %v6872_v13 = vadd.f32 %v1375_v10, %v1374_v9  ;;  %v8081_v9 = vld [vmem:[#allocation44_spill] sm:$0xff] }
 0x5a8   :  { %1442 = vmatmul.mubr.f32.vlgmr.msra.gmra.mxu0 %v6872_v13  ;;  %4735 = vmatmul.mubr.f32.vlgmr.msra.gmra.mxu1 %v6872_v13 }
 0x5a9   :  { %1540 = vmatpush1.msra.mxu0 %v6533_v17  ;;  %4738 = vmatpush3.msra.mxu1 %v6642_v49 }
 0x5aa   :  { %1541 = vmatprep.subr.mxu0 %v6540_v5  ;;  %4739 = vmatprep.subr.mxu1 %v8044_v46 }
 0x5ab   :  { %1542 = vmatpush1.msra.mxu0 %v6547_v44  ;;  %4740 = vmatpush3.msra.mxu1 %v6651_v52 }
 0x5ac   :  { %1543 = vmatprep.subr.mxu0 %v6554_v22  ;;  %4741 = vmatprep.subr.mxu1 %v8044_v46 }
 0x5ad   :  { %1544 = vmatpush1.msra.mxu0 %v6561_v25  ;;  %4742 = vmatpush3.msra.mxu1 %v6660_v11 }
 0x5ae   :  { %1545 = vmatprep.subr.mxu0 %v6666_v12  ;;  %4743 = vmatprep.subr.mxu1 %v8044_v46 }
 0x5af   :  { %1546 = vmatpush1.msra.mxu0 %v6673_v51  ;;  %4744 = vmatpush3.msra.mxu1 %v6679_v26 }
 0x5b0   :  { %1547 = vmatprep.subr.mxu0 %v6685_v40  ;;  %4745 = vmatprep.subr.mxu1 %v8044_v46 }
 0x5b1   :  { %1548 = vmatpush1.msra.mxu0 %v6692_v56  ;;  %4746 = vmatpush3.msra.mxu1 %v6698_v63 }
 0x5b2   :  { %1549 = vmatprep.subr.mxu0 %v6704_v45  ;;  %4747 = vmatprep.subr.mxu1 %v8044_v46 }
 0x5b3   :  { %1550 = vmatpush1.msra.mxu0 %v6711_v23  ;;  %4748 = vmatpush3.msra.mxu1 %v6717_v50 }
 0x5b4   :  { %1551 = vmatprep.subr.mxu0 %v6723_v1  ;;  %4749 = vmatprep.subr.mxu1 %v8044_v46 }
 0x5b5   :  { %1552 = vmatpush1.msra.mxu0 %v6730_v62  ;;  %4750 = vmatpush3.msra.mxu1 %v6904_v47 }
 0x5b6   :  { %1553 = vmatprep.subr.mxu0 %v6737_v42  ;;  %4751 = vmatprep.subr.mxu1 %v8044_v46 }
 0x5b7   :  { %1554 = vmatpush1.msra.mxu0 %v6744_v43  ;;  %4752 = vmatpush3.msra.mxu1 %v6913_v4 }
 0x5b8   :  { %1555 = vmatprep.subr.mxu0 %v6751_v33  ;;  %4753 = vmatprep.subr.mxu1 %v8044_v46 }
 0x5b9   :  { %1556 = vmatpush1.msra.mxu0 %v6758_v6  ;;  %4754 = vmatpush3.msra.mxu1 %v6922_v14 }
 0x5ba   :  { %1557 = vmatprep.subr.mxu0 %v6765_v34  ;;  %4755 = vmatprep.subr.mxu1 %v8044_v46 }
 0x5bb   :  { %1558 = vmatpush1.msra.mxu0 %v6772_v55  ;;  %4756 = vmatpush3.msra.mxu1 %v6931_v15 }
 0x5bc   :  { %1559 = vmatprep.subr.mxu0 %v6779_v35  ;;  %4757 = vmatprep.subr.mxu1 %v8044_v46 }
 0x5bd   :  { %1560 = vmatpush1.msra.mxu0 %v6786_v58  ;;  %4758 = vmatpush3.msra.mxu1 %v6940_v53 }
 0x5be   :  { %1561 = vmatprep.subr.mxu0 %v6793_v36  ;;  %4759 = vmatprep.subr.mxu1 %v8044_v46 }
 0x5bf   :  { %1562 = vmatpush1.msra.mxu0 %v6800_v60  ;;  %4760 = vmatpush3.msra.mxu1 %v6949_v16 }
 0x5c0   :  { %1563 = vmatprep.subr.mxu0 %v6807_v37  ;;  %4761 = vmatprep.subr.mxu1 %v8044_v46 }
 0x5c1   :  { %1564 = vmatpush1.msra.mxu0 %v6814_v61  ;;  %4762 = vmatpush3.msra.mxu1 %v6958_v18 }
 0x5c2   :  { %1565 = vmatprep.subr.mxu0 %v6821_v38  ;;  %4763 = vmatprep.subr.mxu1 %v8044_v46 }
 0x5c3   :  { %1566 = vmatpush1.msra.mxu0 %v6828_v0  ;;  %4764 = vmatpush3.msra.mxu1 %v6967_v19 }
 0x5c4   :  { %1567 = vmatprep.subr.mxu0 %v6835_v39  ;;  %4765 = vmatprep.subr.mxu1 %v8044_v46 }
 0x5c5   :  { %1568 = vmatpush1.msra.mxu0 %v6842_v2  ;;  %4766 = vmatpush3.msra.mxu1 %v6976_v20 }
 0x5c6   :  { %1569 = vmatprep.subr.mxu0 %v6849_v27  ;;  %4767 = vmatprep.subr.mxu1 %v8044_v46 }
 0x5c7   :  { %1570 = vmatpush1.msra.mxu0 %v6856_v3  ;;  %1603 = vmatprep.mubr.f32.mxu0 %v8044_v46 }
 0x5c8   :  { %4768 = vmatpush3.msra.mxu1 %v6986_v28  ;;  %4769 = vmatprep.mubr.msk.f32.mxu1 %vm5519_vm0, %v8044_v46 }
 0x5c9   :  { %1701 = vmatprep.subr.mxu0 %v6623_v54  ;;  %4772 = vmatprep.subr.mxu1 %v8044_v46 }
 0x668   :  { %v1443_v29 = vpop.f32.mrf.mxu0  ;;  %v1514_v30 = vpop.f32.mrf.mxu1 }
 0x669   :  { %v1444_v31 = vadd.f32 %v1443_v29, %v8068_v59  ;;  %v1515_v2 = vadd.f32 %v1514_v30, %v6367_v57  ;;  %v2133_v30 = vld [vmem:[#allocation5 + $0x40] sm:$0xff] }
 0x66a   :  { %v1445_v32 = vpop.f32.mrf.mxu0  ;;  %v4736_v21 = vpop.f32.mrf.mxu1 }
 0x66b   :  { %v1518_v48 = vadd.f32 %v1444_v31, %v8080_v41  ;;  %v1446_v8 = vadd.f32 %v1445_v32, %v6351_v24  ;;  %v8082_v21 = vld [vmem:[#allocation53_spill] sm:$0xff] }
 0x66d   :  { %v3993_v7 = vmul.f32 -1.442695, %v1518_v48  ;;  %v1519_v10 = vadd.f32 %v1446_v8, %v8081_v9  ;;  %v2046_v9 = vld [vmem:[#allocation3 + $0x38] sm:$0xff] }
 0x66f   :  { %5119 = vpow2.f32 %v3993_v7  ;;  %v3994_v28 = vmul.f32 -1.442695, %v1519_v10  ;;  %v2132_v10 = vld [vmem:[#allocation5 + $0x38] sm:$0xff] }
 0x671   :  { %5121 = vpow2.f32 %v3994_v28 }
 0x67c   :  { %v5120_v3 = vpop.eup %5119 }
 0x67d   :  { %v1526_v54 = vadd.f32 1.0, %v5120_v3  ;;  %v2052_v3 = vld [vmem:[#allocation3 + $0x68] sm:$0xff] }
 0x67e   :  { %v5122_v27 = vpop.eup %5121 }
 0x67f   :  { %5123 = vrcp.f32 %v1526_v54  ;;  %v1527_v20 = vadd.f32 1.0, %v5122_v27  ;;  %v2139_v27 = vld [vmem:[#allocation5 + $0x70] sm:$0xff] }
 0x680   :  { %v2045_v54 = vld [vmem:[#allocation3 + $0x30] sm:$0xff] }
 0x681   :  { %5125 = vrcp.f32 %v1527_v20  ;;  %v2047_v20 = vld [vmem:[#allocation3 + $0x40] sm:$0xff] }
 0x68c   :  { %v5124_v29 = vpop.eup %5123 }
 0x68d   :  { %v1532_v59 = vmul.f32 %v5124_v29, %v1515_v2  ;;  %v2053_v2 = vld [vmem:[#allocation3 + $0x70] sm:$0xff] }
 0x68e   :  { %v5126_v41 = vpop.eup %5125  ;;  %v2131_v29 = vld [vmem:[#allocation5 + $0x30] sm:$0xff] }
 0x68f   :  { %v1533_v31 = vadd.f32 %v1532_v59, %v8082_v21  ;;  %v1535_v32 = vsub.f32 1.0, %v5126_v41  ;;  %v1537_v8 = vmul.f32 %v5126_v41, %v6872_v13  ;;  %v2138_v13 = vld [vmem:[#allocation5 + $0x68] sm:$0xff]  ;;  %v2043_v41 = vld [vmem:[#allocation3 + $0x20] sm:$0xff] }
 0x690   :  { %v2044_v21 = vld [vmem:[#allocation3 + $0x28] sm:$0xff] }
 0x691   :  { %5127 = vtanh.f32 %v1533_v31  ;;  %v2130_v31 = vld [vmem:[#allocation5 + $0x28] sm:$0xff] }
 0x69e   :  { %v5128_v48 = vpop.eup %5127 }
 0x69f   :  { %v1536_v7 = vmul.f32 %v5128_v48, %v1535_v32  ;;  %v2129_v32 = vld [vmem:[#allocation5 + $0x20] sm:$0xff]  ;;  %v2042_v48 = vld [vmem:[#allocation3 + $0x18] sm:$0xff] }
 0x6a1   :  { %v7000_v28 = vadd.f32 %v1537_v8, %v1536_v7  ;;  %v2128_v7 = vld [vmem:[#allocation5 + $0x18] sm:$0xff]  ;;  %v2041_v8 = vld [vmem:[#allocation3 + $0x10] sm:$0xff] }
 0x6a3   :  { %1604 = vmatmul.mubr.f32.vlgmr.msra.gmra.mxu0 %v7000_v28  ;;  %4770 = vmatmul.mubr.f32.vlgmr.msra.gmra.mxu1 %v7000_v28 }
 0x6a4   :  { %1702 = vmatpush1.msra.mxu0 %v6533_v17  ;;  %4773 = vmatpush3.msra.mxu1 %v6642_v49  ;;  %v8083_v17 = vld [vmem:[#allocation23_spill] sm:$0xff] }
 0x6a5   :  { %1703 = vmatprep.subr.mxu0 %v6540_v5  ;;  %4774 = vmatprep.subr.mxu1 %v8044_v46  ;;  %v8084_v5 = vld [vmem:[#allocation34_spill] sm:$0xff] }
 0x6a6   :  { %1704 = vmatpush1.msra.mxu0 %v6547_v44  ;;  %4775 = vmatpush3.msra.mxu1 %v6651_v52  ;;  %v8085_v44 = vld [vmem:[#allocation28_spill] sm:$0xff]  ;;  %v8088_v52 = vld [vmem:[#allocation49_spill] sm:$0xff] }
 0x6a7   :  { %1705 = vmatprep.subr.mxu0 %v6554_v22  ;;  %4776 = vmatprep.subr.mxu1 %v8044_v46  ;;  %v8086_v22 = vld [vmem:[#allocation24_spill] sm:$0xff] }
 0x6a8   :  { %1706 = vmatpush1.msra.mxu0 %v6561_v25  ;;  %4777 = vmatpush3.msra.mxu1 %v6660_v11  ;;  %v8087_v25 = vld [vmem:[#allocation35_spill] sm:$0xff] }
 0x6a9   :  { %1707 = vmatprep.subr.mxu0 %v6666_v12  ;;  %4778 = vmatprep.subr.mxu1 %v8044_v46 }
 0x6aa   :  { %1708 = vmatpush1.msra.mxu0 %v6673_v51  ;;  %4779 = vmatpush3.msra.mxu1 %v6679_v26  ;;  %v8089_v26 = vld [vmem:[#allocation45_spill] sm:$0xff] }
 0x6ab   :  { %1709 = vmatprep.subr.mxu0 %v6685_v40  ;;  %4780 = vmatprep.subr.mxu1 %v8044_v46 }
 0x6ac   :  { %1710 = vmatpush1.msra.mxu0 %v6692_v56  ;;  %4781 = vmatpush3.msra.mxu1 %v6698_v63 }
 0x6ad   :  { %1711 = vmatprep.subr.mxu0 %v6704_v45  ;;  %4782 = vmatprep.subr.mxu1 %v8044_v46  ;;  %v8090_v45 = vld [vmem:[#allocation46_spill] sm:$0xff] }
 0x6ae   :  { %1712 = vmatpush1.msra.mxu0 %v6711_v23  ;;  %4783 = vmatpush3.msra.mxu1 %v6717_v50 }
 0x6af   :  { %1713 = vmatprep.subr.mxu0 %v6723_v1  ;;  %4784 = vmatprep.subr.mxu1 %v8044_v46 }
 0x6b0   :  { %1714 = vmatpush1.msra.mxu0 %v6730_v62  ;;  %4785 = vmatpush3.msra.mxu1 %v6904_v47  ;;  %v2051_v47 = vld [vmem:[#allocation3 + $0x60] sm:$0xff] }
 0x6b1   :  { %1715 = vmatprep.subr.mxu0 %v6737_v42  ;;  %4786 = vmatprep.subr.mxu1 %v8044_v46 }
 0x6b2   :  { %1716 = vmatpush1.msra.mxu0 %v6744_v43  ;;  %4787 = vmatpush3.msra.mxu1 %v6913_v4  ;;  %v2137_v4 = vld [vmem:[#allocation5 + $0x60] sm:$0xff] }
 0x6b3   :  { %1717 = vmatprep.subr.mxu0 %v6751_v33  ;;  %4788 = vmatprep.subr.mxu1 %v8044_v46 }
 0x6b4   :  { %1718 = vmatpush1.msra.mxu0 %v6758_v6  ;;  %4789 = vmatpush3.msra.mxu1 %v6922_v14  ;;  %v2050_v14 = vld [vmem:[#allocation3 + $0x58] sm:$0xff] }
 0x6b5   :  { %1719 = vmatprep.subr.mxu0 %v6765_v34  ;;  %4790 = vmatprep.subr.mxu1 %v8044_v46 }
 0x6b6   :  { %1720 = vmatpush1.msra.mxu0 %v6772_v55  ;;  %4791 = vmatpush3.msra.mxu1 %v6931_v15  ;;  %v8091_v55 = vld [vmem:[#allocation56_spill] sm:$0xff] }
 0x6b7   :  { %1721 = vmatprep.subr.mxu0 %v6779_v35  ;;  %4792 = vmatprep.subr.mxu1 %v8044_v46  ;;  %v2136_v15 = vld [vmem:[#allocation5 + $0x58] sm:$0xff] }
 0x6b8   :  { %1722 = vmatpush1.msra.mxu0 %v6786_v58  ;;  %4793 = vmatpush3.msra.mxu1 %v6940_v53  ;;  %v2049_v53 = vld [vmem:[#allocation3 + $0x50] sm:$0xff] }
 0x6b9   :  { %1723 = vmatprep.subr.mxu0 %v6793_v36  ;;  %4794 = vmatprep.subr.mxu1 %v8044_v46 }
 0x6ba   :  { %1724 = vmatpush1.msra.mxu0 %v6800_v60  ;;  %4795 = vmatpush3.msra.mxu1 %v6949_v16  ;;  %v2135_v16 = vld [vmem:[#allocation5 + $0x50] sm:$0xff] }
 0x6bb   :  { %1725 = vmatprep.subr.mxu0 %v6807_v37  ;;  %4796 = vmatprep.subr.mxu1 %v8044_v46 }
 0x6bc   :  { %1726 = vmatpush1.msra.mxu0 %v6814_v61  ;;  %4797 = vmatpush3.msra.mxu1 %v6958_v18  ;;  %v2048_v18 = vld [vmem:[#allocation3 + $0x48] sm:$0xff] }
 0x6bd   :  { %1727 = vmatprep.subr.mxu0 %v6821_v38  ;;  %4798 = vmatprep.subr.mxu1 %v8044_v46 }
 0x6be   :  { %1728 = vmatpush1.msra.mxu0 %v6828_v0  ;;  %4799 = vmatpush3.msra.mxu1 %v6967_v19  ;;  %v2054_v0 = vld [vmem:[#allocation3 + $0x78] sm:$0xff]  ;;  %v2134_v19 = vld [vmem:[#allocation5 + $0x48] sm:$0xff] }
 0x6bf   :  { %1729 = vmatprep.subr.mxu0 %v6835_v39  ;;  %4800 = vmatprep.subr.mxu1 %v8044_v46  ;;  %v2140_v39 = vld [vmem:[#allocation5 + $0x78] sm:$0xff] }
 0x6c0   :  { %1730 = vmatpush1.msra.mxu0 %v8083_v17  ;;  %4801 = vmatpush3.msra.mxu1 %v8084_v5  ;;  %v2040_v17 = vld [vmem:[#allocation3 + $0x8] sm:$0xff] }
 0x6c1   :  { %1731 = vmatprep.subr.mxu0 %v8085_v44  ;;  %4802 = vmatprep.subr.mxu1 %v8044_v46  ;;  %v2126_v5 = vld [vmem:[#allocation5 + $0x8] sm:$0xff]  ;;  %v2039_v44 = vld [vmem:[#allocation3] sm:$0xff] }
 0x6c2   :  { %1732 = vmatpush1.msra.mxu0 %v8086_v22  ;;  %1765 = vmatprep.mubr.f32.mxu0 %v8044_v46  ;;  %v2125_v22 = vld [vmem:[#allocation5] sm:$0xff] }
 0x6c3   :  { %4803 = vmatpush3.msra.mxu1 %v8087_v25  ;;  %4804 = vmatprep.mubr.msk.f32.mxu1 %vm5519_vm0, %v8044_v46  ;;  %v2242_v25 = vld [vmem:[%s8092_s14 + $0xf8] sm:$0xff] }
 0x6c4   :  { %4807 = vmatprep.subr.mxu0 %v8044_v46  ;;  %4842 = vmatprep.subr.mxu1 %v8044_v46 }
 0x763   :  { %v1605_v59 = vpop.f32.mrf.mxu0  ;;  %v1676_v49 = vpop.f32.mrf.mxu1 }
 0x764   :  { %v1606_v11 = vadd.f32 %v1605_v59, %v8088_v52  ;;  %v1677_v33 = vadd.f32 %v1676_v49, %v6367_v57  ;;  %v2492_v59 = vld [vmem:[%s8093_s12 + $0xf8] sm:$0xff] }
 0x765   :  { %v1607_v12 = vpop.f32.mrf.mxu0  ;;  %v4771_v51 = vpop.f32.mrf.mxu1 }
 0x766   :  { %v1680_v40 = vadd.f32 %v1606_v11, %v8089_v26  ;;  %v1608_v63 = vadd.f32 %v1607_v12, %v6351_v24 }
 0x768   :  { %v3995_v56 = vmul.f32 -1.442695, %v1680_v40  ;;  %v1681_v23 = vadd.f32 %v1608_v63, %v8090_v45  ;;  %v8094_v40 = vld [vmem:[#allocation48_spill] sm:$0xff] }
 0x76a   :  { %5129 = vpow2.f32 %v3995_v56  ;;  %v3996_v50 = vmul.f32 -1.442695, %v1681_v23  ;;  %v8095_v23 = vld [vmem:[#allocation50_spill] sm:$0xff] }
 0x76c   :  { %5131 = vpow2.f32 %v3996_v50 }
 0x777   :  { %v5130_v1 = vpop.eup %5129 }
 0x778   :  { %v1688_v62 = vadd.f32 1.0, %v5130_v1 }
 0x779   :  { %v5132_v42 = vpop.eup %5131 }
 0x77a   :  { %5133 = vrcp.f32 %v1688_v62  ;;  %v1689_v43 = vadd.f32 1.0, %v5132_v42 }
 0x77c   :  { %5135 = vrcp.f32 %v1689_v43 }
 0x787   :  { %v5134_v6 = vpop.eup %5133 }
 0x788   :  { %v1694_v34 = vmul.f32 %v5134_v6, %v1677_v33 }
 0x789   :  { %v5136_v58 = vpop.eup %5135 }
 0x78a   :  { %v1695_v35 = vadd.f32 %v1694_v34, %v8091_v55  ;;  %v1697_v36 = vsub.f32 1.0, %v5136_v58  ;;  %v1699_v61 = vmul.f32 %v5136_v58, %v7000_v28  ;;  %v2127_v28 = vld [vmem:[#allocation5 + $0x10] sm:$0xff] }
 0x78b   :  { %v7142_v55 = vld [vmem:[%s8096_s4 + $0x18] sm:$0xff] }
 0x78c   :  { %5137 = vtanh.f32 %v1695_v35 }
 0x799   :  { %v5138_v60 = vpop.eup %5137 }
 0x79a   :  { %v1698_v37 = vmul.f32 %v5138_v60, %v1697_v36 }
 0x79c   :  { %v7078_v38 = vadd.f32 %v1699_v61, %v1698_v37  ;;  %v1882_v37 = vmul.f32 %v7142_v55, %v7142_v55  ;;  %v8097_v61 = vld [vmem:[#allocation55_spill] sm:$0xff] }
 0x79e   :  { %1766 = vmatmul.mubr.f32.vlgmr.msra.gmra.mxu0 %v7078_v38  ;;  %4805 = vmatmul.mubr.f32.vlgmr.msra.gmra.mxu1 %v7078_v38 }
 0x79f   :  { %4839 = vmatprep.mubr.msk.f32.mxu0 %vm5519_vm0, %v8044_v46  ;;  %4874 = vmatprep.mubr.msk.f32.mxu1 %vm5519_vm0, %v8044_v46 }
 0x7a0   :  { %4808 = vmatpush3.msra.mxu0 %v2054_v0  ;;  %4843 = vmatpush3.msra.mxu1 %v2140_v39  ;;  %v7157_v39 = vld [vmem:[%s8096_s4 + $0x28] sm:$0xff] }
 0x7a1   :  { %4809 = vmatprep.subr.mxu0 %v8044_v46  ;;  %4844 = vmatprep.subr.mxu1 %v8044_v46 }
 0x7a2   :  { %4810 = vmatpush3.msra.mxu0 %v2053_v2  ;;  %4845 = vmatpush3.msra.mxu1 %v2139_v27 }
 0x7a3   :  { %4811 = vmatprep.subr.mxu0 %v8044_v46  ;;  %4846 = vmatprep.subr.mxu1 %v8044_v46 }
 0x7a4   :  { %4812 = vmatpush3.msra.mxu0 %v2052_v3  ;;  %4847 = vmatpush3.msra.mxu1 %v2138_v13  ;;  %v1913_v3 = vrot.slane %v1882_v37, 4 }
 0x7a5   :  { %4813 = vmatprep.subr.mxu0 %v8044_v46  ;;  %4848 = vmatprep.subr.mxu1 %v8044_v46 }
 0x7a6   :  { %4814 = vmatpush3.msra.mxu0 %v2051_v47  ;;  %4849 = vmatpush3.msra.mxu1 %v2137_v4  ;;  %v1884_v47 = vmul.f32 %v7157_v39, %v7157_v39  ;;  %v7166_v4 = vld [vmem:[%s8096_s4 + $0x20] sm:$0xff] }
 0x7a7   :  { %4815 = vmatprep.subr.mxu0 %v8044_v46  ;;  %4850 = vmatprep.subr.mxu1 %v8044_v46 }
 0x7a8   :  { %4816 = vmatpush3.msra.mxu0 %v2050_v14  ;;  %4851 = vmatpush3.msra.mxu1 %v2136_v15  ;;  %v7171_v14 = vld [vmem:[%s8096_s4 + $0x38] sm:$0xff] }
 0x7a9   :  { %4817 = vmatprep.subr.mxu0 %v8044_v46  ;;  %4852 = vmatprep.subr.mxu1 %v8044_v46 }
 0x7aa   :  { %4818 = vmatpush3.msra.mxu0 %v2049_v53  ;;  %4853 = vmatpush3.msra.mxu1 %v2135_v16  ;;  %v1914_v16 = vadd.f32 %v1913_v3, %v1882_v37  ;;  %v2475_v37 = vld [vmem:[%s8093_s12 + $0x70] sm:$0xff]  ;;  %v2240_v3 = vld [vmem:[%s8092_s14 + $0xe8] sm:$0xff] }
 0x7ab   :  { %4819 = vmatprep.subr.mxu0 %v8044_v46  ;;  %4854 = vmatprep.subr.mxu1 %v8044_v46 }
 0x7ac   :  { %4820 = vmatpush3.msra.mxu0 %v2048_v18  ;;  %4855 = vmatpush3.msra.mxu1 %v2134_v19  ;;  %v1925_v19 = vrot.slane %v1884_v47, 4 }
 0x7ad   :  { %4821 = vmatprep.subr.mxu0 %v8044_v46  ;;  %4856 = vmatprep.subr.mxu1 %v8044_v46 }
 0x7ae   :  { %4822 = vmatpush3.msra.mxu0 %v2047_v20  ;;  %4857 = vmatpush3.msra.mxu1 %v2133_v30  ;;  %v1883_v20 = vmul.f32 %v7166_v4, %v7166_v4  ;;  %v1886_v30 = vmul.f32 %v7171_v14, %v7171_v14 }
 0x7af   :  { %4823 = vmatprep.subr.mxu0 %v8044_v46  ;;  %4858 = vmatprep.subr.mxu1 %v8044_v46 }
 0x7b0   :  { %4824 = vmatpush3.msra.mxu0 %v2046_v9  ;;  %4859 = vmatpush3.msra.mxu1 %v2132_v10  ;;  %v7180_v9 = vld [vmem:[%s8096_s4 + $0x30] sm:$0xff] }
 0x7b1   :  { %4825 = vmatprep.subr.mxu0 %v8044_v46  ;;  %4860 = vmatprep.subr.mxu1 %v8044_v46 }
 0x7b2   :  { %4826 = vmatpush3.msra.mxu0 %v2045_v54  ;;  %4861 = vmatpush3.msra.mxu1 %v2131_v29 }
 0x7b3   :  { %4827 = vmatprep.subr.mxu0 %v8044_v46  ;;  %4862 = vmatprep.subr.mxu1 %v8044_v46 }
 0x7b4   :  { %4828 = vmatpush3.msra.mxu0 %v2044_v21  ;;  %4863 = vmatpush3.msra.mxu1 %v2130_v31  ;;  %v1915_v21 = vrot.slane %v1914_v16, 2 }
 0x7b5   :  { %4829 = vmatprep.subr.mxu0 %v8044_v46  ;;  %4864 = vmatprep.subr.mxu1 %v8044_v46 }
 0x7b6   :  { %4830 = vmatpush3.msra.mxu0 %v2043_v41  ;;  %4865 = vmatpush3.msra.mxu1 %v2129_v32  ;;  %v1926_v41 = vadd.f32 %v1925_v19, %v1884_v47  ;;  %v1919_v32 = vrot.slane %v1883_v20, 4 }
 0x7b7   :  { %4831 = vmatprep.subr.mxu0 %v8044_v46  ;;  %4866 = vmatprep.subr.mxu1 %v8044_v46 }
 0x7b8   :  { %4832 = vmatpush3.msra.mxu0 %v2042_v48  ;;  %4867 = vmatpush3.msra.mxu1 %v2128_v7  ;;  %v7185_v48 = vld [vmem:[%s8096_s4 + $0x48] sm:$0xff]  ;;  %v1937_v7 = vrot.slane %v1886_v30, 4 }
 0x7b9   :  { %4833 = vmatprep.subr.mxu0 %v8044_v46  ;;  %4868 = vmatprep.subr.mxu1 %v8044_v46 }
 0x7ba   :  { %4834 = vmatpush3.msra.mxu0 %v2041_v8  ;;  %4869 = vmatpush3.msra.mxu1 %v2127_v28  ;;  %v1885_v8 = vmul.f32 %v7180_v9, %v7180_v9 }
 0x7bb   :  { %4835 = vmatprep.subr.mxu0 %v8044_v46  ;;  %4870 = vmatprep.subr.mxu1 %v8044_v46 }
 0x7bc   :  { %4836 = vmatpush3.msra.mxu0 %v2040_v17  ;;  %4871 = vmatpush3.msra.mxu1 %v2126_v5 }
 0x7bd   :  { %4837 = vmatprep.subr.mxu0 %v8044_v46  ;;  %4872 = vmatprep.subr.mxu1 %v8044_v46 }
 0x7be   :  { %4838 = vmatpush3.msra.mxu0 %v2039_v44  ;;  %4873 = vmatpush3.msra.mxu1 %v2125_v22  ;;  %v1888_v44 = vmul.f32 %v7185_v48, %v7185_v48  ;;  %v7194_v22 = vld [vmem:[%s8096_s4 + $0x40] sm:$0xff] }
 0x7bf   :  { %4216 = vmatprep.subr.mxu0 %v2242_v25  ;;  %4272 = vmatprep.subr.mxu1 %v2492_v59  ;;  %v1916_v59 = vadd.f32 %v1915_v21, %v1914_v16  ;;  %v2474_v16 = vld [vmem:[%s8093_s12 + $0x68] sm:$0xff] }
 0x85e   :  { %v1767_v49 = vpop.f32.mrf.mxu0  ;;  %v1838_v11 = vpop.f32.mrf.mxu1 }
 0x85f   :  { %v1768_v12 = vadd.f32 %v1767_v49, %v8088_v52  ;;  %v7129_v52 = vld [vmem:[%s8096_s4 + $0x8] sm:$0xff]  ;;  %v1839_v34 = vadd.f32 %v1838_v11, %v6367_v57  ;;  %v7152_v57 = vld [vmem:[%s8096_s4 + $0x10] sm:$0xff]  ;;  %v1927_v11 = vrot.slane %v1926_v41, 2 }
 0x860   :  { %v1769_v51 = vpop.f32.mrf.mxu0  ;;  %v4806_v26 = vpop.f32.mrf.mxu1  ;;  %v1880_v6 = vmul.f32 %v7129_v52, %v7129_v52  ;;  %v1881_v13 = vmul.f32 %v7152_v57, %v7152_v57 }
 0x861   :  { %v1842_v56 = vadd.f32 %v1768_v12, %v8094_v40  ;;  %v1770_v45 = vadd.f32 %v1769_v51, %v6351_v24  ;;  %v7136_v24 = vld [vmem:[%s8096_s4] sm:$0xff]  ;;  %v1920_v12 = vadd.f32 %v1919_v32, %v1883_v20  ;;  %v7199_v51 = vld [vmem:[%s8096_s4 + $0x58] sm:$0xff] }
 0x862   :  { %v1901_v36 = vrot.slane %v1880_v6, 4  ;;  %v1879_v60 = vmul.f32 %v7136_v24, %v7136_v24  ;;  %v1907_v18 = vrot.slane %v1881_v13, 4  ;;  %v7288_v32 = vld [vmem:[%s8096_s4 + $0x78] sm:$0xff] }
 0x863   :  { %v3997_v63 = vmul.f32 -1.442695, %v1842_v56  ;;  %v1843_v50 = vadd.f32 %v1770_v45, %v8095_v23  ;;  %v1938_v56 = vadd.f32 %v1937_v7, %v1886_v30  ;;  %v1887_v45 = vmul.f32 %v7194_v22, %v7194_v22  ;;  %v7271_v30 = vld [vmem:[%s8096_s4 + $0x60] sm:$0xff] }
 0x864   :  { %v1902_v2 = vadd.f32 %v1901_v36, %v1880_v6  ;;  %v1895_v27 = vrot.slane %v1879_v60, 4  ;;  %v1908_v31 = vadd.f32 %v1907_v18, %v1881_v13  ;;  %v7232_v36 = vld [vmem:[%s8096_s4 + $0x68] sm:$0xff]  ;;  %v2223_v7 = vld [vmem:[%s8092_s14 + $0x60] sm:$0xff] }
 0x865   :  { %5139 = vpow2.f32 %v3997_v63  ;;  %v3998_v1 = vmul.f32 -1.442695, %v1843_v50  ;;  %v1931_v63 = vrot.slane %v1885_v8, 4  ;;  %v2226_v50 = vld [vmem:[%s8092_s14 + $0x78] sm:$0xff]  ;;  %v2490_v13 = vld [vmem:[%s8093_s12 + $0xe8] sm:$0xff]  ;;  %v1943_v47 = vrot.slane %v1887_v45, 4 }
 0x866   :  { %v1903_v15 = vrot.slane %v1902_v2, 2  ;;  %v1896_v53 = vadd.f32 %v1895_v27, %v1879_v60  ;;  %v1909_v49 = vrot.slane %v1908_v31, 2  ;;  %v2225_v60 = vld [vmem:[%s8092_s14 + $0x70] sm:$0xff]  ;;  %v7266_v20 = vmul.f32 %v7232_v36, %v7232_v36 }
 0x867   :  { %5141 = vpow2.f32 %v3998_v1  ;;  %v2476_v1 = vld [vmem:[%s8093_s12 + $0x78] sm:$0xff]  ;;  %v7244_v27 = vadd.f32 %v1931_v63, %v1885_v8  ;;  %v2473_v8 = vld [vmem:[%s8093_s12 + $0x60] sm:$0xff] }
 0x868   :  { %v1904_v10 = vadd.f32 %v1903_v15, %v1902_v2  ;;  %v1897_v54 = vrot.slane %v1896_v53, 2  ;;  %v1939_v2 = vrot.slane %v1938_v56, 2 }
 0x86a   :  { %v1905_v17 = vrot.slane %v1904_v10, 1  ;;  %v1898_v5 = vadd.f32 %v1897_v54, %v1896_v53  ;;  %v2224_v53 = vld [vmem:[%s8092_s14 + $0x68] sm:$0xff]  ;;  %v2489_v54 = vld [vmem:[%s8093_s12 + $0xe0] sm:$0xff] }
 0x86c   :  { %v7225_v6 = vadd.f32 %v1905_v17, %v1904_v10  ;;  %v2239_v10 = vld [vmem:[%s8092_s14 + $0xe0] sm:$0xff] }
 0x872   :  { %v5140_v62 = vpop.eup %5139 }
 0x873   :  { %v1850_v42 = vadd.f32 1.0, %v5140_v62  ;;  %v1949_v62 = vrot.slane %v1888_v44, 4 }
 0x874   :  { %v5142_v43 = vpop.eup %5141 }
 0x875   :  { %5143 = vrcp.f32 %v1850_v42  ;;  %v1851_v33 = vadd.f32 1.0, %v5142_v43  ;;  %v1890_v42 = vmul.f32 %v7199_v51, %v7199_v51  ;;  %v2241_v43 = vld [vmem:[%s8092_s14 + $0xf0] sm:$0xff]  ;;  %v7262_v18 = vadd.f32 %v1949_v62, %v1888_v44 }
 0x876   :  { %v1933_v44 = vrot.slane %v7244_v27, 2  ;;  %v2237_v62 = vld [vmem:[%s8092_s14 + $0xd0] sm:$0xff] }
 0x877   :  { %5145 = vrcp.f32 %v1851_v33  ;;  %v2491_v33 = vld [vmem:[%s8093_s12 + $0xf0] sm:$0xff]  ;;  %v1961_v19 = vrot.slane %v1890_v42, 4 }
 0x879   :  { %v7322_v63 = vadd.f32 %v1961_v19, %v1890_v42  ;;  %v2487_v42 = vld [vmem:[%s8093_s12 + $0xd0] sm:$0xff] }
 0x882   :  { %v5144_v35 = vpop.eup %5143 }
 0x883   :  { %v1856_v58 = vmul.f32 %v5144_v35, %v1839_v34  ;;  %v1899_v34 = vrot.slane %v1898_v5, 1  ;;  %v7227_v35 = vadd.f32 %v1909_v49, %v1908_v31  ;;  %v2488_v49 = vld [vmem:[%s8093_s12 + $0xd8] sm:$0xff] }
 0x884   :  { %v5146_v29 = vpop.eup %5145 }
 0x885   :  { %v1857_v0 = vadd.f32 %v1856_v58, %v8097_v61  ;;  %v1859_v28 = vsub.f32 1.0, %v5146_v29  ;;  %v1861_v40 = vmul.f32 %v5146_v29, %v7078_v38  ;;  %v7217_v38 = vld [vmem:[%s8096_s4 + $0x50] sm:$0xff]  ;;  %v1921_v58 = vrot.slane %v1920_v12, 2 }
 0x886   :  { %v1917_v61 = vrot.slane %v1916_v59, 1  ;;  %v7254_v15 = vmul.f32 %v7217_v38, %v7217_v38  ;;  %v1992_v29 = vmax.f32 %v7225_v6, 1e-24  ;;  %v7280_v21 = vadd.f32 %v1899_v34, %v1898_v5  ;;  %v2221_v34 = vld [vmem:[%s8092_s14 + $0x50] sm:$0xff] }
 0x887   :  { %5147 = vtanh.f32 %v1857_v0  ;;  %v7242_v0 = vadd.f32 %v1927_v11, %v1926_v41  ;;  %v1911_v31 = vrot.slane %v7227_v35, 1  ;;  %v7283_v41 = vadd.f32 %v1921_v58, %v1920_v12  ;;  %v2471_v58 = vld [vmem:[%s8093_s12 + $0x50] sm:$0xff] }
 0x888   :  { %v7299_v5 = vadd.f32 %v1939_v2, %v1938_v56  ;;  %v7308_v11 = vadd.f32 %v1943_v47, %v1887_v45  ;;  %v7313_v12 = vmul.f32 %v7271_v30, %v7271_v30  ;;  %v1951_v56 = vrot.slane %v7262_v18, 2  ;;  %v2236_v2 = vld [vmem:[%s8092_s14 + $0xc8] sm:$0xff] }
 0x889   :  { %v1929_v17 = vrot.slane %v7242_v0, 1  ;;  %v1973_v45 = vrot.slane %v7266_v20, 4  ;;  %5149 = vrsqrt.f32 %v1992_v29  ;;  %v1923_v6 = vrot.slane %v7283_v41, 1  ;;  %v2235_v29 = vld [vmem:[%s8092_s14 + $0xc0] sm:$0xff] }
 0x88a   :  { %v1952_v19 = vadd.f32 %v1951_v56, %v7262_v18 }
 0x88b   :  { %v1924_v18 = vadd.f32 %v1923_v6, %v7283_v41  ;;  %v2234_v41 = vld [vmem:[%s8092_s14 + $0xb8] sm:$0xff] }
 0x88c   :  { %v1953_v56 = vrot.slane %v1952_v19, 1 }
 0x894   :  { %v5148_v25 = vpop.eup %5147 }
 0x895   :  { %v1860_v26 = vmul.f32 %v5148_v25, %v1859_v28  ;;  %v7296_v28 = vadd.f32 %v1917_v61, %v1916_v59  ;;  %v2238_v25 = vld [vmem:[%s8092_s14 + $0xd8] sm:$0xff]  ;;  %v1955_v59 = vrot.slane %v7254_v15, 4  ;;  %v1941_v61 = vrot.slane %v7299_v5, 1 }
 0x897   :  { %v7204_v23 = vadd.f32 %v1861_v40, %v1860_v26  ;;  %v2222_v26 = vld [vmem:[%s8092_s14 + $0x58] sm:$0xff]  ;;  %v1956_v47 = vadd.f32 %v1955_v59, %v7254_v15  ;;  %v1974_v15 = vadd.f32 %v1973_v45, %v7266_v20  ;;  %v2219_v20 = vld [vmem:[%s8092_s14 + $0x40] sm:$0xff] }
 0x898   :  { %v2472_v40 = vld [vmem:[%s8093_s12 + $0x58] sm:$0xff] }
 0x899   :  { %4840 = vmatmul.mubr.f32.vlgmr.msra.gmra.mxu0 %v7204_v23  ;;  %4875 = vmatmul.mubr.f32.vlgmr.msra.gmra.mxu1 %v7204_v23 }
 0x89a   :  { %4217 = vmatpush3.msra.mxu0 %v2226_v50  ;;  %4273 = vmatpush3.msra.mxu1 %v2476_v1  ;;  %v7327_v50 = vmul.f32 %v7288_v32, %v7288_v32  ;;  %v7332_v1 = vld [vmem:[%s8096_s4 + $0x70] sm:$0xff]  ;;  %s8100_s4 = sld [smem:[#allocation68_spill]] }
 0x89b   :  { %4218 = vmatprep.subr.mxu0 %v2241_v43  ;;  %4274 = vmatprep.subr.mxu1 %v2491_v33  ;;  %v1991_v43 = vmax.f32 %v7280_v21, 1e-24  ;;  %v1912_v33 = vadd.f32 %v1911_v31, %v7227_v35  ;;  %v1934_v35 = vadd.f32 %v1933_v44, %v7244_v27  ;;  %v2220_v27 = vld [vmem:[%s8092_s14 + $0x48] sm:$0xff]  ;;  %v2485_v21 = vld [vmem:[%s8093_s12 + $0xc0] sm:$0xff]  ;;  %v2484_v44 = vld [vmem:[%s8093_s12 + $0xb8] sm:$0xff] }
 0x89c   :  { %4219 = vmatpush3.msra.mxu0 %v2225_v60  ;;  %4275 = vmatpush3.msra.mxu1 %v2475_v37  ;;  %v1994_v60 = vmax.f32 %v7296_v28, 1e-24  ;;  %v1930_v37 = vadd.f32 %v1929_v17, %v7242_v0  ;;  %v1967_v0 = vrot.slane %v7313_v12, 4  ;;  %v1942_v28 = vadd.f32 %v1941_v61, %v7299_v5  ;;  %v2218_v5 = vld [vmem:[%s8092_s14 + $0x38] sm:$0xff] }
 0x89d   :  { %4220 = vmatprep.subr.mxu0 %v2240_v3  ;;  %4276 = vmatprep.subr.mxu1 %v2490_v13  ;;  %v2486_v3 = vld [vmem:[%s8093_s12 + $0xc8] sm:$0xff]  ;;  %v1945_v13 = vrot.slane %v7308_v11, 2  ;;  %5151 = vrsqrt.f32 %v1991_v43  ;;  %v1993_v31 = vmax.f32 %v1912_v33, 1e-24  ;;  %v1935_v17 = vrot.slane %v1934_v35, 1 }
 0x89e   :  { %4221 = vmatpush3.msra.mxu0 %v2224_v53  ;;  %4277 = vmatpush3.msra.mxu1 %v2474_v16  ;;  %v1893_v53 = vmul.f32 %v7332_v1, %v7332_v1  ;;  %v2470_v16 = vld [vmem:[%s8093_s12 + $0x48] sm:$0xff]  ;;  %5153 = vrsqrt.f32 %v1994_v60  ;;  %v1968_v59 = vadd.f32 %v1967_v0, %v7313_v12  ;;  %v2233_v12 = vld [vmem:[%s8092_s14 + $0xb0] sm:$0xff]  ;;  %v1995_v43 = vmax.f32 %v1924_v18, 1e-24 }
 0x89f   :  { %4222 = vmatprep.subr.mxu0 %v2239_v10  ;;  %4278 = vmatprep.subr.mxu1 %v2489_v54  ;;  %v1963_v10 = vrot.slane %v7322_v63, 2  ;;  %v1985_v54 = vrot.slane %v7327_v50, 4  ;;  %5155 = vrsqrt.f32 %v1993_v31  ;;  %v1998_v33 = vmax.f32 %v1942_v28, 1e-24  ;;  %v2464_v28 = vld [vmem:[%s8093_s12 + $0x18] sm:$0xff] }
 0x8a0   :  { %4223 = vmatpush3.msra.mxu0 %v2223_v7  ;;  %4279 = vmatpush3.msra.mxu1 %v2473_v8  ;;  %v2469_v7 = vld [vmem:[%s8093_s12 + $0x40] sm:$0xff]  ;;  %v1996_v8 = vmax.f32 %v1930_v37, 1e-24  ;;  %v1936_v6 = vadd.f32 %v1935_v17, %v1934_v35  ;;  %v1969_v61 = vrot.slane %v1968_v59, 2  ;;  %v2216_v35 = vld [vmem:[%s8092_s14 + $0x28] sm:$0xff] }
 0x8a1   :  { %4224 = vmatprep.subr.mxu0 %v2238_v25  ;;  %4280 = vmatprep.subr.mxu1 %v2488_v49  ;;  %v1946_v25 = vadd.f32 %v1945_v13, %v7308_v11  ;;  %v1957_v49 = vrot.slane %v1956_v47, 2  ;;  %v1964_v45 = vadd.f32 %v1963_v10, %v7322_v63  ;;  %v1986_v11 = vadd.f32 %v1985_v54, %v7327_v50  ;;  %v2217_v63 = vld [vmem:[%s8092_s14 + $0x30] sm:$0xff]  ;;  %v5150_v10 = vpop.eup %5149 }
 0x8a2   :  { %4225 = vmatpush3.msra.mxu0 %v2222_v26  ;;  %4281 = vmatpush3.msra.mxu1 %v2472_v40  ;;  %v1979_v26 = vrot.slane %v1893_v53, 4  ;;  %v2468_v40 = vld [vmem:[%s8093_s12 + $0x38] sm:$0xff]  ;;  %v2467_v50 = vld [vmem:[%s8093_s12 + $0x30] sm:$0xff]  ;;  %5157 = vrsqrt.f32 %v1996_v8  ;;  %v1954_v13 = vadd.f32 %v1953_v56, %v1952_v19  ;;  %v2215_v19 = vld [vmem:[%s8092_s14 + $0x20] sm:$0xff]  ;;  %v1997_v54 = vmax.f32 %v1936_v6, 1e-24 }
 0x8a3   :  { %4226 = vmatprep.subr.mxu0 %v2237_v62  ;;  %4282 = vmatprep.subr.mxu1 %v2487_v42  ;;  %v1975_v62 = vrot.slane %v1974_v15, 2  ;;  %v2483_v42 = vld [vmem:[%s8093_s12 + $0xb0] sm:$0xff]  ;;  %v1947_v60 = vrot.slane %v1946_v25, 1  ;;  %v1958_v37 = vadd.f32 %v1957_v49, %v1956_v47  ;;  %v1965_v0 = vrot.slane %v1964_v45, 1  ;;  %v2231_v47 = vld [vmem:[%s8092_s14 + $0xa0] sm:$0xff]  ;;  %v2214_v8 = vld [vmem:[%s8092_s14 + $0x18] sm:$0xff] }
 0x8a4   :  { %4227 = vmatpush3.msra.mxu0 %v2221_v34  ;;  %4283 = vmatpush3.msra.mxu1 %v2471_v58  ;;  %v2232_v34 = vld [vmem:[%s8092_s14 + $0xa8] sm:$0xff]  ;;  %5159 = vrsqrt.f32 %v1995_v43  ;;  %v2000_v17 = vmax.f32 %v1954_v13, 1e-24  ;;  %v2461_v13 = vld [vmem:[%s8093_s12] sm:$0xff] }
 0x8a5   :  { %4228 = vmatprep.subr.mxu0 %v2236_v2  ;;  %4284 = vmatprep.subr.mxu1 %v2486_v3  ;;  %v2482_v58 = vld [vmem:[%s8093_s12 + $0xa8] sm:$0xff]  ;;  %v1980_v2 = vadd.f32 %v1979_v26, %v1893_v53  ;;  %v2481_v53 = vld [vmem:[%s8093_s12 + $0xa0] sm:$0xff]  ;;  %5161 = vrsqrt.f32 %v1998_v33  ;;  %v1948_v31 = vadd.f32 %v1947_v60, %v1946_v25  ;;  %v1959_v18 = vrot.slane %v1958_v37, 1  ;;  %v2229_v25 = vld [vmem:[%s8092_s14 + $0x90] sm:$0xff] }
 0x8a6   :  { %4229 = vmatpush3.msra.mxu0 %v2220_v27  ;;  %4285 = vmatpush3.msra.mxu1 %v2470_v16  ;;  %v2466_v3 = vld [vmem:[%s8093_s12 + $0x28] sm:$0xff]  ;;  %v1976_v27 = vadd.f32 %v1975_v62, %v1974_v15  ;;  %v1987_v16 = vrot.slane %v1986_v11, 2  ;;  %v2465_v15 = vld [vmem:[%s8093_s12 + $0x20] sm:$0xff]  ;;  %5163 = vrsqrt.f32 %v1997_v54 }
 0x8a7   :  { %4230 = vmatprep.subr.mxu0 %v2235_v29  ;;  %4286 = vmatprep.subr.mxu1 %v2485_v21  ;;  %v2230_v29 = vld [vmem:[%s8092_s14 + $0x98] sm:$0xff]  ;;  %v2478_v62 = vld [vmem:[%s8093_s12 + $0x88] sm:$0xff]  ;;  %5165 = vrsqrt.f32 %v2000_v17  ;;  %v2477_v60 = vld [vmem:[%s8093_s12 + $0x80] sm:$0xff] }
 0x8a8   :  { %4231 = vmatpush3.msra.mxu0 %v2219_v20  ;;  %4287 = vmatpush3.msra.mxu1 %v2469_v7  ;;  %v2480_v21 = vld [vmem:[%s8093_s12 + $0x98] sm:$0xff]  ;;  %v1970_v20 = vadd.f32 %v1969_v61, %v1968_v59  ;;  %v1981_v7 = vrot.slane %v1980_v2, 2  ;;  %v1988_v49 = vadd.f32 %v1987_v16, %v1986_v11  ;;  %v2479_v59 = vld [vmem:[%s8093_s12 + $0x90] sm:$0xff]  ;;  %v1999_v11 = vmax.f32 %v1948_v31, 1e-24 }
 0x8a9   :  { %4232 = vmatprep.subr.mxu0 %v2234_v41  ;;  %4288 = vmatprep.subr.mxu1 %v2484_v44  ;;  %v1966_v41 = vadd.f32 %v1965_v0, %v1964_v45  ;;  %v1977_v44 = vrot.slane %v1976_v27, 1  ;;  %v2228_v45 = vld [vmem:[%s8092_s14 + $0x88] sm:$0xff] }
 0x8aa   :  { %4233 = vmatpush3.msra.mxu0 %v2218_v5  ;;  %4289 = vmatpush3.msra.mxu1 %v2468_v40  ;;  %v5152_v26 = vpop.eup %5151  ;;  %v2213_v5 = vld [vmem:[%s8092_s14 + $0x10] sm:$0xff]  ;;  %v1982_v43 = vadd.f32 %v1981_v7, %v1980_v2  ;;  %v2211_v2 = vld [vmem:[%s8092_s14] sm:$0xff]  ;;  %5167 = vrsqrt.f32 %v1999_v11 }
 0x8ab   :  { %4234 = vmatprep.subr.mxu0 %v2233_v12  ;;  %4290 = vmatprep.subr.mxu1 %v2483_v42  ;;  %v2463_v40 = vld [vmem:[%s8093_s12 + $0x10] sm:$0xff]  ;;  %v5154_v56 = vpop.eup %5153  ;;  %v1960_v12 = vadd.f32 %v1959_v18, %v1958_v37  ;;  %v1971_v42 = vrot.slane %v1970_v20, 1  ;;  %v2002_v33 = vmax.f32 %v1966_v41, 1e-24  ;;  %v1978_v6 = vadd.f32 %v1977_v44, %v1976_v27 }
 0x8ac   :  { %4235 = vmatpush3.msra.mxu0 %v2217_v63  ;;  %4291 = vmatpush3.msra.mxu1 %v2467_v50  ;;  %v2212_v63 = vld [vmem:[%s8092_s14 + $0x8] sm:$0xff]  ;;  %v7483_v37 = vmul.f32 %v5150_v10, %v7129_v52  ;;  %v5156_v61 = vpop.eup %5155  ;;  %v1983_v27 = vrot.slane %v1982_v43, 1  ;;  %v7495_v16 = vmul.f32 %v5154_v56, %v7142_v55 }
 0x8ad   :  { %4236 = vmatprep.subr.mxu0 %v2232_v34  ;;  %4292 = vmatprep.subr.mxu1 %v2482_v58  ;;  %v2462_v50 = vld [vmem:[%s8093_s12 + $0x8] sm:$0xff]  ;;  %v1989_v34 = vrot.slane %v1988_v49, 1  ;;  %v2227_v58 = vld [vmem:[%s8092_s14 + $0x80] sm:$0xff]  ;;  %v2001_v52 = vmax.f32 %v1960_v12, 1e-24  ;;  %v1972_v0 = vadd.f32 %v1971_v42, %v1970_v20  ;;  %5169 = vrsqrt.f32 %v2002_v33 }
 0x8ae   :  { %4237 = vmatpush3.msra.mxu0 %v2216_v35  ;;  %4293 = vmatpush3.msra.mxu1 %v2466_v3  ;;  %v7489_v35 = vmul.f32 %v5152_v26, %v7136_v24  ;;  %v8098_v56 = vld [vmem:[#allocation31_spill] sm:$0xff] }
 0x8af   :  { %4238 = vmatprep.subr.mxu0 %v2231_v47  ;;  %4294 = vmatprep.subr.mxu1 %v2481_v53  ;;  %v5158_v3 = vpop.eup %5157  ;;  %v2004_v47 = vmax.f32 %v1978_v6, 1e-24  ;;  %v1990_v24 = vadd.f32 %v1989_v34, %v1988_v49  ;;  %5171 = vrsqrt.f32 %v2001_v52  ;;  %v2003_v55 = vmax.f32 %v1972_v0, 1e-24  ;;  %v8099_v34 = vld [vmem:[#allocation32_spill] sm:$0xff] }
 0x8b0   :  { %4239 = vmatpush3.msra.mxu0 %v2215_v19  ;;  %4295 = vmatpush3.msra.mxu1 %v2465_v15  ;;  %v7502_v19 = vmul.f32 %v5156_v61, %v7152_v57  ;;  %v1984_v15 = vadd.f32 %v1983_v27, %v1982_v43  ;;  %v7507_v54 = vmul.f32 %v5158_v3, %v7157_v39 }
 0x8b1   :  { %4240 = vmatprep.subr.mxu0 %v2230_v29  ;;  %4296 = vmatprep.subr.mxu1 %v2480_v21  ;;  %v5160_v53 = vpop.eup %5159  ;;  %5173 = vrsqrt.f32 %v2004_v47  ;;  %v2006_v29 = vmax.f32 %v1990_v24, 1e-24 }
 0x8b2   :  { %4241 = vmatpush3.msra.mxu0 %v2214_v8  ;;  %4297 = vmatpush3.msra.mxu1 %v2464_v28  ;;  %v5162_v10 = vpop.eup %5161  ;;  %v7512_v57 = vmul.f32 %v5160_v53, %v7166_v4  ;;  %5175 = vrsqrt.f32 %v2003_v55  ;;  %v2005_v31 = vmax.f32 %v1984_v15, 1e-24 }
 0x8b3   :  { %4242 = vmatprep.subr.mxu0 %v2229_v25  ;;  %4298 = vmatprep.subr.mxu1 %v2479_v59  ;;  %v5164_v21 = vpop.eup %5163  ;;  %v7517_v18 = vmul.f32 %v5162_v10, %v7171_v14  ;;  %5177 = vrsqrt.f32 %v2006_v29 }
 0x8b4   :  { %4243 = vmatpush3.msra.mxu0 %v2213_v5  ;;  %4299 = vmatpush3.msra.mxu1 %v2463_v40  ;;  %v5166_v39 = vpop.eup %5165  ;;  %v7522_v20 = vmul.f32 %v5164_v21, %v7180_v9  ;;  %5179 = vrsqrt.f32 %v2005_v31  ;;  %v5521_v5 = vmov 1966171168  }
 0x8b5   :  { %4244 = vmatprep.subr.mxu0 %v2228_v45  ;;  %4300 = vmatprep.subr.mxu1 %v2478_v62  ;;  %v7527_v7 = vmul.f32 %v5166_v39, %v7185_v48  ;;  %v2351_v40 = vunpack.c.l.s4 %v5521_v5 }
 0x8b6   :  { %4245 = vmatpush3.msra.mxu0 %v2212_v63  ;;  %4301 = vmatpush3.msra.mxu1 %v2462_v50 }
 0x8b7   :  { %4246 = vmatprep.subr.mxu0 %v2227_v58  ;;  %4302 = vmatprep.subr.mxu1 %v2477_v60  ;;  %v5168_v4 = vpop.eup %5167  ;;  %v7580_v60 = vld [vmem:[%s8100_s4] ss:$0 sm:$0xff] }
 0x8b8   :  { %4247 = vmatpush3.msra.mxu0 %v2211_v2  ;;  %2307 = vmatprep.mubr.f32.mxu0 %v7483_v37  ;;  %v7532_v8 = vmul.f32 %v5168_v4, %v7194_v22 }
 0x8b9   :  { %4303 = vmatpush3.msra.mxu1 %v2461_v13  ;;  %2557 = vmatprep.mubr.f32.mxu1 %v7483_v37 }
 0x8ba   :  { %2308 = vmatmul.mubr.f32.vlgmr.msra.gmra.mxu0 %v7489_v35  ;;  %2558 = vmatmul.mubr.f32.vlgmr.msra.gmra.mxu1 %v7489_v35  ;;  %v5170_v14 = vpop.eup %5169 }
 0x8bb   :  { %2312 = vmatprep.mubr.f32.mxu0 %v7495_v16  ;;  %2562 = vmatprep.mubr.f32.mxu1 %v7495_v16  ;;  %v7537_v9 = vmul.f32 %v5170_v14, %v7199_v51 }
 0x8bc   :  { %v5172_v28 = vpop.eup %5171 }
 0x8bd   :  { %v7542_v48 = vmul.f32 %v5172_v28, %v7217_v38 }
 0x8be   :  { %2313 = vmatmul.mubr.f32.gmra.mxu0 %v7502_v19  ;;  %2563 = vmatmul.mubr.f32.gmra.mxu1 %v7502_v19  ;;  %v5174_v17 = vpop.eup %5173 }
 0x8bf   :  { %2317 = vmatprep.mubr.f32.mxu0 %v7507_v54  ;;  %2567 = vmatprep.mubr.f32.mxu1 %v7507_v54  ;;  %v5176_v41 = vpop.eup %5175  ;;  %v7547_v22 = vmul.f32 %v5174_v17, %v7232_v36 }
 0x8c0   :  { %v5178_v44 = vpop.eup %5177  ;;  %v7552_v51 = vmul.f32 %v5176_v41, %v7271_v30  ;;  %v5520_v30 = vmov 0  }
 0x8c1   :  { %v5180_v49 = vpop.eup %5179  ;;  %v7557_v38 = vmul.f32 %v5178_v44, %v7288_v32  ;;  %5067 = vset.pattern.permute.xlu0 %v5520_v30  ;;  %5068 = vset.pattern.permute.xlu1 %v5520_v30 }
 0x8c2   :  { %2318 = vmatmul.mubr.f32.gmra.mxu0 %v7512_v57  ;;  %2568 = vmatmul.mubr.f32.gmra.mxu1 %v7512_v57  ;;  %v7562_v36 = vmul.f32 %v5180_v49, %v7332_v1  ;;  %v2352_v1 = vunpack.c.0.s8 %v2351_v40 }
 0x8c3   :  { %2322 = vmatprep.mubr.f32.mxu0 %v7517_v18  ;;  %2572 = vmatprep.mubr.f32.mxu1 %v7517_v18 }
 0x8c4   :  { %v7571_v45 = vsub.s32 %v2352_v1, %v8098_v56 }
 0x8c6   :  { %2323 = vmatmul.mubr.f32.gmra.mxu0 %v7522_v20  ;;  %2573 = vmatmul.mubr.f32.gmra.mxu1 %v7522_v20 }
 0x8c7   :  { %2327 = vmatprep.mubr.f32.mxu0 %v7527_v7  ;;  %2577 = vmatprep.mubr.f32.mxu1 %v7527_v7 }
 0x8ca   :  { %2328 = vmatmul.mubr.f32.gmra.mxu0 %v7532_v8  ;;  %2578 = vmatmul.mubr.f32.gmra.mxu1 %v7532_v8 }
 0x8cb   :  { %2332 = vmatprep.mubr.f32.mxu0 %v7537_v9  ;;  %2582 = vmatprep.mubr.f32.mxu1 %v7537_v9 }
 0x8ce   :  { %2333 = vmatmul.mubr.f32.gmra.mxu0 %v7542_v48  ;;  %2583 = vmatmul.mubr.f32.gmra.mxu1 %v7542_v48 }
 0x8cf   :  { %2337 = vmatprep.mubr.f32.mxu0 %v7547_v22  ;;  %2587 = vmatprep.mubr.f32.mxu1 %v7547_v22 }
 0x8d2   :  { %2338 = vmatmul.mubr.f32.gmra.mxu0 %v7552_v51  ;;  %2588 = vmatmul.mubr.f32.gmra.mxu1 %v7552_v51 }
 0x8d3   :  { %2342 = vmatprep.mubr.f32.mxu0 %v7557_v38  ;;  %2592 = vmatprep.mubr.f32.mxu1 %v7557_v38 }
 0x8d6   :  { %2343 = vmatmul.mubr.f32.gmra.mxu0 %v7562_v36  ;;  %2593 = vmatmul.mubr.f32.gmra.mxu1 %v7562_v36 }
 0x959   :  { %v7568_v32 = vpop.f32.mrf.mxu0  ;;  %v2207_v25 = vpop.f32.mrf.mxu1 }
 0x95a   :  { %v2606_v62 = vrot.slane %v2207_v25, %v7571_v45  ;;  %v2599_v13 = vcombine.high %v2207_v25, %v2207_v25  ;;  %v2356_v27 = vrot.slane %v7568_v32, %v7571_v45 }
 0x95b   :  { %v4841_v59 = vpop.f32.mrf.mxu0  ;;  %v4876_v26 = vpop.f32.mrf.mxu1 }
 0x95c   :  { %v2614_v11 = vcombine.high %v2606_v62, %v2606_v62  ;;  %v2622_v12 = vrot.slane %v2606_v62, %v7571_v45  ;;  %v2613_v31 = vrot.slane %v2599_v13, %v7571_v45  ;;  %v2372_v14 = vrot.slane %v2356_v27, %v7571_v45 }
 0x95d   :  { %v2364_v41 = vcombine.high %v2356_v27, %v2356_v27 }
 0x95e   :  { %v2636_v33 = vrot.slane %v2614_v11, %v7571_v45  ;;  %v2651_v58 = vrot.slane %v2622_v12, %v8099_v34  ;;  %v2644_v10 = vcombine.high %v2622_v12, %v2622_v12  ;;  %v2629_v5 = vrot.slane %v2613_v31, %v7571_v45 }
 0x95f   :  { %v2401_v11 = vrot.slane %v2372_v14, %v8099_v34 }
 0x960   :  { %v2655_v53 = vrot.slane %v2636_v33, %v8099_v34  ;;  %v2646_v17 = vcombine.high %v2636_v33, %v2636_v33  ;;  %v2659_v49 = vrot.slane %v2644_v10, %v8099_v34  ;;  %v2615_v33 = vcombine.high %v2613_v31, %v2613_v31 }
 0x961   :  { %v2667_v10 = vrot.slane %v2629_v5, %v8099_v34 }
 0x97a   :  { %v4248_v42 = vpop.f32.mrf.mxu0  ;;  %v4304_v43 = vpop.f32.mrf.mxu1 }
 0x97c   :  { %v4249_v63 = vpop.f32.mrf.mxu0  ;;  %v4305_v50 = vpop.f32.mrf.mxu1 }
 0x97d   :  { %v4306_v6 = vadd.f32 %v4305_v50, %v4304_v43  ;;  %v4250_v59 = vadd.f32 %v4249_v63, %v4248_v42  ;;  %v2663_v43 = vrot.slane %v2646_v17, %v8099_v34  ;;  %v2386_v50 = vrot.slane %v2364_v41, %v7571_v45 }
 0x97e   :  { %v4251_v61 = vpop.f32.mrf.mxu0  ;;  %v4307_v2 = vpop.f32.mrf.mxu1 }
 0x97f   :  { %v2688_v3 = vadd.f32 %v4306_v6, %v2651_v58  ;;  %v2438_v63 = vadd.f32 %v4250_v59, %v2401_v11 }
 0x980   :  { %v4252_v52 = vpop.f32.mrf.mxu0  ;;  %v4308_v0 = vpop.f32.mrf.mxu1 }
 0x981   :  { %v2703_v47 = vadd.f32 %v7580_v60, %v2688_v3  ;;  %v4309_v24 = vadd.f32 %v4308_v0, %v4307_v2  ;;  %v7600_v3 = vld [vmem:[%s8101_s0] ss:$0 sm:$0xff]  ;;  %v4253_v13 = vadd.f32 %v4252_v52, %v4251_v61  ;;  %v2349_v61 = vcombine.high %v7568_v32, %v7568_v32 }
 0x982   :  { %v4254_v55 = vpop.f32.mrf.mxu0  ;;  %v4310_v15 = vpop.f32.mrf.mxu1  ;;  %v2453_v52 = vadd.f32 %v7600_v3, %v2438_v63 }
 0x983   :  { %v4001_v29 = vmul.f32 -1.442695, %v2703_v47  ;;  %v2689_v21 = vadd.f32 %v4309_v24, %v2655_v53 }
 0x984   :  { %v4255_v39 = vpop.f32.mrf.mxu0  ;;  %v4311_v4 = vpop.f32.mrf.mxu1 }
 0x985   :  { %5181 = vpow2.f32 %v4001_v29  ;;  %v2704_v28 = vadd.f32 %v7580_v60, %v2689_v21  ;;  %v4312_v44 = vadd.f32 %v4311_v4, %v4310_v15  ;;  %v2394_v15 = vcombine.high %v2372_v14, %v2372_v14 }
 0x986   :  { %v4257_v30 = vpop.f32.mrf.mxu0  ;;  %v4313_v25 = vpop.f32.mrf.mxu1  ;;  %v2405_v29 = vrot.slane %v2386_v50, %v8099_v34  ;;  %v2643_v4 = vrot.slane %v2615_v33, %v7571_v45 }
 0x987   :  { %v4002_v26 = vmul.f32 -1.442695, %v2704_v28  ;;  %v2690_v40 = vadd.f32 %v4312_v44, %v2659_v49  ;;  %v4256_v44 = vadd.f32 %v4255_v39, %v4254_v55 }
 0x988   :  { %v4258_v1 = vpop.f32.mrf.mxu0  ;;  %v4314_v62 = vpop.f32.mrf.mxu1  ;;  %v2439_v41 = vadd.f32 %v4253_v13, %v2405_v29 }
 0x989   :  { %5183 = vpow2.f32 %v4002_v26  ;;  %v4315_v12 = vadd.f32 %v4314_v62, %v4313_v25  ;;  %v2705_v6 = vadd.f32 %v7580_v60, %v2690_v40  ;;  %v2645_v25 = vcombine.high %v2629_v5, %v2629_v5 }
 0x98a   :  { %v7595_v58 = vpop.f32.mrf.mxu0  ;;  %v4316_v42 = vpop.f32.mrf.mxu1  ;;  %v2409_v26 = vrot.slane %v2394_v15, %v8099_v34  ;;  %v2396_v40 = vcombine.high %v2386_v50, %v2386_v50  ;;  %v2454_v55 = vadd.f32 %v7600_v3, %v2439_v41 }
 0x98b   :  { %v2691_v2 = vadd.f32 %v4315_v12, %v2663_v43  ;;  %v4003_v0 = vmul.f32 -1.442695, %v2705_v6  ;;  %v2671_v12 = vrot.slane %v2643_v4, %v8099_v34  ;;  %v2363_v43 = vrot.slane %v2349_v61, %v7571_v45 }
 0x98c   :  { %v4261_v27 = vpop.f32.mrf.mxu0  ;;  %v4317_v47 = vpop.f32.mrf.mxu1  ;;  %v2440_v39 = vadd.f32 %v4256_v44, %v2409_v26  ;;  %v2675_v50 = vrot.slane %v2645_v25, %v8099_v34 }
 0x98d   :  { %v2706_v24 = vadd.f32 %v7580_v60, %v2691_v2  ;;  %v4318_v53 = vadd.f32 %v4317_v47, %v4316_v42  ;;  %5185 = vpow2.f32 %v4003_v0  ;;  %v4259_v42 = vadd.f32 %v4258_v1, %v4257_v30 }
 0x98e   :  { %v7605_v21 = vpop.f32.mrf.mxu0  ;;  %v4319_v31 = vpop.f32.mrf.mxu1  ;;  %v2413_v0 = vrot.slane %v2396_v40, %v8099_v34  ;;  %v2365_v15 = vcombine.high %v2363_v43, %v2363_v43  ;;  %v2379_v29 = vrot.slane %v2363_v43, %v7571_v45  ;;  %v2455_v1 = vadd.f32 %v7600_v3, %v2440_v39 }
 0x98f   :  { %v4004_v28 = vmul.f32 -1.442695, %v2706_v24  ;;  %v2692_v17 = vadd.f32 %v4318_v53, %v2667_v10  ;;  %v2647_v10 = vcombine.high %v2643_v4, %v2643_v4 }
 0x990   :  { %v4320_v49 = vpop.f32.mrf.mxu1  ;;  %v4264_v62 = vpop.f32.mrf.mxu0  ;;  %v2441_v61 = vadd.f32 %v4259_v42, %v2413_v0  ;;  %v2417_v25 = vrot.slane %v2379_v29, %v8099_v34  ;;  %v2395_v43 = vcombine.high %v2379_v29, %v2379_v29 }
 0x991   :  { %5187 = vpow2.f32 %v4004_v28  ;;  %v2707_v14 = vadd.f32 %v7580_v60, %v2692_v17  ;;  %v4321_v11 = vadd.f32 %v4320_v49, %v4319_v31  ;;  %v4262_v17 = vadd.f32 %v4261_v27, %v7595_v58 }
 0x992   :  { %v5182_v59 = vpop.eup %5181  ;;  %v4322_v32 = vpop.f32.mrf.mxu1  ;;  %5189 = vtanh.f32 %v2453_v52  ;;  %v2679_v4 = vrot.slane %v2647_v10, %v8099_v34  ;;  %v4265_v58 = vadd.f32 %v4264_v62, %v7605_v21  ;;  %v2425_v21 = vrot.slane %v2395_v43, %v8099_v34 }
 0x993   :  { %v2743_v33 = vadd.f32 1.0, %v5182_v59  ;;  %v4005_v6 = vmul.f32 -1.442695, %v2707_v14  ;;  %v2693_v63 = vadd.f32 %v4321_v11, %v2671_v12  ;;  %v4266_v24 = vpop.f32.mrf.mxu0  ;;  %v2393_v59 = vrot.slane %v2365_v15, %v7571_v45 }
 0x994   :  { %v4323_v5 = vpop.f32.mrf.mxu1  ;;  %v2456_v11 = vadd.f32 %v7600_v3, %v2441_v61 }
 0x995   :  { %5191 = vrcp.f32 %v2743_v33  ;;  %v4324_v2 = vadd.f32 %v4323_v5, %v4322_v32  ;;  %v2708_v47 = vadd.f32 %v7580_v60, %v2693_v63  ;;  %v4267_v44 = vpop.f32.mrf.mxu0  ;;  %v2442_v32 = vadd.f32 %v4262_v17, %v2417_v25 }
 0x996   :  { %v5184_v13 = vpop.eup %5183  ;;  %5193 = vpow2.f32 %v4005_v6  ;;  %v4325_v53 = vpop.f32.mrf.mxu1  ;;  %v2421_v39 = vrot.slane %v2393_v59, %v8099_v34  ;;  %v4268_v42 = vadd.f32 %v4267_v44, %v4266_v24  ;;  %v2397_v0 = vcombine.high %v2393_v59, %v2393_v59 }
 0x997   :  { %v2744_v31 = vadd.f32 1.0, %v5184_v13  ;;  %v2694_v30 = vadd.f32 %v4324_v2, %v2675_v50  ;;  %5195 = vtanh.f32 %v2454_v55  ;;  %v4006_v52 = vmul.f32 -1.442695, %v2708_v47  ;;  %v4269_v33 = vpop.f32.mrf.mxu0 }
 0x998   :  { %v4326_v28 = vpop.f32.mrf.mxu1  ;;  %v2457_v5 = vadd.f32 %v7600_v3, %v2442_v32  ;;  %v2443_v2 = vadd.f32 %v4265_v58, %v2421_v39  ;;  %v2444_v10 = vadd.f32 %v4268_v42, %v2425_v21  ;;  %v2429_v61 = vrot.slane %v2397_v0, %v8099_v34 }
 0x999   :  { %5197 = vrcp.f32 %v2744_v31  ;;  %v2709_v41 = vadd.f32 %v7580_v60, %v2694_v30  ;;  %v4327_v49 = vadd.f32 %v4326_v28, %v4325_v53  ;;  %v4270_v62 = vpop.f32.mrf.mxu0 }
 0x99a   :  { %5199 = vpow2.f32 %v4006_v52  ;;  %v5186_v14 = vpop.eup %5185  ;;  %v2458_v15 = vadd.f32 %v7600_v3, %v2443_v2  ;;  %v4271_v29 = vadd.f32 %v4270_v62, %v4269_v33  ;;  %v2459_v17 = vadd.f32 %v7600_v3, %v2444_v10 }
 0x99b   :  { %v4007_v26 = vmul.f32 -1.442695, %v2709_v41  ;;  %5201 = vtanh.f32 %v2455_v1  ;;  %v2745_v40 = vadd.f32 1.0, %v5186_v14  ;;  %v2695_v12 = vadd.f32 %v4327_v49, %v2679_v4 }
 0x99c   :  { %v2445_v44 = vadd.f32 %v4271_v29, %v2429_v61 }
 0x99d   :  { %5203 = vpow2.f32 %v4007_v26  ;;  %v2710_v6 = vadd.f32 %v7580_v60, %v2695_v12  ;;  %v4009_v60 = vld [vmem:[%s8102_s29] ss:$0 sm:$0xff] }
 0x99e   :  { %v5188_v27 = vpop.eup %5187  ;;  %5205 = vrcp.f32 %v2745_v40  ;;  %v2460_v40 = vadd.f32 %v7600_v3, %v2445_v44 }
 0x99f   :  { %v2746_v55 = vadd.f32 1.0, %v5188_v27  ;;  %v5190_v45 = vpop.eup %5189  ;;  %5207 = vtanh.f32 %v2456_v11  ;;  %v4008_v63 = vmul.f32 -1.442695, %v2710_v6 }
 0x9a1   :  { %5209 = vrcp.f32 %v2746_v55 }
 0x9a2   :  { %v5192_v50 = vpop.eup %5191  ;;  %5211 = vpow2.f32 %v4008_v63 }
 0x9a3   :  { %v5194_v13 = vpop.eup %5193  ;;  %v2767_v47 = vmul.f32 %v5192_v50, %v5190_v45  ;;  %5213 = vtanh.f32 %v2457_v5 }
 0x9a4   :  { %v2747_v53 = vadd.f32 1.0, %v5194_v13  ;;  %v5196_v24 = vpop.eup %5195 }
 0x9a5   :  { %v2782_v31 = vmul.f32 %v4009_v60, %v2767_v47 }
 0x9a6   :  { %v5198_v30 = vpop.eup %5197  ;;  %5215 = vrcp.f32 %v2747_v53  ;;  %v4010_v53 = vld [vmem:[#allocation2] ss:$0 sm:$0xff] }
 0x9a7   :  { %v5200_v1 = vpop.eup %5199  ;;  %2790 = vadd.xlane.f32.xlu0 %v2782_v31  ;;  %v2768_v52 = vmul.f32 %v5198_v30, %v5196_v24  ;;  %5217 = vtanh.f32 %v2458_v15  ;;  %v8103_v31 = vlaneseq }
 0x9a8   :  { %v2748_v28 = vadd.f32 1.0, %v5200_v1  ;;  %v5202_v41 = vpop.eup %5201 }
 0x9a9   :  { %v2783_v49 = vmul.f32 %v4009_v60, %v2768_v52  ;;  %v2833_v30 = vand.u32 127, %v8103_v31  ;;  %v2904_v31 = vsub.s32 4, %v8098_v56 }
 0x9aa   :  { %v5204_v4 = vpop.eup %5203  ;;  %5219 = vrcp.f32 %v2748_v28 }
 0x9ab   :  { %v5206_v14 = vpop.eup %5205  ;;  %v2749_v25 = vadd.f32 1.0, %v5204_v4  ;;  %2792 = vadd.xlane.f32.xlu0 %v2783_v49  ;;  %5221 = vtanh.f32 %v2459_v17  ;;  %v7641_v52 = vsub.s32 %v2833_v30, %v8098_v56 }
 0x9ac   :  { %v2769_v59 = vmul.f32 %v5206_v14, %v5202_v41  ;;  %v5208_v26 = vpop.eup %5207 }
 0x9ad   :  { %5223 = vrcp.f32 %v2749_v25 }
 0x9ae   :  { %v5210_v11 = vpop.eup %5209  ;;  %v2784_v12 = vmul.f32 %v4009_v60, %v2769_v59  ;;  %5225 = vtanh.f32 %v2460_v40 }
 0x9af   :  { %v5212_v32 = vpop.eup %5211  ;;  %v2770_v58 = vmul.f32 %v5210_v11, %v5208_v26 }
 0x9b0   :  { %v2750_v27 = vadd.f32 1.0, %v5212_v32  ;;  %2794 = vadd.xlane.f32.xlu1 %v2784_v12  ;;  %v5214_v33 = vpop.eup %5213 }
 0x9b1   :  { %v2785_v43 = vmul.f32 %v4009_v60, %v2770_v58 }
 0x9b2   :  { %5227 = vrcp.f32 %v2750_v27 }
 0x9b3   :  { %v5216_v6 = vpop.eup %5215 }
 0x9b4   :  { %2796 = vadd.xlane.f32.xlu1 %v2785_v43  ;;  %v2771_v55 = vmul.f32 %v5216_v6, %v5214_v33  ;;  %v5218_v39 = vpop.eup %5217 }
 0x9b6   :  { %v2786_v45 = vmul.f32 %v4009_v60, %v2771_v55 }
 0x9b7   :  { %v5220_v42 = vpop.eup %5219 }
 0x9b8   :  { %2798 = vadd.xlane.f32.xlu0 %v2786_v45  ;;  %v2772_v63 = vmul.f32 %v5220_v42, %v5218_v39  ;;  %v5222_v5 = vpop.eup %5221 }
 0x9ba   :  { %v5224_v3 = vpop.eup %5223  ;;  %v2787_v2 = vmul.f32 %v4009_v60, %v2772_v63 }
 0x9bb   :  { %v2773_v50 = vmul.f32 %v5224_v3, %v5222_v5  ;;  %v5226_v62 = vpop.eup %5225 }
 0x9bc   :  { %2800 = vadd.xlane.f32.xlu1 %v2787_v2  ;;  %v2916_v2 = vsub.s32 7, %v8098_v56 }
 0x9bd   :  { %v2788_v21 = vmul.f32 %v4009_v60, %v2773_v50 }
 0x9bf   :  { %v5228_v13 = vpop.eup %5227  ;;  %2802 = vadd.xlane.f32.xlu0 %v2788_v21 }
 0x9c0   :  { %v2774_v0 = vmul.f32 %v5228_v13, %v5226_v62  ;;  %v8104_v62 = vld [vmem:[#allocation33_spill] sm:$0xff] }
 0x9c2   :  { %v2789_v47 = vmul.f32 %v4009_v60, %v2774_v0 }
 0x9c4   :  { %2804 = vadd.xlane.f32.xlu1 %v2789_v47  ;;  %v2900_v47 = vsub.s32 3, %v8098_v56 }
 0x9d5   :  { %2813 = vperm.xlu0 %5067, %v4010_v53   ;;  %v8105_v53 = vld [vmem:[#allocation42_spill] sm:$0xff] }
 0xa30   :  { %v2791_v10 = vpop.xlane.xlu0 %2790 }
 0xa34   :  { %v2793_v24 = vpop.xlane.xlu0 %2792 }
 0xa39   :  { %v2795_v15 = vpop.xlane.xlu1 %2794 }
 0xa3d   :  { %v2797_v1 = vpop.xlane.xlu1 %2796 }
 0xa41   :  { %v2799_v29 = vpop.xlane.xlu0 %2798 }
 0xa45   :  { %v2801_v28 = vpop.xlane.xlu1 %2800 }
 0xa48   :  { %v2803_v61 = vpop.xlane.xlu0 %2802 }
 0xa4d   :  { %v2805_v40 = vpop.xlane.xlu1 %2804 }
 0xa50   :  { %v2814_v17 = vpop.permute.xlu0 %2813 }
 0xa51   :  { %v2816_v41 = vadd.f32 %v2814_v17, %v2791_v10  ;;  %v2817_v44 = vadd.f32 %v2814_v17, %v2793_v24  ;;  %v2818_v49 = vadd.f32 %v2814_v17, %v2795_v15  ;;  %v2819_v60 = vadd.f32 %v2814_v17, %v2797_v1 }
 0xa52   :  { %v2820_v4 = vadd.f32 %v2814_v17, %v2799_v29  ;;  %v7643_v14 = vadd.f32 %v2814_v17, %v2801_v28  ;;  %v7648_v11 = vadd.f32 %v2814_v17, %v2803_v61  ;;  %v2823_v12 = vadd.f32 %v2814_v17, %v2805_v40 }
 0xa53   :  { %v2837_v25 = vrot.slane %v2816_v41, %v7641_v52  ;;  %v2841_v59 = vrot.slane %v2817_v44, %v7641_v52  ;;  %v2845_v26 = vrot.slane %v2818_v49, %v7641_v52  ;;  %v2849_v32 = vrot.slane %v2819_v60, %v7641_v52 }
 0xa54   :  { %v2853_v27 = vrot.slane %v2820_v4, %v7641_v52  ;;  %v2857_v33 = vrot.slane %v7643_v14, %v7641_v52  ;;  %v2861_v55 = vrot.slane %v7648_v11, %v7641_v52  ;;  %v2865_v45 = vrot.slane %v2823_v12, %v7641_v52 }
 0xa55   :  { %v2867_v58 = vsel %vm2866_vm1, %v2841_v59, %v2837_v25  ;;  %v2908_v17 = vsub.s32 5, %v8098_v56 }
 0xa56   :  { %v2869_v43 = vsel %vm2868_vm2, %v2845_v26, %v2867_v58 }
 0xa57   :  { %v2871_v6 = vsel %vm2870_vm3, %v2849_v32, %v2869_v43 }
 0xa58   :  { %v2873_v39 = vsel %vm2872_vm4, %v2853_v27, %v2871_v6 }
 0xa59   :  { %v2875_v42 = vsel %vm2874_vm5, %v2857_v33, %v2873_v39 }
 0xa5a   :  { %v2877_v63 = vsel %vm2876_vm6, %v2861_v55, %v2875_v42 }
 0xa5b   :  { %v2879_v5 = vsel %vm2878_vm7, %v2865_v45, %v2877_v63 }
 0xa5c   :  { %v2882_v3 = vsel %vm2881_vm8, %v2879_v5, -inf }
 0xa5d   :  { %2883 = vmax.xlane.f32.xlu1 %v2882_v3 }
 0xae6   :  { %v2884_v50 = vpop.xlane.xlu1 %2883 }
 0xae7   :  { %v2889_v21 = vrot.slane %v2884_v50, %v8099_v34  ;;  %v2893_v13 = vrot.slane %v2884_v50, %v8104_v62  ;;  %v2917_v0 = vrot.slane %v2884_v50, %v2916_v2  ;;  %v2897_v10 = vrot.slane %v2884_v50, %v8105_v53 }
 0xae8   :  { %v2901_v1 = vrot.slane %v2884_v50, %v2900_v47  ;;  %v2905_v59 = vrot.slane %v2884_v50, %v2904_v31  ;;  %v2909_v40 = vrot.slane %v2884_v50, %v2908_v17 }
 0xae9   :  { %v2926_v24 = vsub.f32 %v2816_v41, %v2889_v21  ;;  %v2927_v15 = vsub.f32 %v2817_v44, %v2893_v13  ;;  %v2933_v30 = vsub.f32 %v2823_v12, %v2917_v0  ;;  %v2928_v61 = vsub.f32 %v2818_v49, %v2897_v10 }
 0xaea   :  { %v2929_v26 = vsub.f32 %v2819_v60, %v2901_v1  ;;  %v2912_v44 = vsub.s32 6, %v8098_v56  ;;  %v2930_v12 = vsub.f32 %v2820_v4, %v2905_v59  ;;  %v2931_v58 = vsub.f32 %v7643_v14, %v2909_v40  ;;  %v3236_v56 = vld [vmem:[#allocation7 + $0x48] sm:$0xff] }
 0xaeb   :  { %v2934_v29 = vmul.f32 1.442695, %v2926_v24  ;;  %v2936_v28 = vmul.f32 1.442695, %v2927_v15  ;;  %v2948_v25 = vmul.f32 1.442695, %v2933_v30 }
 0xaec   :  { %v2938_v41 = vmul.f32 1.442695, %v2928_v61  ;;  %v2940_v49 = vmul.f32 1.442695, %v2929_v26  ;;  %v2913_v32 = vrot.slane %v2884_v50, %v2912_v44  ;;  %v2942_v27 = vmul.f32 1.442695, %v2930_v12 }
 0xaed   :  { %5229 = vpow2.f32 %v2934_v29  ;;  %v2944_v33 = vmul.f32 1.442695, %v2931_v58 }
 0xaee   :  { %5231 = vpow2.f32 %v2936_v28  ;;  %v2932_v60 = vsub.f32 %v7648_v11, %v2913_v32 }
 0xaef   :  { %5233 = vpow2.f32 %v2948_v25 }
 0xaf0   :  { %5235 = vpow2.f32 %v2938_v41  ;;  %v2946_v4 = vmul.f32 1.442695, %v2932_v60 }
 0xaf1   :  { %5237 = vpow2.f32 %v2940_v49 }
 0xaf2   :  { %5239 = vpow2.f32 %v2942_v27 }
 0xaf3   :  { %5241 = vpow2.f32 %v2944_v33 }
 0xaf4   :  { %5243 = vpow2.f32 %v2946_v4 }
 0xafa   :  { %v5230_v43 = vpop.eup %5229 }
 0xafb   :  { %2959 = vperm.xlu1 %5068, %v5230_v43   ;;  %v5232_v6 = vpop.eup %5231 }
 0xafc   :  { %v7685_v55 = vpop.eup %5233 }
 0xafd   :  { %v5236_v39 = vpop.eup %5235  ;;  %2980 = vperm.xlu0 %5067, %v7685_v55  }
 0xafe   :  { %v5238_v14 = vpop.eup %5237 }
 0xaff   :  { %2962 = vperm.xlu1 %5068, %v5232_v6   ;;  %v5240_v45 = vpop.eup %5239 }
 0xb00   :  { %v7688_v42 = vpop.eup %5241 }
 0xb01   :  { %v7691_v11 = vpop.eup %5243 }
 0xb03   :  { %2965 = vperm.xlu1 %5068, %v5236_v39  }
 0xb07   :  { %2968 = vperm.xlu1 %5068, %v5238_v14  }
 0xb0b   :  { %2971 = vperm.xlu1 %5068, %v5240_v45  }
 0xb0f   :  { %2974 = vperm.xlu1 %5068, %v7688_v42  }
 0xb13   :  { %2977 = vperm.xlu1 %5068, %v7691_v11  }
 0xb76   :  { %v2960_v63 = vpop.permute.xlu1 %2959 }
 0xb77   :  { %v2985_v10 = vrot.slane %v2960_v63, %v7641_v52 }
 0xb78   :  { %v2981_v61 = vpop.permute.xlu0 %2980 }
 0xb79   :  { %v3013_v40 = vrot.slane %v2981_v61, %v7641_v52  ;;  %v3239_v61 = vld [vmem:[#allocation7 + $0x60] sm:$0xff] }
 0xb7a   :  { %v2963_v5 = vpop.permute.xlu1 %2962 }
 0xb7b   :  { %v2989_v13 = vrot.slane %v2963_v5, %v7641_v52 }
 0xb7d   :  { %v3014_v30 = vsel %vm2866_vm1, %v2989_v13, %v2985_v10  ;;  %v3274_v10 = vld [vmem:[#allocation8 + $0x70] sm:$0xff] }
 0xb7e   :  { %v2966_v3 = vpop.permute.xlu1 %2965 }
 0xb7f   :  { %v2993_v0 = vrot.slane %v2966_v3, %v7641_v52 }
 0xb81   :  { %v3015_v28 = vsel %vm2868_vm2, %v2993_v0, %v3014_v30  ;;  %v3258_v0 = vld [vmem:[#allocation7 + $0xf8] sm:$0xff]  ;;  %v3255_v30 = vld [vmem:[#allocation7 + $0xe0] sm:$0xff] }
 0xb82   :  { %v2969_v50 = vpop.permute.xlu1 %2968  ;;  %4328 = vmatprep.subr.mxu0 %v3258_v0  ;;  %v3266_v0 = vld [vmem:[#allocation8 + $0x30] sm:$0xff] }
 0xb83   :  { %v2997_v24 = vrot.slane %v2969_v50, %v7641_v52 }
 0xb85   :  { %v3016_v25 = vsel %vm2870_vm3, %v2997_v24, %v3015_v28  ;;  %v3289_v24 = vld [vmem:[#allocation8 + $0xe8] sm:$0xff]  ;;  %v3272_v28 = vld [vmem:[#allocation8 + $0x60] sm:$0xff] }
 0xb86   :  { %v2972_v21 = vpop.permute.xlu1 %2971 }
 0xb87   :  { %v3001_v29 = vrot.slane %v2972_v21, %v7641_v52 }
 0xb89   :  { %v3017_v26 = vsel %vm2872_vm4, %v3001_v29, %v3016_v25  ;;  %v3273_v29 = vld [vmem:[#allocation8 + $0x68] sm:$0xff]  ;;  %v3254_v25 = vld [vmem:[#allocation7 + $0xd8] sm:$0xff] }
 0xb8a   :  { %v2975_v15 = vpop.permute.xlu1 %2974 }
 0xb8b   :  { %v3005_v1 = vrot.slane %v2975_v15, %v7641_v52  ;;  %v3240_v15 = vld [vmem:[#allocation7 + $0x68] sm:$0xff] }
 0xb8d   :  { %v3018_v12 = vsel %vm2874_vm5, %v3005_v1, %v3017_v26  ;;  %v3288_v1 = vld [vmem:[#allocation8 + $0xe0] sm:$0xff]  ;;  %v3238_v26 = vld [vmem:[#allocation7 + $0x58] sm:$0xff] }
 0xb8e   :  { %v2978_v59 = vpop.permute.xlu1 %2977 }
 0xb8f   :  { %v3009_v41 = vrot.slane %v2978_v59, %v7641_v52  ;;  %v3287_v59 = vld [vmem:[#allocation8 + $0xd8] sm:$0xff] }
 0xb91   :  { %v3019_v49 = vsel %vm2876_vm6, %v3009_v41, %v3018_v12  ;;  %v3271_v41 = vld [vmem:[#allocation8 + $0x58] sm:$0xff]  ;;  %v3286_v12 = vld [vmem:[#allocation8 + $0xd0] sm:$0xff] }
 0xb92   :  { %v3020_v32 = vsel %vm2878_vm7, %v3013_v40, %v3019_v49  ;;  %v3253_v40 = vld [vmem:[#allocation7 + $0xd0] sm:$0xff] }
 0xb93   :  { %v3022_v58 = vsel %vm2881_vm8, %v3020_v32, 0.0  ;;  %v3237_v49 = vld [vmem:[#allocation7 + $0x50] sm:$0xff] }
 0xb94   :  { %3023 = vadd.xlane.f32.xlu1 %v3022_v58  ;;  %v3270_v32 = vld [vmem:[#allocation8 + $0x50] sm:$0xff]  ;;  %v3252_v58 = vld [vmem:[#allocation7 + $0xc8] sm:$0xff] }
 0xc1d   :  { %v3024_v27 = vpop.xlane.xlu1 %3023 }
 0xc1e   :  { %5245 = vrcp.f32 %v3024_v27  ;;  %v3285_v27 = vld [vmem:[#allocation8 + $0xc8] sm:$0xff] }
 0xc2b   :  { %v5246_v60 = vpop.eup %5245 }
 0xc2c   :  { %v3030_v33 = vrot.slane %v5246_v60, %v8099_v34  ;;  %v3034_v63 = vrot.slane %v5246_v60, %v8104_v62  ;;  %v3038_v52 = vrot.slane %v5246_v60, %v8105_v53  ;;  %v3042_v50 = vrot.slane %v5246_v60, %v2900_v47  ;;  %v3291_v34 = vld [vmem:[#allocation8 + $0xf8] sm:$0xff]  ;;  %v3290_v47 = vld [vmem:[#allocation8 + $0xf0] sm:$0xff] }
 0xc2d   :  { %v3046_v13 = vrot.slane %v5246_v60, %v2904_v31  ;;  %v3050_v62 = vrot.slane %v5246_v60, %v2908_v17  ;;  %4363 = vmatprep.subr.mxu1 %v3291_v34  ;;  %v3242_v53 = vld [vmem:[#allocation7 + $0x78] sm:$0xff]  ;;  %v3256_v31 = vld [vmem:[#allocation7 + $0xe8] sm:$0xff]  ;;  %v3054_v17 = vrot.slane %v5246_v60, %v2912_v44  ;;  %v3058_v44 = vrot.slane %v5246_v60, %v2916_v2  ;;  %v3251_v60 = vld [vmem:[#allocation7 + $0xc0] sm:$0xff] }
 0xc2e   :  { %v3067_v4 = vmul.f32 %v5230_v43, %v3030_v33  ;;  %v3068_v5 = vmul.f32 %v5232_v6, %v3034_v63  ;;  %v3069_v3 = vmul.f32 %v5236_v39, %v3038_v52  ;;  %v3070_v21 = vmul.f32 %v5238_v14, %v3042_v50  ;;  %v3275_v6 = vld [vmem:[#allocation8 + $0x78] sm:$0xff]  ;;  %4329 = vmatpush3.msra.mxu0 %v3242_v53  ;;  %v3257_v39 = vld [vmem:[#allocation7 + $0xf0] sm:$0xff]  ;;  %v3269_v2 = vld [vmem:[#allocation8 + $0x48] sm:$0xff] }
 0xc2f   :  { %v3071_v43 = vmul.f32 %v5240_v45, %v3046_v13  ;;  %4364 = vmatpush3.msra.mxu1 %v3275_v6  ;;  %4330 = vmatprep.subr.mxu0 %v3257_v39  ;;  %v3241_v14 = vld [vmem:[#allocation7 + $0x70] sm:$0xff]  ;;  %v3072_v45 = vmul.f32 %v7688_v42, %v3050_v62  ;;  %v3073_v42 = vmul.f32 %v7691_v11, %v3054_v17  ;;  %v3284_v33 = vld [vmem:[#allocation8 + $0xc0] sm:$0xff]  ;;  %v3283_v52 = vld [vmem:[#allocation8 + $0xb8] sm:$0xff] }
 0xc30   :  { %3077 = vperm.xlu0 %5067, %v3067_v4   ;;  %4365 = vmatprep.subr.mxu1 %v3290_v47  ;;  %v3074_v11 = vmul.f32 %v7685_v55, %v3058_v44  ;;  %v3235_v4 = vld [vmem:[#allocation7 + $0x40] sm:$0xff]  ;;  %v3267_v55 = vld [vmem:[#allocation8 + $0x38] sm:$0xff]  ;;  %v3249_v50 = vld [vmem:[#allocation7 + $0xb0] sm:$0xff] }
 0xc31   :  { %4331 = vmatpush3.msra.mxu0 %v3241_v14  ;;  %4366 = vmatpush3.msra.mxu1 %v3274_v10  ;;  %v3268_v63 = vld [vmem:[#allocation8 + $0x40] sm:$0xff]  ;;  %v3233_v13 = vld [vmem:[#allocation7 + $0x30] sm:$0xff]  ;;  %v3248_v34 = vld [vmem:[#allocation7 + $0xa8] sm:$0xff] }
 0xc32   :  { %4332 = vmatprep.subr.mxu0 %v3256_v31  ;;  %4367 = vmatprep.subr.mxu1 %v3289_v24  ;;  %v3232_v62 = vld [vmem:[#allocation7 + $0x28] sm:$0xff]  ;;  %v3247_v6 = vld [vmem:[#allocation7 + $0xa0] sm:$0xff]  ;;  %v3246_v10 = vld [vmem:[#allocation7 + $0x98] sm:$0xff] }
 0xc33   :  { %4333 = vmatpush3.msra.mxu0 %v3240_v15  ;;  %4368 = vmatpush3.msra.mxu1 %v3273_v29  ;;  %v3265_v53 = vld [vmem:[#allocation8 + $0x28] sm:$0xff]  ;;  %v3280_v39 = vld [vmem:[#allocation8 + $0xa0] sm:$0xff]  ;;  %v3279_v31 = vld [vmem:[#allocation8 + $0x98] sm:$0xff] }
 0xc34   :  { %3082 = vperm.xlu0 %5067, %v3068_v5   ;;  %4334 = vmatprep.subr.mxu0 %v3255_v30  ;;  %v3250_v5 = vld [vmem:[#allocation7 + $0xb8] sm:$0xff]  ;;  %v3231_v47 = vld [vmem:[#allocation7 + $0x20] sm:$0xff]  ;;  %v3245_v17 = vld [vmem:[#allocation7 + $0x90] sm:$0xff] }
 0xc35   :  { %4369 = vmatprep.subr.mxu1 %v3288_v1  ;;  %4335 = vmatpush3.msra.mxu0 %v3239_v61  ;;  %v3264_v14 = vld [vmem:[#allocation8 + $0x20] sm:$0xff]  ;;  %v3230_v24 = vld [vmem:[#allocation7 + $0x18] sm:$0xff]  ;;  %v3278_v15 = vld [vmem:[#allocation8 + $0x90] sm:$0xff] }
 0xc36   :  { %4370 = vmatpush3.msra.mxu1 %v3272_v28  ;;  %4336 = vmatprep.subr.mxu0 %v3254_v25  ;;  %v3229_v29 = vld [vmem:[#allocation7 + $0x10] sm:$0xff]  ;;  %v3244_v1 = vld [vmem:[#allocation7 + $0x88] sm:$0xff]  ;;  %v3227_v44 = vld [vmem:[#allocation7] sm:$0xff] }
 0xc37   :  { %4371 = vmatprep.subr.mxu1 %v3287_v59  ;;  %4337 = vmatpush3.msra.mxu0 %v3238_v26  ;;  %v3262_v30 = vld [vmem:[#allocation8 + $0x10] sm:$0xff]  ;;  %v3277_v61 = vld [vmem:[#allocation8 + $0x88] sm:$0xff]  ;;  %v3243_v59 = vld [vmem:[#allocation7 + $0x80] sm:$0xff] }
 0xc38   :  { %3087 = vperm.xlu0 %5067, %v3069_v3   ;;  %4372 = vmatpush3.msra.mxu1 %v3271_v41  ;;  %v3234_v3 = vld [vmem:[#allocation7 + $0x38] sm:$0xff]  ;;  %v3228_v28 = vld [vmem:[#allocation7 + $0x8] sm:$0xff]  ;;  %v3260_v26 = vld [vmem:[#allocation8] sm:$0xff] }
 0xc39   :  { %4338 = vmatprep.subr.mxu0 %v3253_v40  ;;  %4373 = vmatprep.subr.mxu1 %v3286_v12  ;;  %v3261_v25 = vld [vmem:[#allocation8 + $0x8] sm:$0xff] }
 0xc3a   :  { %4339 = vmatpush3.msra.mxu0 %v3237_v49  ;;  %4374 = vmatpush3.msra.mxu1 %v3270_v32 }
 0xc3b   :  { %4340 = vmatprep.subr.mxu0 %v3252_v58  ;;  %4375 = vmatprep.subr.mxu1 %v3285_v27 }
 0xc3c   :  { %3092 = vperm.xlu0 %5067, %v3070_v21   ;;  %4341 = vmatpush3.msra.mxu0 %v3236_v56  ;;  %v3282_v21 = vld [vmem:[#allocation8 + $0xb0] sm:$0xff] }
 0xc3d   :  { %4376 = vmatpush3.msra.mxu1 %v3269_v2  ;;  %4342 = vmatprep.subr.mxu0 %v3251_v60 }
 0xc3e   :  { %4377 = vmatprep.subr.mxu1 %v3284_v33  ;;  %4343 = vmatpush3.msra.mxu0 %v3235_v4 }
 0xc3f   :  { %4378 = vmatpush3.msra.mxu1 %v3268_v63  ;;  %4344 = vmatprep.subr.mxu0 %v3250_v5 }
 0xc40   :  { %3097 = vperm.xlu0 %5067, %v3071_v43   ;;  %4379 = vmatprep.subr.mxu1 %v3283_v52  ;;  %v3281_v43 = vld [vmem:[#allocation8 + $0xa8] sm:$0xff] }
 0xc41   :  { %4345 = vmatpush3.msra.mxu0 %v3234_v3  ;;  %4380 = vmatpush3.msra.mxu1 %v3267_v55 }
 0xc42   :  { %4346 = vmatprep.subr.mxu0 %v3249_v50  ;;  %4381 = vmatprep.subr.mxu1 %v3282_v21 }
 0xc43   :  { %4347 = vmatpush3.msra.mxu0 %v3233_v13  ;;  %4382 = vmatpush3.msra.mxu1 %v3266_v0 }
 0xc44   :  { %3102 = vperm.xlu0 %5067, %v3072_v45   ;;  %4348 = vmatprep.subr.mxu0 %v3248_v34  ;;  %v3263_v45 = vld [vmem:[#allocation8 + $0x18] sm:$0xff] }
 0xc45   :  { %4383 = vmatprep.subr.mxu1 %v3281_v43  ;;  %4349 = vmatpush3.msra.mxu0 %v3232_v62 }
 0xc46   :  { %4384 = vmatpush3.msra.mxu1 %v3265_v53  ;;  %4350 = vmatprep.subr.mxu0 %v3247_v6 }
 0xc47   :  { %4385 = vmatprep.subr.mxu1 %v3280_v39  ;;  %4351 = vmatpush3.msra.mxu0 %v3231_v47 }
 0xc48   :  { %3107 = vperm.xlu0 %5067, %v3073_v42   ;;  %4386 = vmatpush3.msra.mxu1 %v3264_v14  ;;  %v3276_v42 = vld [vmem:[#allocation8 + $0x80] sm:$0xff] }
 0xc49   :  { %4352 = vmatprep.subr.mxu0 %v3246_v10  ;;  %4387 = vmatprep.subr.mxu1 %v3279_v31 }
 0xc4a   :  { %4353 = vmatpush3.msra.mxu0 %v3230_v24  ;;  %4388 = vmatpush3.msra.mxu1 %v3263_v45 }
 0xc4b   :  { %4354 = vmatprep.subr.mxu0 %v3245_v17  ;;  %4389 = vmatprep.subr.mxu1 %v3278_v15 }
 0xc4c   :  { %3112 = vperm.xlu0 %5067, %v3074_v11   ;;  %4355 = vmatpush3.msra.mxu0 %v3229_v29 }
 0xc4d   :  { %4390 = vmatpush3.msra.mxu1 %v3262_v30  ;;  %4356 = vmatprep.subr.mxu0 %v3244_v1 }
 0xc4e   :  { %4391 = vmatprep.subr.mxu1 %v3277_v61  ;;  %4357 = vmatpush3.msra.mxu0 %v3228_v28 }
 0xc4f   :  { %4392 = vmatpush3.msra.mxu1 %v3261_v25  ;;  %4358 = vmatprep.subr.mxu0 %v3243_v59 }
 0xc50   :  { %4393 = vmatprep.subr.mxu1 %v3276_v42  ;;  %4359 = vmatpush3.msra.mxu0 %v3227_v44 }
 0xc51   :  { %4394 = vmatpush3.msra.mxu1 %v3260_v26  ;;  %4877 = vmatprep.subr.mxu0 %v8044_v46 }
 0xc52   :  { %4912 = vmatprep.subr.mxu1 %v8044_v46 }
 0xcab   :  { %v3078_v41 = vpop.permute.xlu0 %3077 }
 0xcac   :  { %v3115_v40 = vmul.f32 %v3078_v41, %v7489_v35  ;;  %v3116_v12 = vmul.f32 %v3078_v41, %v7483_v37 }
 0xcae   :  { %v3131_v49 = vrot.slane %v3115_v40, 4  ;;  %v3137_v32 = vrot.slane %v3116_v12, 4 }
 0xcaf   :  { %v3083_v58 = vpop.permute.xlu0 %3082 }
 0xcb0   :  { %v3117_v27 = vmul.f32 %v3083_v58, %v7502_v19  ;;  %v3118_v11 = vmul.f32 %v3083_v58, %v7495_v16  ;;  %v3132_v56 = vadd.f32 %v3131_v49, %v3115_v40  ;;  %v3138_v2 = vadd.f32 %v3137_v32, %v3116_v12 }
 0xcb2   :  { %v3143_v60 = vrot.slane %v3117_v27, 4  ;;  %v3149_v33 = vrot.slane %v3118_v11, 4  ;;  %v3133_v52 = vrot.slane %v3132_v56, 2  ;;  %v3139_v35 = vrot.slane %v3138_v2, 2 }
 0xcb3   :  { %v3088_v4 = vpop.permute.xlu0 %3087 }
 0xcb4   :  { %v3119_v63 = vmul.f32 %v3088_v4, %v7512_v57  ;;  %v3120_v5 = vmul.f32 %v3088_v4, %v7507_v54  ;;  %v3144_v3 = vadd.f32 %v3143_v60, %v3117_v27  ;;  %v3150_v37 = vadd.f32 %v3149_v33, %v3118_v11 }
 0xcb5   :  { %v3134_v13 = vadd.f32 %v3133_v52, %v3132_v56  ;;  %v3140_v0 = vadd.f32 %v3139_v35, %v3138_v2 }
 0xcb6   :  { %v3155_v50 = vrot.slane %v3119_v63, 4  ;;  %v3161_v21 = vrot.slane %v3120_v5, 4  ;;  %v3145_v34 = vrot.slane %v3144_v3, 2  ;;  %v3151_v43 = vrot.slane %v3150_v37, 2 }
 0xcb7   :  { %v3093_v55 = vpop.permute.xlu0 %3092  ;;  %v3141_v45 = vrot.slane %v3140_v0, 1 }
 0xcb8   :  { %v3121_v19 = vmul.f32 %v3093_v55, %v7522_v20  ;;  %v3122_v16 = vmul.f32 %v3093_v55, %v7517_v18  ;;  %v3156_v39 = vadd.f32 %v3155_v50, %v3119_v63  ;;  %v3162_v47 = vadd.f32 %v3161_v21, %v3120_v5 }
 0xcb9   :  { %v3135_v20 = vrot.slane %v3134_v13, 1  ;;  %v3146_v18 = vadd.f32 %v3145_v34, %v3144_v3  ;;  %v3152_v17 = vadd.f32 %v3151_v43, %v3150_v37  ;;  %v3142_v26 = vadd.f32 %v3141_v45, %v3140_v0 }
 0xcba   :  { %v3167_v62 = vrot.slane %v3121_v19, 4  ;;  %v3173_v53 = vrot.slane %v3122_v16, 4  ;;  %v3163_v28 = vrot.slane %v3162_v47, 2 }
 0xcbb   :  { %v3098_v57 = vpop.permute.xlu0 %3097  ;;  %v3136_v44 = vadd.f32 %v3135_v20, %v3134_v13  ;;  %v3147_v41 = vrot.slane %v3146_v18, 1  ;;  %v3153_v40 = vrot.slane %v3152_v17, 1 }
 0xcbc   :  { %v3123_v54 = vmul.f32 %v3098_v57, %v7532_v8  ;;  %v3124_v6 = vmul.f32 %v3098_v57, %v7527_v7  ;;  %v3168_v14 = vadd.f32 %v3167_v62, %v3121_v19  ;;  %v3174_v10 = vadd.f32 %v3173_v53, %v3122_v16 }
 0xcbd   :  { %v3157_v8 = vrot.slane %v3156_v39, 2  ;;  %v3164_v56 = vadd.f32 %v3163_v28, %v3162_v47  ;;  %v3148_v63 = vadd.f32 %v3147_v41, %v3146_v18  ;;  %v3154_v5 = vadd.f32 %v3153_v40, %v3152_v17 }
 0xcbe   :  { %v3179_v31 = vrot.slane %v3123_v54, 4  ;;  %v3185_v24 = vrot.slane %v3124_v6, 4  ;;  %v3169_v7 = vrot.slane %v3168_v14, 2  ;;  %v3175_v25 = vrot.slane %v3174_v10, 2 }
 0xcbf   :  { %v3103_v15 = vpop.permute.xlu0 %3102  ;;  %v3158_v11 = vadd.f32 %v3157_v8, %v3156_v39  ;;  %v3165_v0 = vrot.slane %v3164_v56, 1 }
 0xcc0   :  { %v3180_v29 = vadd.f32 %v3179_v31, %v3123_v54  ;;  %v3186_v30 = vadd.f32 %v3185_v24, %v3124_v6  ;;  %v3125_v1 = vmul.f32 %v3103_v15, %v7542_v48  ;;  %v3126_v61 = vmul.f32 %v3103_v15, %v7537_v9 }
 0xcc1   :  { %v3170_v2 = vadd.f32 %v3169_v7, %v3168_v14  ;;  %v3176_v60 = vadd.f32 %v3175_v25, %v3174_v10 }
 0xcc2   :  { %v3191_v59 = vrot.slane %v3125_v1, 4  ;;  %v3197_v42 = vrot.slane %v3126_v61, 4  ;;  %v3181_v49 = vrot.slane %v3180_v29, 2  ;;  %v3187_v32 = vrot.slane %v3186_v30, 2 }
 0xcc3   :  { %v3108_v12 = vpop.permute.xlu0 %3107  ;;  %v3171_v34 = vrot.slane %v3170_v2, 1  ;;  %v3177_v43 = vrot.slane %v3176_v60, 1 }
 0xcc4   :  { %v3192_v58 = vadd.f32 %v3191_v59, %v3125_v1  ;;  %v3198_v27 = vadd.f32 %v3197_v42, %v3126_v61  ;;  %v3127_v48 = vmul.f32 %v3108_v12, %v7552_v51  ;;  %v3128_v9 = vmul.f32 %v3108_v12, %v7547_v22 }
 0xcc5   :  { %v3182_v37 = vadd.f32 %v3181_v49, %v3180_v29  ;;  %v3188_v55 = vadd.f32 %v3187_v32, %v3186_v30  ;;  %v3159_v22 = vrot.slane %v3158_v11, 1  ;;  %v3172_v18 = vadd.f32 %v3171_v34, %v3170_v2  ;;  %v3493_v34 = vld [vmem:[#allocation10 + $0x40] sm:$0xff] }
 0xcc6   :  { %v3193_v33 = vrot.slane %v3192_v58, 2  ;;  %v3199_v4 = vrot.slane %v3198_v27, 2  ;;  %v3203_v52 = vrot.slane %v3127_v48, 4  ;;  %v3209_v35 = vrot.slane %v3128_v9, 4 }
 0xcc7   :  { %v3113_v3 = vpop.permute.xlu0 %3112  ;;  %v3183_v6 = vrot.slane %v3182_v37, 1  ;;  %v3189_v39 = vrot.slane %v3188_v55, 1  ;;  %v3160_v45 = vadd.f32 %v3159_v22, %v3158_v11  ;;  %v3315_v1 = vsel %vm2866_vm1, %v3148_v63, %v3136_v44  ;;  %v3494_v22 = vld [vmem:[#allocation10 + $0x48] sm:$0xff] }
 0xcc8   :  { %v3194_v50 = vadd.f32 %v3193_v33, %v3192_v58  ;;  %v3200_v21 = vadd.f32 %v3199_v4, %v3198_v27  ;;  %v3204_v19 = vadd.f32 %v3203_v52, %v3127_v48  ;;  %v3210_v16 = vadd.f32 %v3209_v35, %v3128_v9  ;;  %v3517_v52 = vld [vmem:[#allocation11 + $0x78] sm:$0xff]  ;;  %v3499_v35 = vld [vmem:[#allocation10 + $0x70] sm:$0xff] }
 0xcc9   :  { %v3129_v13 = vmul.f32 %v3113_v3, %v7562_v36  ;;  %v3130_v51 = vmul.f32 %v3113_v3, %v7557_v38  ;;  %v3166_v36 = vadd.f32 %v3165_v0, %v3164_v56  ;;  %v3178_v38 = vadd.f32 %v3177_v43, %v3176_v60  ;;  %v3516_v3 = vld [vmem:[#allocation11 + $0x70] sm:$0xff]  ;;  %v3511_v0 = vld [vmem:[#allocation11 + $0x48] sm:$0xff]  ;;  %v3510_v43 = vld [vmem:[#allocation11 + $0x40] sm:$0xff] }
 0xcca   :  { %v3205_v62 = vrot.slane %v3204_v19, 2  ;;  %v3211_v53 = vrot.slane %v3210_v16, 2  ;;  %v3195_v47 = vrot.slane %v3194_v50, 1  ;;  %v3201_v14 = vrot.slane %v3200_v21, 1 }
 0xccb   :  { %v3215_v57 = vrot.slane %v3129_v13, 4  ;;  %v3221_v54 = vrot.slane %v3130_v51, 4  ;;  %v3322_v61 = vsel %vm2866_vm1, %v3154_v5, %v3142_v26  ;;  %v3184_v8 = vadd.f32 %v3183_v6, %v3182_v37  ;;  %v3500_v5 = vld [vmem:[#allocation10 + $0x78] sm:$0xff]  ;;  %v3498_v37 = vld [vmem:[#allocation10 + $0x68] sm:$0xff] }
 0xccc   :  { %v3206_v10 = vadd.f32 %v3205_v62, %v3204_v19  ;;  %v3212_v31 = vadd.f32 %v3211_v53, %v3210_v16  ;;  %v3190_v28 = vadd.f32 %v3189_v39, %v3188_v55  ;;  %v3196_v7 = vadd.f32 %v3195_v47, %v3194_v50  ;;  %v3515_v55 = vld [vmem:[#allocation11 + $0x68] sm:$0xff]  ;;  %v3497_v50 = vld [vmem:[#allocation10 + $0x60] sm:$0xff]  ;;  %v3496_v19 = vld [vmem:[#allocation10 + $0x58] sm:$0xff] }
 0xccd   :  { %v3216_v24 = vadd.f32 %v3215_v57, %v3129_v13  ;;  %v3222_v20 = vadd.f32 %v3221_v54, %v3130_v51  ;;  %v3202_v25 = vadd.f32 %v3201_v14, %v3200_v21  ;;  %v3316_v41 = vsel %vm2868_vm2, %v3160_v45, %v3315_v1  ;;  %v3514_v21 = vld [vmem:[#allocation11 + $0x60] sm:$0xff]  ;;  %v3513_v16 = vld [vmem:[#allocation11 + $0x58] sm:$0xff]  ;;  %v3495_v13 = vld [vmem:[#allocation10 + $0x50] sm:$0xff] }
 0xcce   :  { %v3207_v17 = vrot.slane %v3206_v10, 1  ;;  %v3213_v15 = vrot.slane %v3212_v31, 1  ;;  %v3323_v40 = vsel %vm2868_vm2, %v3166_v36, %v3322_v61  ;;  %v3317_v32 = vsel %vm2870_vm3, %v3172_v18, %v3316_v41  ;;  %v3512_v51 = vld [vmem:[#allocation11 + $0x50] sm:$0xff]  ;;  %v3492_v62 = vld [vmem:[#allocation10 + $0x38] sm:$0xff]  ;;  %v3490_v6 = vld [vmem:[#allocation10 + $0x28] sm:$0xff] }
 0xccf   :  { %v3217_v29 = vrot.slane %v3216_v24, 2  ;;  %v3223_v30 = vrot.slane %v3222_v20, 2  ;;  %v3324_v44 = vsel %vm2870_vm3, %v3178_v38, %v3323_v40  ;;  %v3318_v26 = vsel %vm2872_vm4, %v3184_v8, %v3317_v32  ;;  %v3509_v53 = vld [vmem:[#allocation11 + $0x38] sm:$0xff]  ;;  %v3491_v57 = vld [vmem:[#allocation10 + $0x30] sm:$0xff]  ;;  %v3507_v39 = vld [vmem:[#allocation11 + $0x28] sm:$0xff] }
 0xcd0   :  { %v3208_v12 = vadd.f32 %v3207_v17, %v3206_v10  ;;  %v3214_v49 = vadd.f32 %v3213_v15, %v3212_v31  ;;  %v3325_v11 = vsel %vm2872_vm4, %v3190_v28, %v3324_v44  ;;  %v3319_v2 = vsel %vm2874_vm5, %v3196_v7, %v3318_v26  ;;  %v3508_v54 = vld [vmem:[#allocation11 + $0x30] sm:$0xff]  ;;  %v3489_v47 = vld [vmem:[#allocation10 + $0x20] sm:$0xff]  ;;  %v3488_v10 = vld [vmem:[#allocation10 + $0x18] sm:$0xff] }
 0xcd1   :  { %v3218_v59 = vadd.f32 %v3217_v29, %v3216_v24  ;;  %v3224_v42 = vadd.f32 %v3223_v30, %v3222_v20  ;;  %v3326_v9 = vsel %vm2874_vm5, %v3202_v25, %v3325_v11  ;;  %v3506_v14 = vld [vmem:[#allocation11 + $0x20] sm:$0xff]  ;;  %v3505_v31 = vld [vmem:[#allocation11 + $0x18] sm:$0xff]  ;;  %v3487_v24 = vld [vmem:[#allocation10 + $0x10] sm:$0xff] }
 0xcd2   :  { %v3327_v60 = vsel %vm2876_vm6, %v3214_v49, %v3326_v9  ;;  %v3320_v33 = vsel %vm2876_vm6, %v3208_v12, %v3319_v2  ;;  %v3504_v20 = vld [vmem:[#allocation11 + $0x10] sm:$0xff]  ;;  %v3486_v45 = vld [vmem:[#allocation10 + $0x8] sm:$0xff]  ;;  %v3485_v18 = vld [vmem:[#allocation10] sm:$0xff] }
 0xcd3   :  { %v3219_v58 = vrot.slane %v3218_v59, 1  ;;  %v3225_v27 = vrot.slane %v3224_v42, 1  ;;  %v3503_v36 = vld [vmem:[#allocation11 + $0x8] sm:$0xff]  ;;  %v3502_v38 = vld [vmem:[#allocation11] sm:$0xff]  ;;  %v3694_v29 = vld [vmem:[#allocation14 + $0x70] sm:$0xff] }
 0xcd4   :  { %v3695_v17 = vld [vmem:[#allocation14 + $0x78] sm:$0xff]  ;;  %v3693_v30 = vld [vmem:[#allocation14 + $0x68] sm:$0xff]  ;;  %v3692_v61 = vld [vmem:[#allocation14 + $0x60] sm:$0xff] }
 0xcd5   :  { %v3220_v56 = vadd.f32 %v3219_v58, %v3218_v59  ;;  %v3226_v48 = vadd.f32 %v3225_v27, %v3224_v42  ;;  %v3712_v15 = vld [vmem:[#allocation16 + $0x78] sm:$0xff]  ;;  %v3710_v1 = vld [vmem:[#allocation16 + $0x68] sm:$0xff]  ;;  %v3709_v8 = vld [vmem:[#allocation16 + $0x60] sm:$0xff] }
 0xcd6   :  { %v3691_v28 = vld [vmem:[#allocation14 + $0x58] sm:$0xff]  ;;  %v3690_v25 = vld [vmem:[#allocation14 + $0x50] sm:$0xff]  ;;  %v3689_v42 = vld [vmem:[#allocation14 + $0x48] sm:$0xff] }
 0xcd7   :  { %v3328_v4 = vsel %vm2878_vm7, %v3226_v48, %v3327_v60  ;;  %v3321_v63 = vsel %vm2878_vm7, %v3220_v56, %v3320_v33  ;;  %v3708_v7 = vld [vmem:[#allocation16 + $0x58] sm:$0xff]  ;;  %v3707_v59 = vld [vmem:[#allocation16 + $0x50] sm:$0xff]  ;;  %v3706_v41 = vld [vmem:[#allocation16 + $0x48] sm:$0xff] }
 0xcd8   :  { %3395 = vmatprep.mubr.f32.mxu0 %v3328_v4  ;;  %3471 = vmatprep.mubr.f32.mxu1 %v3328_v4  ;;  %v3688_v40 = vld [vmem:[#allocation14 + $0x40] sm:$0xff]  ;;  %v3687_v49 = vld [vmem:[#allocation14 + $0x38] sm:$0xff]  ;;  %v3686_v58 = vld [vmem:[#allocation14 + $0x30] sm:$0xff] }
 0xcd9   :  { %3396 = vmatmul.mubr.f32.vlgmr.msra.gmra.mxu0 %v3321_v63  ;;  %3472 = vmatmul.mubr.f32.vlgmr.msra.gmra.mxu1 %v3321_v63  ;;  %v3705_v12 = vld [vmem:[#allocation16 + $0x40] sm:$0xff]  ;;  %v3704_v32 = vld [vmem:[#allocation16 + $0x38] sm:$0xff]  ;;  %v3703_v27 = vld [vmem:[#allocation16 + $0x30] sm:$0xff] }
 0xcda   :  { %4878 = vmatpush3.msra.mxu0 %v3500_v5  ;;  %4913 = vmatpush3.msra.mxu1 %v3517_v52  ;;  %v3685_v44 = vld [vmem:[#allocation14 + $0x28] sm:$0xff]  ;;  %v3684_v11 = vld [vmem:[#allocation14 + $0x20] sm:$0xff]  ;;  %v3683_v48 = vld [vmem:[#allocation14 + $0x18] sm:$0xff] }
 0xcdb   :  { %4879 = vmatprep.subr.mxu0 %v8044_v46  ;;  %4914 = vmatprep.subr.mxu1 %v8044_v46  ;;  %v3702_v26 = vld [vmem:[#allocation16 + $0x28] sm:$0xff]  ;;  %v3701_v56 = vld [vmem:[#allocation16 + $0x20] sm:$0xff]  ;;  %v3700_v9 = vld [vmem:[#allocation16 + $0x18] sm:$0xff] }
 0xcdc   :  { %4880 = vmatpush3.msra.mxu0 %v3499_v35  ;;  %4915 = vmatpush3.msra.mxu1 %v3516_v3  ;;  %v3682_v2 = vld [vmem:[#allocation14 + $0x10] sm:$0xff]  ;;  %v3681_v33 = vld [vmem:[#allocation14 + $0x8] sm:$0xff]  ;;  %v3680_v63 = vld [vmem:[#allocation14] sm:$0xff] }
 0xcdd   :  { %4881 = vmatprep.subr.mxu0 %v8044_v46  ;;  %4916 = vmatprep.subr.mxu1 %v8044_v46  ;;  %v3699_v60 = vld [vmem:[#allocation16 + $0x10] sm:$0xff]  ;;  %v3698_v4 = vld [vmem:[#allocation16 + $0x8] sm:$0xff]  ;;  %v3697_v5 = vld [vmem:[#allocation16] sm:$0xff] }
 0xcde   :  { %4882 = vmatpush3.msra.mxu0 %v3498_v37  ;;  %4917 = vmatpush3.msra.mxu1 %v3515_v55  ;;  %v4012_v37 = vld [vmem:[%s7934_s17] ss:$0 sm:$0xff] }
 0xcdf   :  { %4883 = vmatprep.subr.mxu0 %v8044_v46  ;;  %4918 = vmatprep.subr.mxu1 %v8044_v46 }
 0xce0   :  { %4884 = vmatpush3.msra.mxu0 %v3497_v50  ;;  %4919 = vmatpush3.msra.mxu1 %v3514_v21 }
 0xce1   :  { %4885 = vmatprep.subr.mxu0 %v8044_v46  ;;  %4920 = vmatprep.subr.mxu1 %v8044_v46 }
 0xce2   :  { %4886 = vmatpush3.msra.mxu0 %v3496_v19  ;;  %4921 = vmatpush3.msra.mxu1 %v3513_v16  ;;  %v4015_v16 = vld [vmem:[#allocation13] ss:$0 sm:$0xff] }
 0xce3   :  { %4887 = vmatprep.subr.mxu0 %v8044_v46  ;;  %4922 = vmatprep.subr.mxu1 %v8044_v46 }
 0xce4   :  { %4888 = vmatpush3.msra.mxu0 %v3495_v13  ;;  %4923 = vmatpush3.msra.mxu1 %v3512_v51 }
 0xce5   :  { %4889 = vmatprep.subr.mxu0 %v8044_v46  ;;  %4924 = vmatprep.subr.mxu1 %v8044_v46 }
 0xce6   :  { %4890 = vmatpush3.msra.mxu0 %v3494_v22  ;;  %4925 = vmatpush3.msra.mxu1 %v3511_v0 }
 0xce7   :  { %4891 = vmatprep.subr.mxu0 %v8044_v46  ;;  %4926 = vmatprep.subr.mxu1 %v8044_v46 }
 0xce8   :  { %4892 = vmatpush3.msra.mxu0 %v3493_v34  ;;  %4927 = vmatpush3.msra.mxu1 %v3510_v43 }
 0xce9   :  { %4893 = vmatprep.subr.mxu0 %v8044_v46  ;;  %4928 = vmatprep.subr.mxu1 %v8044_v46 }
 0xcea   :  { %4894 = vmatpush3.msra.mxu0 %v3492_v62  ;;  %4929 = vmatpush3.msra.mxu1 %v3509_v53  ;;  %v4011_v53 = vld [vmem:[%s7932_s15] ss:$0 sm:$0xff] }
 0xceb   :  { %4895 = vmatprep.subr.mxu0 %v8044_v46  ;;  %4930 = vmatprep.subr.mxu1 %v8044_v46 }
 0xcec   :  { %4896 = vmatpush3.msra.mxu0 %v3491_v57  ;;  %4931 = vmatpush3.msra.mxu1 %v3508_v54  ;;  %v4014_v54 = vld [vmem:[%s7936_s19] ss:$0 sm:$0xff] }
 0xced   :  { %4897 = vmatprep.subr.mxu0 %v8044_v46  ;;  %4932 = vmatprep.subr.mxu1 %v8044_v46 }
 0xcee   :  { %4898 = vmatpush3.msra.mxu0 %v3490_v6  ;;  %4933 = vmatpush3.msra.mxu1 %v3507_v39 }
 0xcef   :  { %4899 = vmatprep.subr.mxu0 %v8044_v46  ;;  %4934 = vmatprep.subr.mxu1 %v8044_v46 }
 0xcf0   :  { %4900 = vmatpush3.msra.mxu0 %v3489_v47  ;;  %4935 = vmatpush3.msra.mxu1 %v3506_v14 }
 0xcf1   :  { %4901 = vmatprep.subr.mxu0 %v8044_v46  ;;  %4936 = vmatprep.subr.mxu1 %v8044_v46 }
 0xcf2   :  { %4902 = vmatpush3.msra.mxu0 %v3488_v10  ;;  %4937 = vmatpush3.msra.mxu1 %v3505_v31 }
 0xcf3   :  { %4903 = vmatprep.subr.mxu0 %v8044_v46  ;;  %4938 = vmatprep.subr.mxu1 %v8044_v46 }
 0xcf4   :  { %4904 = vmatpush3.msra.mxu0 %v3487_v24  ;;  %4939 = vmatpush3.msra.mxu1 %v3504_v20 }
 0xcf5   :  { %4905 = vmatprep.subr.mxu0 %v8044_v46  ;;  %4940 = vmatprep.subr.mxu1 %v8044_v46 }
 0xcf6   :  { %4906 = vmatpush3.msra.mxu0 %v3486_v45  ;;  %4941 = vmatpush3.msra.mxu1 %v3503_v36 }
 0xcf7   :  { %4907 = vmatprep.subr.mxu0 %v8044_v46  ;;  %4942 = vmatprep.subr.mxu1 %v8044_v46 }
 0xcf8   :  { %4908 = vmatpush3.msra.mxu0 %v3485_v18  ;;  %4909 = vmatprep.mubr.msk.f32.mxu0 %vm5519_vm0, %v8044_v46 }
 0xcf9   :  { %4943 = vmatpush3.msra.mxu1 %v3502_v38  ;;  %4944 = vmatprep.mubr.msk.f32.mxu1 %vm5519_vm0, %v8044_v46 }
 0xcfa   :  { %4910 = vmatmul.mubr.f32.vlgmr.msra.gmra.mxu0 %v7204_v23  ;;  %4945 = vmatmul.mubr.f32.vlgmr.msra.gmra.mxu1 %v7204_v23  ;;  %v3711_v23 = vld [vmem:[#allocation16 + $0x70] sm:$0xff] }
 0xcfb   :  { %4947 = vmatprep.subr.mxu0 %v8044_v46  ;;  %4982 = vmatprep.subr.mxu1 %v8044_v46 }
 0xcfc   :  { %4979 = vmatprep.mubr.msk.f32.mxu0 %vm5519_vm0, %v8044_v46  ;;  %5014 = vmatprep.mubr.msk.f32.mxu1 %vm5519_vm0, %v8044_v46 }
 0xcfd   :  { %4948 = vmatpush3.msra.mxu0 %v3695_v17  ;;  %4983 = vmatpush3.msra.mxu1 %v3712_v15  ;;  %v3889_v17 = vld [vmem:[%s7943_s26 + $0x78] sm:$0xff]  ;;  %v3888_v15 = vld [vmem:[%s7943_s26 + $0x70] sm:$0xff] }
 0xcfe   :  { %4949 = vmatprep.subr.mxu0 %v8044_v46  ;;  %4984 = vmatprep.subr.mxu1 %v8044_v46 }
 0xcff   :  { %4950 = vmatpush3.msra.mxu0 %v3694_v29  ;;  %4985 = vmatpush3.msra.mxu1 %v3711_v23  ;;  %v3887_v29 = vld [vmem:[%s7943_s26 + $0x68] sm:$0xff]  ;;  %v3886_v23 = vld [vmem:[%s7943_s26 + $0x60] sm:$0xff] }
 0xd00   :  { %4951 = vmatprep.subr.mxu0 %v8044_v46  ;;  %4986 = vmatprep.subr.mxu1 %v8044_v46 }
 0xd01   :  { %4952 = vmatpush3.msra.mxu0 %v3693_v30  ;;  %4987 = vmatpush3.msra.mxu1 %v3710_v1  ;;  %v3885_v30 = vld [vmem:[%s7943_s26 + $0x58] sm:$0xff]  ;;  %v3884_v1 = vld [vmem:[%s7943_s26 + $0x50] sm:$0xff] }
 0xd02   :  { %4953 = vmatprep.subr.mxu0 %v8044_v46  ;;  %4988 = vmatprep.subr.mxu1 %v8044_v46 }
 0xd03   :  { %4954 = vmatpush3.msra.mxu0 %v3692_v61  ;;  %4989 = vmatpush3.msra.mxu1 %v3709_v8  ;;  %v3883_v61 = vld [vmem:[%s7943_s26 + $0x48] sm:$0xff]  ;;  %v3882_v8 = vld [vmem:[%s7943_s26 + $0x40] sm:$0xff] }
 0xd04   :  { %4955 = vmatprep.subr.mxu0 %v8044_v46  ;;  %4990 = vmatprep.subr.mxu1 %v8044_v46 }
 0xd05   :  { %4956 = vmatpush3.msra.mxu0 %v3691_v28  ;;  %4991 = vmatpush3.msra.mxu1 %v3708_v7  ;;  %v3881_v28 = vld [vmem:[%s7943_s26 + $0x38] sm:$0xff]  ;;  %v3880_v7 = vld [vmem:[%s7943_s26 + $0x30] sm:$0xff] }
 0xd06   :  { %4957 = vmatprep.subr.mxu0 %v8044_v46  ;;  %4992 = vmatprep.subr.mxu1 %v8044_v46 }
 0xd07   :  { %4958 = vmatpush3.msra.mxu0 %v3690_v25  ;;  %4993 = vmatpush3.msra.mxu1 %v3707_v59  ;;  %v3879_v25 = vld [vmem:[%s7943_s26 + $0x28] sm:$0xff]  ;;  %v3878_v59 = vld [vmem:[%s7943_s26 + $0x20] sm:$0xff] }
 0xd08   :  { %4959 = vmatprep.subr.mxu0 %v8044_v46  ;;  %4994 = vmatprep.subr.mxu1 %v8044_v46 }
 0xd09   :  { %4960 = vmatpush3.msra.mxu0 %v3689_v42  ;;  %4995 = vmatpush3.msra.mxu1 %v3706_v41  ;;  %v3877_v42 = vld [vmem:[%s7943_s26 + $0x18] sm:$0xff]  ;;  %v3876_v41 = vld [vmem:[%s7943_s26 + $0x10] sm:$0xff] }
 0xd0a   :  { %4961 = vmatprep.subr.mxu0 %v8044_v46  ;;  %4996 = vmatprep.subr.mxu1 %v8044_v46 }
 0xd0b   :  { %4962 = vmatpush3.msra.mxu0 %v3688_v40  ;;  %4997 = vmatpush3.msra.mxu1 %v3705_v12  ;;  %v3875_v40 = vld [vmem:[%s7943_s26 + $0x8] sm:$0xff]  ;;  %v3874_v12 = vld [vmem:[%s7943_s26] sm:$0xff] }
 0xd0c   :  { %4963 = vmatprep.subr.mxu0 %v8044_v46  ;;  %4998 = vmatprep.subr.mxu1 %v8044_v46 }
 0xd0d   :  { %4964 = vmatpush3.msra.mxu0 %v3687_v49  ;;  %4999 = vmatpush3.msra.mxu1 %v3704_v32  ;;  %v4018_v49 = vld [vmem:[%s7942_s25] ss:$0 sm:$0xff] }
 0xd0e   :  { %4965 = vmatprep.subr.mxu0 %v8044_v46  ;;  %5000 = vmatprep.subr.mxu1 %v8044_v46 }
 0xd0f   :  { %4966 = vmatpush3.msra.mxu0 %v3686_v58  ;;  %5001 = vmatpush3.msra.mxu1 %v3703_v27 }
 0xd10   :  { %4967 = vmatprep.subr.mxu0 %v8044_v46  ;;  %5002 = vmatprep.subr.mxu1 %v8044_v46 }
 0xd11   :  { %4968 = vmatpush3.msra.mxu0 %v3685_v44  ;;  %5003 = vmatpush3.msra.mxu1 %v3702_v26 }
 0xd12   :  { %4969 = vmatprep.subr.mxu0 %v8044_v46  ;;  %5004 = vmatprep.subr.mxu1 %v8044_v46 }
 0xd13   :  { %4970 = vmatpush3.msra.mxu0 %v3684_v11  ;;  %5005 = vmatpush3.msra.mxu1 %v3701_v56  ;;  %v4017_v56 = vld [vmem:[%s7940_s23] ss:$0 sm:$0xff] }
 0xd14   :  { %4971 = vmatprep.subr.mxu0 %v8044_v46  ;;  %5006 = vmatprep.subr.mxu1 %v8044_v46 }
 0xd15   :  { %4972 = vmatpush3.msra.mxu0 %v3683_v48  ;;  %5007 = vmatpush3.msra.mxu1 %v3700_v9 }
 0xd16   :  { %4973 = vmatprep.subr.mxu0 %v8044_v46  ;;  %5008 = vmatprep.subr.mxu1 %v8044_v46 }
 0xd17   :  { %4974 = vmatpush3.msra.mxu0 %v3682_v2  ;;  %5009 = vmatpush3.msra.mxu1 %v3699_v60 }
 0xd18   :  { %4975 = vmatprep.subr.mxu0 %v8044_v46  ;;  %5010 = vmatprep.subr.mxu1 %v8044_v46 }
 0xd19   :  { %4976 = vmatpush3.msra.mxu0 %v3681_v33  ;;  %5011 = vmatpush3.msra.mxu1 %v3698_v4  ;;  %v4020_v4 = vld [vmem:[%s7944_s27] ss:$0 sm:$0xff] }
 0xd1a   :  { %4977 = vmatprep.subr.mxu0 %v8044_v46  ;;  %5012 = vmatprep.subr.mxu1 %v8044_v46 }
 0xd1b   :  { %4978 = vmatpush3.msra.mxu0 %v3680_v63  ;;  %5013 = vmatpush3.msra.mxu1 %v3697_v5 }
 0xd1c   :  { %5017 = vmatprep.subr.mxu0 %v8044_v46 }
 0xd99   :  { %v4395_v52 = vpop.f32.mrf.mxu1  ;;  %v4360_v50 = vpop.f32.mrf.mxu0 }
 0xd9b   :  { %v4396_v35 = vpop.f32.mrf.mxu1  ;;  %v4361_v19 = vpop.f32.mrf.mxu0 }
 0xd9c   :  { %v4397_v3 = vadd.f32 %v4396_v35, %v4395_v52  ;;  %v4362_v62 = vadd.f32 %v4361_v19, %v4360_v50 }
 0xd9e   :  { %v3474_v55 = vadd.f32 %v4397_v3, %v4012_v37  ;;  %v3398_v6 = vadd.f32 %v4362_v62, %v4011_v53 }
 0xda0   :  { %v4013_v21 = vmul.f32 -1.442695, %v3474_v55 }
 0xda2   :  { %5247 = vpow2.f32 %v4013_v21 }
 0xdaf   :  { %v5248_v57 = vpop.eup %5247 }
 0xdb0   :  { %v3481_v39 = vadd.f32 1.0, %v5248_v57 }
 0xdba   :  { %v3591_v13 = vpop.f32.mrf.mxu0  ;;  %v3667_v51 = vpop.f32.mrf.mxu1 }
 0xdbb   :  { %v3668_v22 = vadd.f32 %v4015_v16, %v3667_v51  ;;  %v3592_v47 = vadd.f32 %v4014_v54, %v3591_v13 }
 0xdbc   :  { %v4911_v0 = vpop.f32.mrf.mxu0  ;;  %v4946_v34 = vpop.f32.mrf.mxu1 }
 0xdbd   :  { %v4016_v43 = vmul.f32 -1.442695, %v3668_v22 }
 0xdbf   :  { %5249 = vpow2.f32 %v4016_v43 }
 0xdc0   :  { %5251 = vtanh.f32 %v3398_v6 }
 0xdc1   :  { %5253 = vrcp.f32 %v3481_v39 }
 0xdc2   :  { %5255 = vtanh.f32 %v3592_v47 }
 0xdcc   :  { %v5250_v14 = vpop.eup %5249 }
 0xdcd   :  { %v3675_v10 = vadd.f32 1.0, %v5250_v14  ;;  %v5252_v31 = vpop.eup %5251 }
 0xdce   :  { %v5254_v24 = vpop.eup %5253 }
 0xdcf   :  { %5257 = vrcp.f32 %v3675_v10  ;;  %v5256_v20 = vpop.eup %5255  ;;  %v3484_v36 = vmul.f32 %v5254_v24, %v5252_v31 }
 0xddc   :  { %v5258_v45 = vpop.eup %5257 }
 0xddd   :  { %v3678_v18 = vmul.f32 %v5258_v45, %v5256_v20 }
 0xddf   :  { %v3679_v38 = vmul.f32 %v3678_v18, %v3484_v36 }
 0xde1   :  { %4980 = vmatmul.mubr.f32.vlgmr.msra.gmra.mxu0 %v3679_v38  ;;  %5015 = vmatmul.mubr.f32.vlgmr.msra.gmra.mxu1 %v3679_v38 }
 0xde2   :  { %5049 = vmatprep.mubr.msk.f32.mxu0 %vm5519_vm0, %v8044_v46  ;;  %5018 = vmatpush3.msra.mxu0 %v3889_v17 }
 0xde3   :  { %5019 = vmatprep.subr.mxu0 %v8044_v46 }
 0xde4   :  { %5020 = vmatpush3.msra.mxu0 %v3888_v15 }
 0xde5   :  { %5021 = vmatprep.subr.mxu0 %v8044_v46 }
 0xde6   :  { %5022 = vmatpush3.msra.mxu0 %v3887_v29 }
 0xde7   :  { %5023 = vmatprep.subr.mxu0 %v8044_v46 }
 0xde8   :  { %5024 = vmatpush3.msra.mxu0 %v3886_v23 }
 0xde9   :  { %5025 = vmatprep.subr.mxu0 %v8044_v46 }
 0xdea   :  { %5026 = vmatpush3.msra.mxu0 %v3885_v30 }
 0xdeb   :  { %5027 = vmatprep.subr.mxu0 %v8044_v46 }
 0xdec   :  { %5028 = vmatpush3.msra.mxu0 %v3884_v1 }
 0xded   :  { %5029 = vmatprep.subr.mxu0 %v8044_v46 }
 0xdee   :  { %5030 = vmatpush3.msra.mxu0 %v3883_v61 }
 0xdef   :  { %5031 = vmatprep.subr.mxu0 %v8044_v46 }
 0xdf0   :  { %5032 = vmatpush3.msra.mxu0 %v3882_v8 }
 0xdf1   :  { %5033 = vmatprep.subr.mxu0 %v8044_v46 }
 0xdf2   :  { %5034 = vmatpush3.msra.mxu0 %v3881_v28 }
 0xdf3   :  { %5035 = vmatprep.subr.mxu0 %v8044_v46 }
 0xdf4   :  { %5036 = vmatpush3.msra.mxu0 %v3880_v7 }
 0xdf5   :  { %5037 = vmatprep.subr.mxu0 %v8044_v46 }
 0xdf6   :  { %5038 = vmatpush3.msra.mxu0 %v3879_v25 }
 0xdf7   :  { %5039 = vmatprep.subr.mxu0 %v8044_v46 }
 0xdf8   :  { %5040 = vmatpush3.msra.mxu0 %v3878_v59 }
 0xdf9   :  { %5041 = vmatprep.subr.mxu0 %v8044_v46 }
 0xdfa   :  { %5042 = vmatpush3.msra.mxu0 %v3877_v42 }
 0xdfb   :  { %5043 = vmatprep.subr.mxu0 %v8044_v46 }
 0xdfc   :  { %5044 = vmatpush3.msra.mxu0 %v3876_v41 }
 0xdfd   :  { %5045 = vmatprep.subr.mxu0 %v8044_v46 }
 0xdfe   :  { %5046 = vmatpush3.msra.mxu0 %v3875_v40 }
 0xdff   :  { %5047 = vmatprep.subr.mxu0 %v8044_v46 }
 0xe00   :  { %5048 = vmatpush3.msra.mxu0 %v3874_v12 }
 0xea1   :  { %v3786_v32 = vpop.f32.mrf.mxu0  ;;  %v3862_v58 = vpop.f32.mrf.mxu1 }
 0xea2   :  { %v3863_v27 = vadd.f32 %v4018_v49, %v3862_v58  ;;  %v3787_v48 = vadd.f32 %v4017_v56, %v3786_v32 }
 0xea3   :  { %v4981_v44 = vpop.f32.mrf.mxu0  ;;  %v5016_v26 = vpop.f32.mrf.mxu1 }
 0xea4   :  { %v4019_v11 = vmul.f32 -1.442695, %v3863_v27 }
 0xea6   :  { %5259 = vpow2.f32 %v4019_v11 }
 0xea7   :  { %5261 = vtanh.f32 %v3787_v48 }
 0xeb3   :  { %v5260_v9 = vpop.eup %5259 }
 0xeb4   :  { %v3870_v2 = vadd.f32 1.0, %v5260_v9  ;;  %v5262_v46 = vpop.eup %5261 }
 0xeb6   :  { %5263 = vrcp.f32 %v3870_v2 }
 0xec3   :  { %v5264_v60 = vpop.eup %5263 }
 0xec4   :  { %v3873_v33 = vmul.f32 %v5264_v60, %v5262_v46 }
 0xec6   :  { %5050 = vmatmul.mubr.f32.vlgmr.msra.gmra.mxu0 %v3873_v33 }
 0xf86   :  { %v3963_v63 = vpop.f32.mrf.mxu0 }
 0xf87   :  { %v3964_v5 = vadd.f32 %v4020_v4, %v3963_v63 }
 0xf88   :  { %v5051_v52 = vpop.f32.mrf.mxu0 }
 0xf89   :  { %v4021_v35 = vmul.f32 -1.442695, %v3964_v5 }
 0xf8b   :  { %5265 = vpow2.f32 %v4021_v35 }
 0xf98   :  { %v5266_v3 = vpop.eup %5265 }
 0xf99   :  { %v3970_v37 = vadd.f32 1.0, %v5266_v3 }
 0xf9b   :  { %5267 = vrcp.f32 %v3970_v37 }
 0xfa8   :  { %v5268_v55 = vpop.eup %5267 }
 0xfa9   :  { %3973 = vst [vmem:[%s7945_s28] sm:$0xff] %v5268_v55 }
 0xfaa   :  { %3978 = vsyncpa [#allocation4], 1 }
 0xfab   :  { %3979 = vsyncpa [#allocation6], 1 }
 0xfac   :  { %3980 = vsyncpa [#allocation9], 1 }
 0xfad   :  { %3981 = vsyncpa [#allocation12], 1 }
 0xfae   :  { %3982 = vsyncpa [#allocation15], 1 }

</bundles_post_ra>
